<compile_context>
chip_gen: v7x
topology: tpu7x:2x2x1
jax: 0.10.0
libtpu: 0.0.40
codegen_flags: <defaults>
</compile_context>

<pallas_src>
import functools

import jax
import jax.numpy as jnp
from jax import lax
from jax.experimental import pallas as pl
from jax.experimental.pallas import tpu as pltpu

NEG_SLOPE = 0.01   # nn.LeakyReLU default
BN_EPS = 1e-5      # nn.BatchNorm2d default
_LANES = 128
_SUBLANES = 8


def _round_up(x, m):
    return (x + m - 1) // m * m


def _row_tile_for(h, target):
    """Largest divisor of h that is <= target (so tiles evenly cover the image)."""
    t = max(1, min(target, h))
    while h % t:
        t -= 1
    return t


# ---------------------------------------------------------------------------
# Pass 1: conv (9 shifted matmuls) + accumulate BN sum / sum-of-squares
# ---------------------------------------------------------------------------
def _conv_stats_kernel(xt_ref, w_ref, g_ref, b_ref,          # inputs
                       y_ref, scale_ref, shift_ref,          # outputs
                       sum_ref, ssq_ref,                     # VMEM scratch
                       *, w_img, w2, m_total):
    # xt_ref:   (1, L_in, Cip)  bf16 flattened row-tile (padded rows/cols, + halo)
    # w_ref:    (9, Cip, Cop)   bf16 conv taps, resident
    # g_ref/b_ref/scale_ref/shift_ref: (1, Cop) f32, resident
    # y_ref:    (1, L_out, Cop) pre-BN conv output for this tile
    step = pl.program_id(0)
    nsteps = pl.num_programs(0)
    l_out = y_ref.shape[1]
    cop = y_ref.shape[2]

    @pl.when(step == 0)
    def _init():
        sum_ref[...] = jnp.zeros_like(sum_ref)
        ssq_ref[...] = jnp.zeros_like(ssq_ref)

    # 3x3 conv as 9 row-shifted views of the same flattened tile (no im2col blob).
    acc = jnp.zeros((l_out, cop), jnp.float32)
    for dy in range(3):
        for dx in range(3):
            off = dy * w2 + dx
            lhs = xt_ref[0, off:off + l_out, :]               # (L_out, Cip) bf16
            acc = acc + jnp.dot(lhs, w_ref[dy * 3 + dx],
                                preferred_element_type=jnp.float32)

    # Rows whose padded column index is >= W are wrap-around garbage: exclude
    # them from the BatchNorm statistics (they are cropped from the output later).
    col = lax.broadcasted_iota(jnp.int32, (l_out, 1), 0) % w2
    valid = col < w_img
    acc_v = jnp.where(valid, acc, 0.0)
    sum_ref[...] += jnp.sum(acc_v, axis=0, keepdims=True)
    ssq_ref[...] += jnp.sum(acc_v * acc_v, axis=0, keepdims=True)

    y_ref[0] = acc.astype(y_ref.dtype)

    # Finalize global (over all N*H*W pixels) BN stats -> per-channel scale/shift.
    @pl.when(step == nsteps - 1)
    def _finalize():
        inv_m = jnp.float32(1.0 / m_total)
        mean = sum_ref[...] * inv_m
        var = jnp.maximum(ssq_ref[...] * inv_m - mean * mean, 0.0)
        scale = g_ref[...] * lax.rsqrt(var + BN_EPS)
        scale_ref[...] = scale
        shift_ref[...] = b_ref[...] - mean * scale


# ---------------------------------------------------------------------------
# Pass 2: y * scale + shift -> LeakyReLU  (per-channel scale/shift precomputed)
# ---------------------------------------------------------------------------
def _bn_lrelu_kernel(y_ref, scale_ref, shift_ref, o_ref):
    y = y_ref[0].astype(jnp.float32)
    z = y * scale_ref[...] + shift_ref[...]
    o_ref[0] = jnp.where(z >= 0, z, NEG_SLOPE * z).astype(o_ref.dtype)


# ---------------------------------------------------------------------------
# One (conv3x3 pad=1, no bias) -> BN -> LeakyReLU block.  NHWC in, NHWC out
# (output channels padded to a multiple of 128; extra channels are exactly 0).
# ---------------------------------------------------------------------------
def _conv_bn_lrelu(x_nhwc, w_hwio, gamma, beta, *,
                   row_tile=64, out_dtype=jnp.bfloat16,
                   compute_dtype=jnp.bfloat16):
    n, h, w, ci_x = x_nhwc.shape
    ci_w, co = w_hwio.shape[2], w_hwio.shape[3]
    assert ci_x >= ci_w

    cip = _round_up(ci_x, _SUBLANES)      # contraction dim (per conv tap)
    cop = _round_up(co, _LANES)           # lane-dense output channels
    # row_tile bounds VMEM per grid step:
    #   ~2*L_in*Cip*2B (input, dbl-buffered) + 2*L_out*Cop*2B (y) + 9*Cip*Cop*2B.
    # Keep well under ~24 MiB for v7x (64 MiB VMEM / 32 MiB scoped default);
    # v6e/v5e (128 MiB) can take larger tiles (raise vmem_limit_bytes if needed).
    th = _row_tile_for(h, row_tile)
    nt = h // th
    w2 = w + 2
    l_in = (th + 3) * w2                  # TH output rows + 3 halo/padded rows
    l_out = th * w2
    num_tiles = n * nt
    m_total = n * h * w

    # --- XLA-side prep (cheap, ~1x traffic): pad + overlapping row windows -----
    xb = x_nhwc.astype(compute_dtype)
    xp = jnp.pad(xb, ((0, 0), (1, 2), (1, 1), (0, cip - ci_x)))   # (N, H+3, W+2, Cip)
    xt = jnp.stack([xp[:, t * th: t * th + th + 3] for t in range(nt)], axis=1)
    xt = xt.reshape(num_tiles, l_in, cip)                         # flattened tiles

    wk = jnp.zeros((9, cip, cop), compute_dtype)
    wk = wk.at[:, :ci_w, :co].set(w_hwio.reshape(9, ci_w, co).astype(compute_dtype))
    g2 = jnp.zeros((1, cop), jnp.float32).at[0, :co].set(gamma.astype(jnp.float32))
    b2 = jnp.zeros((1, cop), jnp.float32).at[0, :co].set(beta.astype(jnp.float32))

    # --- pass 1: conv + global BN statistics ----------------------------------
    kernel1 = functools.partial(_conv_stats_kernel, w_img=w, w2=w2, m_total=m_total)
    y, scale, shift = pl.pallas_call(
        kernel1,
        grid=(num_tiles,),
        in_specs=[
            pl.BlockSpec((1, l_in, cip), lambda t: (t, 0, 0)),    # activation tile
            pl.BlockSpec((9, cip, cop), lambda t: (0, 0, 0)),     # weights, resident
            pl.BlockSpec((1, cop), lambda t: (0, 0)),             # gamma, resident
            pl.BlockSpec((1, cop), lambda t: (0, 0)),             # beta, resident
        ],
        out_specs=[
            pl.BlockSpec((1, l_out, cop), lambda t: (t, 0, 0)),
            pl.BlockSpec((1, cop), lambda t: (0, 0)),
            pl.BlockSpec((1, cop), lambda t: (0, 0)),
        ],
        out_shape=[
            jax.ShapeDtypeStruct((num_tiles, l_out, cop), compute_dtype),
            jax.ShapeDtypeStruct((1, cop), jnp.float32),
            jax.ShapeDtypeStruct((1, cop), jnp.float32),
        ],
        scratch_shapes=[pltpu.VMEM((1, cop), jnp.float32),
                        pltpu.VMEM((1, cop), jnp.float32)],
        compiler_params=pltpu.CompilerParams(
            dimension_semantics=("arbitrary",)),                  # stats carry
    )(xt, wk, g2, b2)

    # --- pass 2: normalize + LeakyReLU (pure elementwise, parallel axis) -------
    out = pl.pallas_call(
        _bn_lrelu_kernel,
        grid=(num_tiles,),
        in_specs=[
            pl.BlockSpec((1, l_out, cop), lambda t: (t, 0, 0)),
            pl.BlockSpec((1, cop), lambda t: (0, 0)),
            pl.BlockSpec((1, cop), lambda t: (0, 0)),
        ],
        out_specs=pl.BlockSpec((1, l_out, cop), lambda t: (t, 0, 0)),
        out_shape=jax.ShapeDtypeStruct((num_tiles, l_out, cop), out_dtype),
        compiler_params=pltpu.CompilerParams(
            dimension_semantics=("parallel",)),
    )(y, scale, shift)

    # (num_tiles, L_out, Cop) -> (N, H, W, Cop): drop the 2 wrap-around columns.
    out = out.reshape(n, nt, th, w2, cop)[:, :, :, :w, :].reshape(n, h, w, cop)
    return out


def double_conv(x_nchw, params, *, row_tile=64):
    """DoubleConv forward. Input/output NCHW, same semantics as the PyTorch module."""
    x = jnp.transpose(x_nchw, (0, 2, 3, 1))                       # NCHW -> NHWC
    # TODO(synk): optionally fuse the two conv blocks per spatial tile (keep `h`
    # in VMEM) to avoid its HBM round-trip; needs the stats pass to span both convs.
    h = _conv_bn_lrelu(x, params["w1"], params["g1"], params["b1"],
                       row_tile=row_tile, out_dtype=jnp.bfloat16)
    # h carries 128-padded channels; the pads are exactly 0 and the second conv's
    # padded weight rows are 0, so it can be fed straight into block 2.
    y = _conv_bn_lrelu(h, params["w2"], params["g2"], params["b2"],
                       row_tile=row_tile, out_dtype=jnp.float32)
    y = y[..., :params["w2"].shape[-1]]                           # crop channel pad
    return jnp.transpose(y, (0, 3, 1, 2))                         # NHWC -> NCHW


# ---------------------------------------------------------------------------
# Deterministic parameter init (shapes from DoubleConv.__init__)
# ---------------------------------------------------------------------------
def init_params(key, in_channels, out_channels, mid_channels=None):
    if not mid_channels:
        mid_channels = out_channels
    k1, k2 = jax.random.split(key)

    def conv_w(k, ci, co):
        bound = 1.0 / (ci * 9) ** 0.5
        return jax.random.uniform(k, (3, 3, ci, co), jnp.float32, -bound, bound)

    return dict(
        w1=conv_w(k1, in_channels, mid_channels),
        g1=jnp.ones((mid_channels,), jnp.float32),
        b1=jnp.zeros((mid_channels,), jnp.float32),
        w2=conv_w(k2, mid_channels, out_channels),
        g2=jnp.ones((out_channels,), jnp.float32),
        b2=jnp.zeros((out_channels,), jnp.float32),
    )


# ---------------------------------------------------------------------------
# Pure-JAX f32 reference (PyTorch training-mode forward semantics)
# ---------------------------------------------------------------------------
def _ref_double_conv(x_nchw, params):
    def block(x, w, g, b):
        y = lax.conv_general_dilated(
            x, w, window_strides=(1, 1), padding="SAME",
            dimension_numbers=("NCHW", "HWIO", "NCHW"))
        mean = y.mean(axis=(0, 2, 3), keepdims=True)
        var = ((y - mean) ** 2).mean(axis=(0, 2, 3), keepdims=True)
        yn = (y - mean) * lax.rsqrt(var + BN_EPS)
        yn = yn * g.reshape(1, -1, 1, 1) + b.reshape(1, -1, 1, 1)
        return jnp.where(yn >= 0, yn, NEG_SLOPE * yn)

    h = block(x_nchw, params["w1"], params["g1"], params["b1"])
    return block(h, params["w2"], params["g2"], params["b2"])


if __name__ == "__main__":
    key = jax.random.PRNGKey(0)
    kx, kp = jax.random.split(key)

    N, Cin, H, W = 2, 4, 16, 16
    Cout = 8  # mid_channels defaults to out_channels

    x = jax.random.normal(kx, (N, Cin, H, W), jnp.float32)
    params = init_params(kp, Cin, Cout)

    fwd = jax.jit(functools.partial(double_conv, row_tile=8))   # 2 row-tiles per image
    out = jax.block_until_ready(fwd(x, params))
    assert out.shape == (N, Cout, H, W), out.shape

    ref = jax.block_until_ready(_ref_double_conv(x, params))
    max_err = float(jnp.max(jnp.abs(out - ref)))
    # Kernel uses bf16 MXU operands (f32 accumulation / BN math) vs an all-f32
    # reference; observed error is at the ~1e-2 scale, real bugs are O(1).
    assert max_err < 1e-1, f"mismatch vs reference: {max_err}"

    print("KERNEL_OK")
</pallas_src>

<mosaic_0001>
module attributes {stable_mosaic.version = 11 : i64} {
  func.func @_conv_stats_kernel(%arg0: i32, %arg1: memref<1x198x8xbf16, #tpu.memory_space<vmem>>, %arg2: memref<9x8x128xbf16, #tpu.memory_space<vmem>>, %arg3: memref<1x128xf32, #tpu.memory_space<vmem>>, %arg4: memref<1x128xf32, #tpu.memory_space<vmem>>, %arg5: memref<1x144x128xbf16, #tpu.memory_space<vmem>>, %arg6: memref<1x128xf32, #tpu.memory_space<vmem>>, %arg7: memref<1x128xf32, #tpu.memory_space<vmem>>, %arg8: memref<1x128xf32, #tpu.memory_space<vmem>>, %arg9: memref<1x128xf32, #tpu.memory_space<vmem>>) attributes {dimension_semantics = [#tpu.dimension_semantics<arbitrary>], iteration_bounds = array<i64: 4>, scalar_prefetch = 0 : i64, scratch_operands = 2 : i64, tpu.core_type = #tpu.core_type<tc>, window_params = [{transform_indices = @transform_0, window_bounds = array<i64: 1, 198, 8>}, {pipeline_mode = #tpu.pipeline_mode<synchronous>, transform_indices = @transform_1, window_bounds = array<i64: 9, 8, 128>}, {pipeline_mode = #tpu.pipeline_mode<synchronous>, transform_indices = @transform_2, window_bounds = array<i64: 1, 128>}, {pipeline_mode = #tpu.pipeline_mode<synchronous>, transform_indices = @transform_3, window_bounds = array<i64: 1, 128>}, {transform_indices = @transform_4, window_bounds = array<i64: 1, 144, 128>}, {pipeline_mode = #tpu.pipeline_mode<synchronous>, transform_indices = @transform_5, window_bounds = array<i64: 1, 128>}, {pipeline_mode = #tpu.pipeline_mode<synchronous>, transform_indices = @transform_6, window_bounds = array<i64: 1, 128>}]} {
    %c0_i32 = arith.constant 0 : i32
    %0 = arith.cmpi eq, %arg0, %c0_i32 : i32
    %1 = arith.extui %0 : i1 to i32
    %c0_i32_0 = arith.constant 0 : i32
    %2 = arith.cmpi ne, %1, %c0_i32_0 : i32
    scf.if %2 {
      %cst_68 = arith.constant 0.000000e+00 : f32
      %99 = vector.broadcast %cst_68 : f32 to vector<1x128xf32>
      %c0_69 = arith.constant 0 : index
      %c0_70 = arith.constant 0 : index
      %100 = vector.load %arg8[%c0_69, %c0_70] : memref<1x128xf32, #tpu.memory_space<vmem>>, vector<1x128xf32>
      tpu.vector_store %arg8[%c0_69, %c0_70], %99 {strides = array<i32>} : memref<1x128xf32, #tpu.memory_space<vmem>>, vector<1x128xf32>,
      %cst_71 = arith.constant 0.000000e+00 : f32
      %101 = vector.broadcast %cst_71 : f32 to vector<1x128xf32>
      %c0_72 = arith.constant 0 : index
      %c0_73 = arith.constant 0 : index
      %102 = vector.load %arg9[%c0_72, %c0_73] : memref<1x128xf32, #tpu.memory_space<vmem>>, vector<1x128xf32>
      tpu.vector_store %arg9[%c0_72, %c0_73], %101 {strides = array<i32>} : memref<1x128xf32, #tpu.memory_space<vmem>>, vector<1x128xf32>,
    } else {
    }
    %cst = arith.constant 0.000000e+00 : f32
    %3 = vector.broadcast %cst : f32 to vector<144x128xf32>
    %c0 = arith.constant 0 : index
    %c0_1 = arith.constant 0 : index
    %c0_2 = arith.constant 0 : index
    %4 = vector.load %arg1[%c0, %c0_1, %c0_2] : memref<1x198x8xbf16, #tpu.memory_space<vmem>>, vector<1x144x8xbf16>
    %5 = vector.shape_cast %4 : vector<1x144x8xbf16> to vector<144x8xbf16>
    %c0_3 = arith.constant 0 : index
    %c0_4 = arith.constant 0 : index
    %c0_5 = arith.constant 0 : index
    %6 = vector.load %arg2[%c0_3, %c0_4, %c0_5] : memref<9x8x128xbf16, #tpu.memory_space<vmem>>, vector<1x8x128xbf16>
    %7 = vector.shape_cast %6 : vector<1x8x128xbf16> to vector<8x128xbf16>
    %cst_6 = arith.constant dense<0.000000e+00> : vector<144x128xf32>
    %8 = tpu.matmul %5, %7, %cst_6 {dimension_numbers = #tpu.dot_dimension_numbers<[1], [0], [0], [1], [0, 0, 1, 1], [], []>} : vector<144x8xbf16>, vector<8x128xbf16>, vector<144x128xf32> -> vector<144x128xf32>
    %9 = arith.addf %3, %8 : vector<144x128xf32>
    %c0_7 = arith.constant 0 : index
    %c1 = arith.constant 1 : index
    %c0_8 = arith.constant 0 : index
    %10 = vector.load %arg1[%c0_7, %c1, %c0_8] : memref<1x198x8xbf16, #tpu.memory_space<vmem>>, vector<1x144x8xbf16>
    %11 = vector.shape_cast %10 : vector<1x144x8xbf16> to vector<144x8xbf16>
    %c1_9 = arith.constant 1 : index
    %c0_10 = arith.constant 0 : index
    %c0_11 = arith.constant 0 : index
    %12 = vector.load %arg2[%c1_9, %c0_10, %c0_11] : memref<9x8x128xbf16, #tpu.memory_space<vmem>>, vector<1x8x128xbf16>
    %13 = vector.shape_cast %12 : vector<1x8x128xbf16> to vector<8x128xbf16>
    %cst_12 = arith.constant dense<0.000000e+00> : vector<144x128xf32>
    %14 = tpu.matmul %11, %13, %cst_12 {dimension_numbers = #tpu.dot_dimension_numbers<[1], [0], [0], [1], [0, 0, 1, 1], [], []>} : vector<144x8xbf16>, vector<8x128xbf16>, vector<144x128xf32> -> vector<144x128xf32>
    %15 = arith.addf %9, %14 : vector<144x128xf32>
    %c0_13 = arith.constant 0 : index
    %c2 = arith.constant 2 : index
    %c0_14 = arith.constant 0 : index
    %16 = vector.load %arg1[%c0_13, %c2, %c0_14] : memref<1x198x8xbf16, #tpu.memory_space<vmem>>, vector<1x144x8xbf16>
    %17 = vector.shape_cast %16 : vector<1x144x8xbf16> to vector<144x8xbf16>
    %c2_15 = arith.constant 2 : index
    %c0_16 = arith.constant 0 : index
    %c0_17 = arith.constant 0 : index
    %18 = vector.load %arg2[%c2_15, %c0_16, %c0_17] : memref<9x8x128xbf16, #tpu.memory_space<vmem>>, vector<1x8x128xbf16>
    %19 = vector.shape_cast %18 : vector<1x8x128xbf16> to vector<8x128xbf16>
    %cst_18 = arith.constant dense<0.000000e+00> : vector<144x128xf32>
    %20 = tpu.matmul %17, %19, %cst_18 {dimension_numbers = #tpu.dot_dimension_numbers<[1], [0], [0], [1], [0, 0, 1, 1], [], []>} : vector<144x8xbf16>, vector<8x128xbf16>, vector<144x128xf32> -> vector<144x128xf32>
    %21 = arith.addf %15, %20 : vector<144x128xf32>
    %c0_19 = arith.constant 0 : index
    %c18 = arith.constant 18 : index
    %c0_20 = arith.constant 0 : index
    %22 = vector.load %arg1[%c0_19, %c18, %c0_20] : memref<1x198x8xbf16, #tpu.memory_space<vmem>>, vector<1x144x8xbf16>
    %23 = vector.shape_cast %22 : vector<1x144x8xbf16> to vector<144x8xbf16>
    %c3 = arith.constant 3 : index
    %c0_21 = arith.constant 0 : index
    %c0_22 = arith.constant 0 : index
    %24 = vector.load %arg2[%c3, %c0_21, %c0_22] : memref<9x8x128xbf16, #tpu.memory_space<vmem>>, vector<1x8x128xbf16>
    %25 = vector.shape_cast %24 : vector<1x8x128xbf16> to vector<8x128xbf16>
    %cst_23 = arith.constant dense<0.000000e+00> : vector<144x128xf32>
    %26 = tpu.matmul %23, %25, %cst_23 {dimension_numbers = #tpu.dot_dimension_numbers<[1], [0], [0], [1], [0, 0, 1, 1], [], []>} : vector<144x8xbf16>, vector<8x128xbf16>, vector<144x128xf32> -> vector<144x128xf32>
    %27 = arith.addf %21, %26 : vector<144x128xf32>
    %c0_24 = arith.constant 0 : index
    %c19 = arith.constant 19 : index
    %c0_25 = arith.constant 0 : index
    %28 = vector.load %arg1[%c0_24, %c19, %c0_25] : memref<1x198x8xbf16, #tpu.memory_space<vmem>>, vector<1x144x8xbf16>
    %29 = vector.shape_cast %28 : vector<1x144x8xbf16> to vector<144x8xbf16>
    %c4 = arith.constant 4 : index
    %c0_26 = arith.constant 0 : index
    %c0_27 = arith.constant 0 : index
    %30 = vector.load %arg2[%c4, %c0_26, %c0_27] : memref<9x8x128xbf16, #tpu.memory_space<vmem>>, vector<1x8x128xbf16>
    %31 = vector.shape_cast %30 : vector<1x8x128xbf16> to vector<8x128xbf16>
    %cst_28 = arith.constant dense<0.000000e+00> : vector<144x128xf32>
    %32 = tpu.matmul %29, %31, %cst_28 {dimension_numbers = #tpu.dot_dimension_numbers<[1], [0], [0], [1], [0, 0, 1, 1], [], []>} : vector<144x8xbf16>, vector<8x128xbf16>, vector<144x128xf32> -> vector<144x128xf32>
    %33 = arith.addf %27, %32 : vector<144x128xf32>
    %c0_29 = arith.constant 0 : index
    %c20 = arith.constant 20 : index
    %c0_30 = arith.constant 0 : index
    %34 = vector.load %arg1[%c0_29, %c20, %c0_30] : memref<1x198x8xbf16, #tpu.memory_space<vmem>>, vector<1x144x8xbf16>
    %35 = vector.shape_cast %34 : vector<1x144x8xbf16> to vector<144x8xbf16>
    %c5 = arith.constant 5 : index
    %c0_31 = arith.constant 0 : index
    %c0_32 = arith.constant 0 : index
    %36 = vector.load %arg2[%c5, %c0_31, %c0_32] : memref<9x8x128xbf16, #tpu.memory_space<vmem>>, vector<1x8x128xbf16>
    %37 = vector.shape_cast %36 : vector<1x8x128xbf16> to vector<8x128xbf16>
    %cst_33 = arith.constant dense<0.000000e+00> : vector<144x128xf32>
    %38 = tpu.matmul %35, %37, %cst_33 {dimension_numbers = #tpu.dot_dimension_numbers<[1], [0], [0], [1], [0, 0, 1, 1], [], []>} : vector<144x8xbf16>, vector<8x128xbf16>, vector<144x128xf32> -> vector<144x128xf32>
    %39 = arith.addf %33, %38 : vector<144x128xf32>
    %c0_34 = arith.constant 0 : index
    %c36 = arith.constant 36 : index
    %c0_35 = arith.constant 0 : index
    %40 = vector.load %arg1[%c0_34, %c36, %c0_35] : memref<1x198x8xbf16, #tpu.memory_space<vmem>>, vector<1x144x8xbf16>
    %41 = vector.shape_cast %40 : vector<1x144x8xbf16> to vector<144x8xbf16>
    %c6 = arith.constant 6 : index
    %c0_36 = arith.constant 0 : index
    %c0_37 = arith.constant 0 : index
    %42 = vector.load %arg2[%c6, %c0_36, %c0_37] : memref<9x8x128xbf16, #tpu.memory_space<vmem>>, vector<1x8x128xbf16>
    %43 = vector.shape_cast %42 : vector<1x8x128xbf16> to vector<8x128xbf16>
    %cst_38 = arith.constant dense<0.000000e+00> : vector<144x128xf32>
    %44 = tpu.matmul %41, %43, %cst_38 {dimension_numbers = #tpu.dot_dimension_numbers<[1], [0], [0], [1], [0, 0, 1, 1], [], []>} : vector<144x8xbf16>, vector<8x128xbf16>, vector<144x128xf32> -> vector<144x128xf32>
    %45 = arith.addf %39, %44 : vector<144x128xf32>
    %c0_39 = arith.constant 0 : index
    %c37 = arith.constant 37 : index
    %c0_40 = arith.constant 0 : index
    %46 = vector.load %arg1[%c0_39, %c37, %c0_40] : memref<1x198x8xbf16, #tpu.memory_space<vmem>>, vector<1x144x8xbf16>
    %47 = vector.shape_cast %46 : vector<1x144x8xbf16> to vector<144x8xbf16>
    %c7 = arith.constant 7 : index
    %c0_41 = arith.constant 0 : index
    %c0_42 = arith.constant 0 : index
    %48 = vector.load %arg2[%c7, %c0_41, %c0_42] : memref<9x8x128xbf16, #tpu.memory_space<vmem>>, vector<1x8x128xbf16>
    %49 = vector.shape_cast %48 : vector<1x8x128xbf16> to vector<8x128xbf16>
    %cst_43 = arith.constant dense<0.000000e+00> : vector<144x128xf32>
    %50 = tpu.matmul %47, %49, %cst_43 {dimension_numbers = #tpu.dot_dimension_numbers<[1], [0], [0], [1], [0, 0, 1, 1], [], []>} : vector<144x8xbf16>, vector<8x128xbf16>, vector<144x128xf32> -> vector<144x128xf32>
    %51 = arith.addf %45, %50 : vector<144x128xf32>
    %c0_44 = arith.constant 0 : index
    %c38 = arith.constant 38 : index
    %c0_45 = arith.constant 0 : index
    %52 = vector.load %arg1[%c0_44, %c38, %c0_45] : memref<1x198x8xbf16, #tpu.memory_space<vmem>>, vector<1x144x8xbf16>
    %53 = vector.shape_cast %52 : vector<1x144x8xbf16> to vector<144x8xbf16>
    %c8 = arith.constant 8 : index
    %c0_46 = arith.constant 0 : index
    %c0_47 = arith.constant 0 : index
    %54 = vector.load %arg2[%c8, %c0_46, %c0_47] : memref<9x8x128xbf16, #tpu.memory_space<vmem>>, vector<1x8x128xbf16>
    %55 = vector.shape_cast %54 : vector<1x8x128xbf16> to vector<8x128xbf16>
    %cst_48 = arith.constant dense<0.000000e+00> : vector<144x128xf32>
    %56 = tpu.matmul %53, %55, %cst_48 {dimension_numbers = #tpu.dot_dimension_numbers<[1], [0], [0], [1], [0, 0, 1, 1], [], []>} : vector<144x8xbf16>, vector<8x128xbf16>, vector<144x128xf32> -> vector<144x128xf32>
    %57 = arith.addf %51, %56 : vector<144x128xf32>
    %58 = tpu.iota {dimensions = array<i32: 0>} : vector<144x1xi32>
    %c18_i32 = arith.constant 18 : i32
    %c0_i32_49 = arith.constant 0 : i32
    %59 = arith.cmpi eq, %c18_i32, %c0_i32_49 : i32
    %c1_i32 = arith.constant 1 : i32
    %60 = arith.select %59, %c1_i32, %c18_i32 : i32
    %61 = vector.broadcast %60 : i32 to vector<144x1xi32>
    %62 = arith.remsi %58, %61 : vector<144x1xi32>
    %c0_i32_50 = arith.constant 0 : i32
    %63 = vector.broadcast %c0_i32_50 : i32 to vector<144x1xi32>
    %64 = arith.cmpi ne, %62, %63 : vector<144x1xi32>
    %c0_i32_51 = arith.constant 0 : i32
    %65 = vector.broadcast %c0_i32_51 : i32 to vector<144x1xi32>
    %66 = arith.cmpi slt, %62, %65 : vector<144x1xi32>
    %c0_i32_52 = arith.constant 0 : i32
    %67 = arith.cmpi slt, %60, %c0_i32_52 : i32
    %68 = vector.broadcast %67 : i1 to vector<144x1xi1>
    %69 = vector.broadcast %68 : vector<144x1xi1> to vector<144x1xi1>
    %70 = arith.xori %66, %69 : vector<144x1xi1>
    %71 = arith.andi %70, %64 : vector<144x1xi1>
    %72 = vector.broadcast %60 : i32 to vector<144x1xi32>
    %73 = arith.addi %62, %72 : vector<144x1xi32>
    %74 = arith.select %71, %73, %62 : vector<144x1xi1>, vector<144x1xi32>
    %c16_i32 = arith.constant 16 : i32
    %75 = vector.broadcast %c16_i32 : i32 to vector<144x1xi32>
    %76 = arith.cmpi slt, %74, %75 : vector<144x1xi32>
    %cst_53 = arith.constant 0.000000e+00 : f32
    %77 = vector.shape_cast %76 : vector<144x1xi1> to vector<144x1xi1>
    %78 = vector.broadcast %77 : vector<144x1xi1> to vector<144x128xi1>
    %79 = vector.broadcast %cst_53 : f32 to vector<144x128xf32>
    %80 = arith.select %78, %57, %79 : vector<144x128xi1>, vector<144x128xf32>
    %c0_54 = arith.constant 0 : index
    %c0_55 = arith.constant 0 : index
    %81 = vector.load %arg8[%c0_54, %c0_55] : memref<1x128xf32, #tpu.memory_space<vmem>>, vector<1x128xf32>
    %cst_56 = arith.constant dense<0.000000e+00> : vector<128xf32>
    %82 = vector.multi_reduction <add>, %80, %cst_56 [0] : vector<144x128xf32> to vector<128xf32>
    %83 = vector.shape_cast %82 : vector<128xf32> to vector<1x128xf32>
    %84 = arith.addf %81, %83 : vector<1x128xf32>
    %c0_57 = arith.constant 0 : index
    %c0_58 = arith.constant 0 : index
    %85 = vector.load %arg8[%c0_57, %c0_58] : memref<1x128xf32, #tpu.memory_space<vmem>>, vector<1x128xf32>
    tpu.vector_store %arg8[%c0_57, %c0_58], %84 {strides = array<i32>} : memref<1x128xf32, #tpu.memory_space<vmem>>, vector<1x128xf32>,
    %c0_59 = arith.constant 0 : index
    %c0_60 = arith.constant 0 : index
    %86 = vector.load %arg9[%c0_59, %c0_60] : memref<1x128xf32, #tpu.memory_space<vmem>>, vector<1x128xf32>
    %87 = arith.mulf %80, %80 : vector<144x128xf32>
    %cst_61 = arith.constant dense<0.000000e+00> : vector<128xf32>
    %88 = vector.multi_reduction <add>, %87, %cst_61 [0] : vector<144x128xf32> to vector<128xf32>
    %89 = vector.shape_cast %88 : vector<128xf32> to vector<1x128xf32>
    %90 = arith.addf %86, %89 : vector<1x128xf32>
    %c0_62 = arith.constant 0 : index
    %c0_63 = arith.constant 0 : index
    %91 = vector.load %arg9[%c0_62, %c0_63] : memref<1x128xf32, #tpu.memory_space<vmem>>, vector<1x128xf32>
    tpu.vector_store %arg9[%c0_62, %c0_63], %90 {strides = array<i32>} : memref<1x128xf32, #tpu.memory_space<vmem>>, vector<1x128xf32>,
    %92 = arith.truncf %57 : vector<144x128xf32> to vector<144x128xbf16>
    %c0_64 = arith.constant 0 : index
    %c0_65 = arith.constant 0 : index
    %c0_66 = arith.constant 0 : index
    %93 = vector.load %arg5[%c0_64, %c0_65, %c0_66] : memref<1x144x128xbf16, #tpu.memory_space<vmem>>, vector<1x144x128xbf16>
    %94 = vector.shape_cast %93 : vector<1x144x128xbf16> to vector<144x128xbf16>
    %95 = vector.shape_cast %92 : vector<144x128xbf16> to vector<1x144x128xbf16>
    tpu.vector_store %arg5[%c0_64, %c0_65, %c0_66], %95 {strides = array<i32>} : memref<1x144x128xbf16, #tpu.memory_space<vmem>>, vector<1x144x128xbf16>,
    %c3_i32 = arith.constant 3 : i32
    %96 = arith.cmpi eq, %arg0, %c3_i32 : i32
    %97 = arith.extui %96 : i1 to i32
    %c0_i32_67 = arith.constant 0 : i32
    %98 = arith.cmpi ne, %97, %c0_i32_67 : i32
    scf.if %98 {
      %c0_68 = arith.constant 0 : index
      %c0_69 = arith.constant 0 : index
      %99 = vector.load %arg8[%c0_68, %c0_69] : memref<1x128xf32, #tpu.memory_space<vmem>>, vector<1x128xf32>
      %cst_70 = arith.constant 0.001953125 : f32
      %100 = vector.broadcast %cst_70 : f32 to vector<1x128xf32>
      %101 = arith.mulf %99, %100 : vector<1x128xf32>
      %c0_71 = arith.constant 0 : index
      %c0_72 = arith.constant 0 : index
      %102 = vector.load %arg9[%c0_71, %c0_72] : memref<1x128xf32, #tpu.memory_space<vmem>>, vector<1x128xf32>
      %cst_73 = arith.constant 0.001953125 : f32
      %103 = vector.broadcast %cst_73 : f32 to vector<1x128xf32>
      %104 = arith.mulf %102, %103 : vector<1x128xf32>
      %105 = arith.mulf %101, %101 : vector<1x128xf32>
      %106 = arith.subf %104, %105 : vector<1x128xf32>
      %cst_74 = arith.constant 0.000000e+00 : f32
      %107 = vector.broadcast %cst_74 : f32 to vector<1x128xf32>
      %108 = arith.maximumf %106, %107 : vector<1x128xf32>
      %c0_75 = arith.constant 0 : index
      %c0_76 = arith.constant 0 : index
      %109 = vector.load %arg3[%c0_75, %c0_76] : memref<1x128xf32, #tpu.memory_space<vmem>>, vector<1x128xf32>
      %cst_77 = arith.constant 9.99999974E-6 : f32
      %110 = vector.broadcast %cst_77 : f32 to vector<1x128xf32>
      %111 = arith.addf %108, %110 : vector<1x128xf32>
      %112 = math.rsqrt %111 : vector<1x128xf32>
      %113 = arith.mulf %109, %112 : vector<1x128xf32>
      %c0_78 = arith.constant 0 : index
      %c0_79 = arith.constant 0 : index
      %114 = vector.load %arg6[%c0_78, %c0_79] : memref<1x128xf32, #tpu.memory_space<vmem>>, vector<1x128xf32>
      tpu.vector_store %arg6[%c0_78, %c0_79], %113 {strides = array<i32>} : memref<1x128xf32, #tpu.memory_space<vmem>>, vector<1x128xf32>,
      %c0_80 = arith.constant 0 : index
      %c0_81 = arith.constant 0 : index
      %115 = vector.load %arg4[%c0_80, %c0_81] : memref<1x128xf32, #tpu.memory_space<vmem>>, vector<1x128xf32>
      %116 = arith.mulf %101, %113 : vector<1x128xf32>
      %117 = arith.subf %115, %116 : vector<1x128xf32>
      %c0_82 = arith.constant 0 : index
      %c0_83 = arith.constant 0 : index
      %118 = vector.load %arg7[%c0_82, %c0_83] : memref<1x128xf32, #tpu.memory_space<vmem>>, vector<1x128xf32>
      tpu.vector_store %arg7[%c0_82, %c0_83], %117 {strides = array<i32>} : memref<1x128xf32, #tpu.memory_space<vmem>>, vector<1x128xf32>,
    } else {
    }
    return
  }
  func.func @transform_0(%arg0: i32) -> (i32, i32, i32) {
    %c0_i32 = arith.constant 0 : i32
    %c0_i32_0 = arith.constant 0 : i32
    %c0_i32_1 = arith.constant 0 : i32
    return %arg0, %c0_i32, %c0_i32_0 : i32, i32, i32
  }
  func.func @transform_1(%arg0: i32) -> (i32, i32, i32) {
    %c0_i32 = arith.constant 0 : i32
    %c0_i32_0 = arith.constant 0 : i32
    %c0_i32_1 = arith.constant 0 : i32
    %c0_i32_2 = arith.constant 0 : i32
    return %c0_i32, %c0_i32_0, %c0_i32_1 : i32, i32, i32
  }
  func.func @transform_2(%arg0: i32) -> (i32, i32) {
    %c0_i32 = arith.constant 0 : i32
    %c0_i32_0 = arith.constant 0 : i32
    %c0_i32_1 = arith.constant 0 : i32
    return %c0_i32, %c0_i32_0 : i32, i32
  }
  func.func @transform_3(%arg0: i32) -> (i32, i32) {
    %c0_i32 = arith.constant 0 : i32
    %c0_i32_0 = arith.constant 0 : i32
    %c0_i32_1 = arith.constant 0 : i32
    return %c0_i32, %c0_i32_0 : i32, i32
  }
  func.func @transform_4(%arg0: i32) -> (i32, i32, i32) {
    %c0_i32 = arith.constant 0 : i32
    %c0_i32_0 = arith.constant 0 : i32
    %c0_i32_1 = arith.constant 0 : i32
    return %arg0, %c0_i32, %c0_i32_0 : i32, i32, i32
  }
  func.func @transform_5(%arg0: i32) -> (i32, i32) {
    %c0_i32 = arith.constant 0 : i32
    %c0_i32_0 = arith.constant 0 : i32
    %c0_i32_1 = arith.constant 0 : i32
    return %c0_i32, %c0_i32_0 : i32, i32
  }
  func.func @transform_6(%arg0: i32) -> (i32, i32) {
    %c0_i32 = arith.constant 0 : i32
    %c0_i32_0 = arith.constant 0 : i32
    %c0_i32_1 = arith.constant 0 : i32
    return %c0_i32, %c0_i32_0 : i32, i32
  }
}

module attributes {stable_mosaic.version = 11 : i64} {
  func.func @_bn_lrelu_kernel(%arg0: i32, %arg1: memref<1x144x128xbf16, #tpu.memory_space<vmem>>, %arg2: memref<1x128xf32, #tpu.memory_space<vmem>>, %arg3: memref<1x128xf32, #tpu.memory_space<vmem>>, %arg4: memref<1x144x128xbf16, #tpu.memory_space<vmem>>) attributes {dimension_semantics = [#tpu.dimension_semantics<parallel>], iteration_bounds = array<i64: 4>, scalar_prefetch = 0 : i64, scratch_operands = 0 : i64, tpu.core_type = #tpu.core_type<tc>, window_params = [{transform_indices = @transform_0, window_bounds = array<i64: 1, 144, 128>}, {pipeline_mode = #tpu.pipeline_mode<synchronous>, transform_indices = @transform_1, window_bounds = array<i64: 1, 128>}, {pipeline_mode = #tpu.pipeline_mode<synchronous>, transform_indices = @transform_2, window_bounds = array<i64: 1, 128>}, {transform_indices = @transform_3, window_bounds = array<i64: 1, 144, 128>}]} {
    %c0 = arith.constant 0 : index
    %c0_0 = arith.constant 0 : index
    %c0_1 = arith.constant 0 : index
    %0 = vector.load %arg1[%c0, %c0_0, %c0_1] : memref<1x144x128xbf16, #tpu.memory_space<vmem>>, vector<1x144x128xbf16>
    %1 = vector.shape_cast %0 : vector<1x144x128xbf16> to vector<144x128xbf16>
    %2 = arith.extf %1 : vector<144x128xbf16> to vector<144x128xf32>
    %c0_2 = arith.constant 0 : index
    %c0_3 = arith.constant 0 : index
    %3 = vector.load %arg2[%c0_2, %c0_3] : memref<1x128xf32, #tpu.memory_space<vmem>>, vector<1x128xf32>
    %4 = vector.broadcast %3 : vector<1x128xf32> to vector<144x128xf32>
    %5 = arith.mulf %2, %4 : vector<144x128xf32>
    %c0_4 = arith.constant 0 : index
    %c0_5 = arith.constant 0 : index
    %6 = vector.load %arg3[%c0_4, %c0_5] : memref<1x128xf32, #tpu.memory_space<vmem>>, vector<1x128xf32>
    %7 = vector.broadcast %6 : vector<1x128xf32> to vector<144x128xf32>
    %8 = arith.addf %5, %7 : vector<144x128xf32>
    %cst = arith.constant 0.000000e+00 : f32
    %9 = vector.broadcast %cst : f32 to vector<144x128xf32>
    %10 = arith.cmpf oge, %8, %9 : vector<144x128xf32>
    %cst_6 = arith.constant 0.00999999977 : f32
    %11 = vector.broadcast %cst_6 : f32 to vector<144x128xf32>
    %12 = arith.mulf %11, %8 : vector<144x128xf32>
    %13 = arith.select %10, %8, %12 : vector<144x128xi1>, vector<144x128xf32>
    %14 = arith.truncf %13 : vector<144x128xf32> to vector<144x128xbf16>
    %c0_7 = arith.constant 0 : index
    %c0_8 = arith.constant 0 : index
    %c0_9 = arith.constant 0 : index
    %15 = vector.load %arg4[%c0_7, %c0_8, %c0_9] : memref<1x144x128xbf16, #tpu.memory_space<vmem>>, vector<1x144x128xbf16>
    %16 = vector.shape_cast %15 : vector<1x144x128xbf16> to vector<144x128xbf16>
    %17 = vector.shape_cast %14 : vector<144x128xbf16> to vector<1x144x128xbf16>
    tpu.vector_store %arg4[%c0_7, %c0_8, %c0_9], %17 {strides = array<i32>} : memref<1x144x128xbf16, #tpu.memory_space<vmem>>, vector<1x144x128xbf16>,
    return
  }
  func.func @transform_0(%arg0: i32) -> (i32, i32, i32) {
    %c0_i32 = arith.constant 0 : i32
    %c0_i32_0 = arith.constant 0 : i32
    %c0_i32_1 = arith.constant 0 : i32
    return %arg0, %c0_i32, %c0_i32_0 : i32, i32, i32
  }
  func.func @transform_1(%arg0: i32) -> (i32, i32) {
    %c0_i32 = arith.constant 0 : i32
    %c0_i32_0 = arith.constant 0 : i32
    %c0_i32_1 = arith.constant 0 : i32
    return %c0_i32, %c0_i32_0 : i32, i32
  }
  func.func @transform_2(%arg0: i32) -> (i32, i32) {
    %c0_i32 = arith.constant 0 : i32
    %c0_i32_0 = arith.constant 0 : i32
    %c0_i32_1 = arith.constant 0 : i32
    return %c0_i32, %c0_i32_0 : i32, i32
  }
  func.func @transform_3(%arg0: i32) -> (i32, i32, i32) {
    %c0_i32 = arith.constant 0 : i32
    %c0_i32_0 = arith.constant 0 : i32
    %c0_i32_1 = arith.constant 0 : i32
    return %arg0, %c0_i32, %c0_i32_0 : i32, i32, i32
  }
}

module attributes {stable_mosaic.version = 11 : i64} {
  func.func @_bn_lrelu_kernel(%arg0: i32, %arg1: memref<1x144x128xbf16, #tpu.memory_space<vmem>>, %arg2: memref<1x128xf32, #tpu.memory_space<vmem>>, %arg3: memref<1x128xf32, #tpu.memory_space<vmem>>, %arg4: memref<1x144x128xf32, #tpu.memory_space<vmem>>) attributes {dimension_semantics = [#tpu.dimension_semantics<parallel>], iteration_bounds = array<i64: 4>, scalar_prefetch = 0 : i64, scratch_operands = 0 : i64, tpu.core_type = #tpu.core_type<tc>, window_params = [{transform_indices = @transform_0, window_bounds = array<i64: 1, 144, 128>}, {pipeline_mode = #tpu.pipeline_mode<synchronous>, transform_indices = @transform_1, window_bounds = array<i64: 1, 128>}, {pipeline_mode = #tpu.pipeline_mode<synchronous>, transform_indices = @transform_2, window_bounds = array<i64: 1, 128>}, {transform_indices = @transform_3, window_bounds = array<i64: 1, 144, 128>}]} {
    %c0 = arith.constant 0 : index
    %c0_0 = arith.constant 0 : index
    %c0_1 = arith.constant 0 : index
    %0 = vector.load %arg1[%c0, %c0_0, %c0_1] : memref<1x144x128xbf16, #tpu.memory_space<vmem>>, vector<1x144x128xbf16>
    %1 = vector.shape_cast %0 : vector<1x144x128xbf16> to vector<144x128xbf16>
    %2 = arith.extf %1 : vector<144x128xbf16> to vector<144x128xf32>
    %c0_2 = arith.constant 0 : index
    %c0_3 = arith.constant 0 : index
    %3 = vector.load %arg2[%c0_2, %c0_3] : memref<1x128xf32, #tpu.memory_space<vmem>>, vector<1x128xf32>
    %4 = vector.broadcast %3 : vector<1x128xf32> to vector<144x128xf32>
    %5 = arith.mulf %2, %4 : vector<144x128xf32>
    %c0_4 = arith.constant 0 : index
    %c0_5 = arith.constant 0 : index
    %6 = vector.load %arg3[%c0_4, %c0_5] : memref<1x128xf32, #tpu.memory_space<vmem>>, vector<1x128xf32>
    %7 = vector.broadcast %6 : vector<1x128xf32> to vector<144x128xf32>
    %8 = arith.addf %5, %7 : vector<144x128xf32>
    %cst = arith.constant 0.000000e+00 : f32
    %9 = vector.broadcast %cst : f32 to vector<144x128xf32>
    %10 = arith.cmpf oge, %8, %9 : vector<144x128xf32>
    %cst_6 = arith.constant 0.00999999977 : f32
    %11 = vector.broadcast %cst_6 : f32 to vector<144x128xf32>
    %12 = arith.mulf %11, %8 : vector<144x128xf32>
    %13 = arith.select %10, %8, %12 : vector<144x128xi1>, vector<144x128xf32>
    %c0_7 = arith.constant 0 : index
    %c0_8 = arith.constant 0 : index
    %c0_9 = arith.constant 0 : index
    %14 = vector.load %arg4[%c0_7, %c0_8, %c0_9] : memref<1x144x128xf32, #tpu.memory_space<vmem>>, vector<1x144x128xf32>
    %15 = vector.shape_cast %14 : vector<1x144x128xf32> to vector<144x128xf32>
    %16 = vector.shape_cast %13 : vector<144x128xf32> to vector<1x144x128xf32>
    tpu.vector_store %arg4[%c0_7, %c0_8, %c0_9], %16 {strides = array<i32>} : memref<1x144x128xf32, #tpu.memory_space<vmem>>, vector<1x144x128xf32>,
    return
  }
  func.func @transform_0(%arg0: i32) -> (i32, i32, i32) {
    %c0_i32 = arith.constant 0 : i32
    %c0_i32_0 = arith.constant 0 : i32
    %c0_i32_1 = arith.constant 0 : i32
    return %arg0, %c0_i32, %c0_i32_0 : i32, i32, i32
  }
  func.func @transform_1(%arg0: i32) -> (i32, i32) {
    %c0_i32 = arith.constant 0 : i32
    %c0_i32_0 = arith.constant 0 : i32
    %c0_i32_1 = arith.constant 0 : i32
    return %c0_i32, %c0_i32_0 : i32, i32
  }
  func.func @transform_2(%arg0: i32) -> (i32, i32) {
    %c0_i32 = arith.constant 0 : i32
    %c0_i32_0 = arith.constant 0 : i32
    %c0_i32_1 = arith.constant 0 : i32
    return %c0_i32, %c0_i32_0 : i32, i32
  }
  func.func @transform_3(%arg0: i32) -> (i32, i32, i32) {
    %c0_i32 = arith.constant 0 : i32
    %c0_i32_0 = arith.constant 0 : i32
    %c0_i32_1 = arith.constant 0 : i32
    return %arg0, %c0_i32, %c0_i32_0 : i32, i32, i32
  }
}

module attributes {stable_mosaic.version = 11 : i64} {
  func.func @_conv_stats_kernel(%arg0: i32, %arg1: memref<1x198x128xbf16, #tpu.memory_space<vmem>>, %arg2: memref<9x128x128xbf16, #tpu.memory_space<vmem>>, %arg3: memref<1x128xf32, #tpu.memory_space<vmem>>, %arg4: memref<1x128xf32, #tpu.memory_space<vmem>>, %arg5: memref<1x144x128xbf16, #tpu.memory_space<vmem>>, %arg6: memref<1x128xf32, #tpu.memory_space<vmem>>, %arg7: memref<1x128xf32, #tpu.memory_space<vmem>>, %arg8: memref<1x128xf32, #tpu.memory_space<vmem>>, %arg9: memref<1x128xf32, #tpu.memory_space<vmem>>) attributes {dimension_semantics = [#tpu.dimension_semantics<arbitrary>], iteration_bounds = array<i64: 4>, scalar_prefetch = 0 : i64, scratch_operands = 2 : i64, tpu.core_type = #tpu.core_type<tc>, window_params = [{transform_indices = @transform_0, window_bounds = array<i64: 1, 198, 128>}, {pipeline_mode = #tpu.pipeline_mode<synchronous>, transform_indices = @transform_1, window_bounds = array<i64: 9, 128, 128>}, {pipeline_mode = #tpu.pipeline_mode<synchronous>, transform_indices = @transform_2, window_bounds = array<i64: 1, 128>}, {pipeline_mode = #tpu.pipeline_mode<synchronous>, transform_indices = @transform_3, window_bounds = array<i64: 1, 128>}, {transform_indices = @transform_4, window_bounds = array<i64: 1, 144, 128>}, {pipeline_mode = #tpu.pipeline_mode<synchronous>, transform_indices = @transform_5, window_bounds = array<i64: 1, 128>}, {pipeline_mode = #tpu.pipeline_mode<synchronous>, transform_indices = @transform_6, window_bounds = array<i64: 1, 128>}]} {
    %c0_i32 = arith.constant 0 : i32
    %0 = arith.cmpi eq, %arg0, %c0_i32 : i32
    %1 = arith.extui %0 : i1 to i32
    %c0_i32_0 = arith.constant 0 : i32
    %2 = arith.cmpi ne, %1, %c0_i32_0 : i32
    scf.if %2 {
      %cst_68 = arith.constant 0.000000e+00 : f32
      %99 = vector.broadcast %cst_68 : f32 to vector<1x128xf32>
      %c0_69 = arith.constant 0 : index
      %c0_70 = arith.constant 0 : index
      %100 = vector.load %arg8[%c0_69, %c0_70] : memref<1x128xf32, #tpu.memory_space<vmem>>, vector<1x128xf32>
      tpu.vector_store %arg8[%c0_69, %c0_70], %99 {strides = array<i32>} : memref<1x128xf32, #tpu.memory_space<vmem>>, vector<1x128xf32>,
      %cst_71 = arith.constant 0.000000e+00 : f32
      %101 = vector.broadcast %cst_71 : f32 to vector<1x128xf32>
      %c0_72 = arith.constant 0 : index
      %c0_73 = arith.constant 0 : index
      %102 = vector.load %arg9[%c0_72, %c0_73] : memref<1x128xf32, #tpu.memory_space<vmem>>, vector<1x128xf32>
      tpu.vector_store %arg9[%c0_72, %c0_73], %101 {strides = array<i32>} : memref<1x128xf32, #tpu.memory_space<vmem>>, vector<1x128xf32>,
    } else {
    }
    %cst = arith.constant 0.000000e+00 : f32
    %3 = vector.broadcast %cst : f32 to vector<144x128xf32>
    %c0 = arith.constant 0 : index
    %c0_1 = arith.constant 0 : index
    %c0_2 = arith.constant 0 : index
    %4 = vector.load %arg1[%c0, %c0_1, %c0_2] : memref<1x198x128xbf16, #tpu.memory_space<vmem>>, vector<1x144x128xbf16>
    %5 = vector.shape_cast %4 : vector<1x144x128xbf16> to vector<144x128xbf16>
    %c0_3 = arith.constant 0 : index
    %c0_4 = arith.constant 0 : index
    %c0_5 = arith.constant 0 : index
    %6 = vector.load %arg2[%c0_3, %c0_4, %c0_5] : memref<9x128x128xbf16, #tpu.memory_space<vmem>>, vector<1x128x128xbf16>
    %7 = vector.shape_cast %6 : vector<1x128x128xbf16> to vector<128x128xbf16>
    %cst_6 = arith.constant dense<0.000000e+00> : vector<144x128xf32>
    %8 = tpu.matmul %5, %7, %cst_6 {dimension_numbers = #tpu.dot_dimension_numbers<[1], [0], [0], [1], [0, 0, 1, 1], [], []>} : vector<144x128xbf16>, vector<128x128xbf16>, vector<144x128xf32> -> vector<144x128xf32>
    %9 = arith.addf %3, %8 : vector<144x128xf32>
    %c0_7 = arith.constant 0 : index
    %c1 = arith.constant 1 : index
    %c0_8 = arith.constant 0 : index
    %10 = vector.load %arg1[%c0_7, %c1, %c0_8] : memref<1x198x128xbf16, #tpu.memory_space<vmem>>, vector<1x144x128xbf16>
    %11 = vector.shape_cast %10 : vector<1x144x128xbf16> to vector<144x128xbf16>
    %c1_9 = arith.constant 1 : index
    %c0_10 = arith.constant 0 : index
    %c0_11 = arith.constant 0 : index
    %12 = vector.load %arg2[%c1_9, %c0_10, %c0_11] : memref<9x128x128xbf16, #tpu.memory_space<vmem>>, vector<1x128x128xbf16>
    %13 = vector.shape_cast %12 : vector<1x128x128xbf16> to vector<128x128xbf16>
    %cst_12 = arith.constant dense<0.000000e+00> : vector<144x128xf32>
    %14 = tpu.matmul %11, %13, %cst_12 {dimension_numbers = #tpu.dot_dimension_numbers<[1], [0], [0], [1], [0, 0, 1, 1], [], []>} : vector<144x128xbf16>, vector<128x128xbf16>, vector<144x128xf32> -> vector<144x128xf32>
    %15 = arith.addf %9, %14 : vector<144x128xf32>
    %c0_13 = arith.constant 0 : index
    %c2 = arith.constant 2 : index
    %c0_14 = arith.constant 0 : index
    %16 = vector.load %arg1[%c0_13, %c2, %c0_14] : memref<1x198x128xbf16, #tpu.memory_space<vmem>>, vector<1x144x128xbf16>
    %17 = vector.shape_cast %16 : vector<1x144x128xbf16> to vector<144x128xbf16>
    %c2_15 = arith.constant 2 : index
    %c0_16 = arith.constant 0 : index
    %c0_17 = arith.constant 0 : index
    %18 = vector.load %arg2[%c2_15, %c0_16, %c0_17] : memref<9x128x128xbf16, #tpu.memory_space<vmem>>, vector<1x128x128xbf16>
    %19 = vector.shape_cast %18 : vector<1x128x128xbf16> to vector<128x128xbf16>
    %cst_18 = arith.constant dense<0.000000e+00> : vector<144x128xf32>
    %20 = tpu.matmul %17, %19, %cst_18 {dimension_numbers = #tpu.dot_dimension_numbers<[1], [0], [0], [1], [0, 0, 1, 1], [], []>} : vector<144x128xbf16>, vector<128x128xbf16>, vector<144x128xf32> -> vector<144x128xf32>
    %21 = arith.addf %15, %20 : vector<144x128xf32>
    %c0_19 = arith.constant 0 : index
    %c18 = arith.constant 18 : index
    %c0_20 = arith.constant 0 : index
    %22 = vector.load %arg1[%c0_19, %c18, %c0_20] : memref<1x198x128xbf16, #tpu.memory_space<vmem>>, vector<1x144x128xbf16>
    %23 = vector.shape_cast %22 : vector<1x144x128xbf16> to vector<144x128xbf16>
    %c3 = arith.constant 3 : index
    %c0_21 = arith.constant 0 : index
    %c0_22 = arith.constant 0 : index
    %24 = vector.load %arg2[%c3, %c0_21, %c0_22] : memref<9x128x128xbf16, #tpu.memory_space<vmem>>, vector<1x128x128xbf16>
    %25 = vector.shape_cast %24 : vector<1x128x128xbf16> to vector<128x128xbf16>
    %cst_23 = arith.constant dense<0.000000e+00> : vector<144x128xf32>
    %26 = tpu.matmul %23, %25, %cst_23 {dimension_numbers = #tpu.dot_dimension_numbers<[1], [0], [0], [1], [0, 0, 1, 1], [], []>} : vector<144x128xbf16>, vector<128x128xbf16>, vector<144x128xf32> -> vector<144x128xf32>
    %27 = arith.addf %21, %26 : vector<144x128xf32>
    %c0_24 = arith.constant 0 : index
    %c19 = arith.constant 19 : index
    %c0_25 = arith.constant 0 : index
    %28 = vector.load %arg1[%c0_24, %c19, %c0_25] : memref<1x198x128xbf16, #tpu.memory_space<vmem>>, vector<1x144x128xbf16>
    %29 = vector.shape_cast %28 : vector<1x144x128xbf16> to vector<144x128xbf16>
    %c4 = arith.constant 4 : index
    %c0_26 = arith.constant 0 : index
    %c0_27 = arith.constant 0 : index
    %30 = vector.load %arg2[%c4, %c0_26, %c0_27] : memref<9x128x128xbf16, #tpu.memory_space<vmem>>, vector<1x128x128xbf16>
    %31 = vector.shape_cast %30 : vector<1x128x128xbf16> to vector<128x128xbf16>
    %cst_28 = arith.constant dense<0.000000e+00> : vector<144x128xf32>
    %32 = tpu.matmul %29, %31, %cst_28 {dimension_numbers = #tpu.dot_dimension_numbers<[1], [0], [0], [1], [0, 0, 1, 1], [], []>} : vector<144x128xbf16>, vector<128x128xbf16>, vector<144x128xf32> -> vector<144x128xf32>
    %33 = arith.addf %27, %32 : vector<144x128xf32>
    %c0_29 = arith.constant 0 : index
    %c20 = arith.constant 20 : index
    %c0_30 = arith.constant 0 : index
    %34 = vector.load %arg1[%c0_29, %c20, %c0_30] : memref<1x198x128xbf16, #tpu.memory_space<vmem>>, vector<1x144x128xbf16>
    %35 = vector.shape_cast %34 : vector<1x144x128xbf16> to vector<144x128xbf16>
    %c5 = arith.constant 5 : index
    %c0_31 = arith.constant 0 : index
    %c0_32 = arith.constant 0 : index
    %36 = vector.load %arg2[%c5, %c0_31, %c0_32] : memref<9x128x128xbf16, #tpu.memory_space<vmem>>, vector<1x128x128xbf16>
    %37 = vector.shape_cast %36 : vector<1x128x128xbf16> to vector<128x128xbf16>
    %cst_33 = arith.constant dense<0.000000e+00> : vector<144x128xf32>
    %38 = tpu.matmul %35, %37, %cst_33 {dimension_numbers = #tpu.dot_dimension_numbers<[1], [0], [0], [1], [0, 0, 1, 1], [], []>} : vector<144x128xbf16>, vector<128x128xbf16>, vector<144x128xf32> -> vector<144x128xf32>
    %39 = arith.addf %33, %38 : vector<144x128xf32>
    %c0_34 = arith.constant 0 : index
    %c36 = arith.constant 36 : index
    %c0_35 = arith.constant 0 : index
    %40 = vector.load %arg1[%c0_34, %c36, %c0_35] : memref<1x198x128xbf16, #tpu.memory_space<vmem>>, vector<1x144x128xbf16>
    %41 = vector.shape_cast %40 : vector<1x144x128xbf16> to vector<144x128xbf16>
    %c6 = arith.constant 6 : index
    %c0_36 = arith.constant 0 : index
    %c0_37 = arith.constant 0 : index
    %42 = vector.load %arg2[%c6, %c0_36, %c0_37] : memref<9x128x128xbf16, #tpu.memory_space<vmem>>, vector<1x128x128xbf16>
    %43 = vector.shape_cast %42 : vector<1x128x128xbf16> to vector<128x128xbf16>
    %cst_38 = arith.constant dense<0.000000e+00> : vector<144x128xf32>
    %44 = tpu.matmul %41, %43, %cst_38 {dimension_numbers = #tpu.dot_dimension_numbers<[1], [0], [0], [1], [0, 0, 1, 1], [], []>} : vector<144x128xbf16>, vector<128x128xbf16>, vector<144x128xf32> -> vector<144x128xf32>
    %45 = arith.addf %39, %44 : vector<144x128xf32>
    %c0_39 = arith.constant 0 : index
    %c37 = arith.constant 37 : index
    %c0_40 = arith.constant 0 : index
    %46 = vector.load %arg1[%c0_39, %c37, %c0_40] : memref<1x198x128xbf16, #tpu.memory_space<vmem>>, vector<1x144x128xbf16>
    %47 = vector.shape_cast %46 : vector<1x144x128xbf16> to vector<144x128xbf16>
    %c7 = arith.constant 7 : index
    %c0_41 = arith.constant 0 : index
    %c0_42 = arith.constant 0 : index
    %48 = vector.load %arg2[%c7, %c0_41, %c0_42] : memref<9x128x128xbf16, #tpu.memory_space<vmem>>, vector<1x128x128xbf16>
    %49 = vector.shape_cast %48 : vector<1x128x128xbf16> to vector<128x128xbf16>
    %cst_43 = arith.constant dense<0.000000e+00> : vector<144x128xf32>
    %50 = tpu.matmul %47, %49, %cst_43 {dimension_numbers = #tpu.dot_dimension_numbers<[1], [0], [0], [1], [0, 0, 1, 1], [], []>} : vector<144x128xbf16>, vector<128x128xbf16>, vector<144x128xf32> -> vector<144x128xf32>
    %51 = arith.addf %45, %50 : vector<144x128xf32>
    %c0_44 = arith.constant 0 : index
    %c38 = arith.constant 38 : index
    %c0_45 = arith.constant 0 : index
    %52 = vector.load %arg1[%c0_44, %c38, %c0_45] : memref<1x198x128xbf16, #tpu.memory_space<vmem>>, vector<1x144x128xbf16>
    %53 = vector.shape_cast %52 : vector<1x144x128xbf16> to vector<144x128xbf16>
    %c8 = arith.constant 8 : index
    %c0_46 = arith.constant 0 : index
    %c0_47 = arith.constant 0 : index
    %54 = vector.load %arg2[%c8, %c0_46, %c0_47] : memref<9x128x128xbf16, #tpu.memory_space<vmem>>, vector<1x128x128xbf16>
    %55 = vector.shape_cast %54 : vector<1x128x128xbf16> to vector<128x128xbf16>
    %cst_48 = arith.constant dense<0.000000e+00> : vector<144x128xf32>
    %56 = tpu.matmul %53, %55, %cst_48 {dimension_numbers = #tpu.dot_dimension_numbers<[1], [0], [0], [1], [0, 0, 1, 1], [], []>} : vector<144x128xbf16>, vector<128x128xbf16>, vector<144x128xf32> -> vector<144x128xf32>
    %57 = arith.addf %51, %56 : vector<144x128xf32>
    %58 = tpu.iota {dimensions = array<i32: 0>} : vector<144x1xi32>
    %c18_i32 = arith.constant 18 : i32
    %c0_i32_49 = arith.constant 0 : i32
    %59 = arith.cmpi eq, %c18_i32, %c0_i32_49 : i32
    %c1_i32 = arith.constant 1 : i32
    %60 = arith.select %59, %c1_i32, %c18_i32 : i32
    %61 = vector.broadcast %60 : i32 to vector<144x1xi32>
    %62 = arith.remsi %58, %61 : vector<144x1xi32>
    %c0_i32_50 = arith.constant 0 : i32
    %63 = vector.broadcast %c0_i32_50 : i32 to vector<144x1xi32>
    %64 = arith.cmpi ne, %62, %63 : vector<144x1xi32>
    %c0_i32_51 = arith.constant 0 : i32
    %65 = vector.broadcast %c0_i32_51 : i32 to vector<144x1xi32>
    %66 = arith.cmpi slt, %62, %65 : vector<144x1xi32>
    %c0_i32_52 = arith.constant 0 : i32
    %67 = arith.cmpi slt, %60, %c0_i32_52 : i32
    %68 = vector.broadcast %67 : i1 to vector<144x1xi1>
    %69 = vector.broadcast %68 : vector<144x1xi1> to vector<144x1xi1>
    %70 = arith.xori %66, %69 : vector<144x1xi1>
    %71 = arith.andi %70, %64 : vector<144x1xi1>
    %72 = vector.broadcast %60 : i32 to vector<144x1xi32>
    %73 = arith.addi %62, %72 : vector<144x1xi32>
    %74 = arith.select %71, %73, %62 : vector<144x1xi1>, vector<144x1xi32>
    %c16_i32 = arith.constant 16 : i32
    %75 = vector.broadcast %c16_i32 : i32 to vector<144x1xi32>
    %76 = arith.cmpi slt, %74, %75 : vector<144x1xi32>
    %cst_53 = arith.constant 0.000000e+00 : f32
    %77 = vector.shape_cast %76 : vector<144x1xi1> to vector<144x1xi1>
    %78 = vector.broadcast %77 : vector<144x1xi1> to vector<144x128xi1>
    %79 = vector.broadcast %cst_53 : f32 to vector<144x128xf32>
    %80 = arith.select %78, %57, %79 : vector<144x128xi1>, vector<144x128xf32>
    %c0_54 = arith.constant 0 : index
    %c0_55 = arith.constant 0 : index
    %81 = vector.load %arg8[%c0_54, %c0_55] : memref<1x128xf32, #tpu.memory_space<vmem>>, vector<1x128xf32>
    %cst_56 = arith.constant dense<0.000000e+00> : vector<128xf32>
    %82 = vector.multi_reduction <add>, %80, %cst_56 [0] : vector<144x128xf32> to vector<128xf32>
    %83 = vector.shape_cast %82 : vector<128xf32> to vector<1x128xf32>
    %84 = arith.addf %81, %83 : vector<1x128xf32>
    %c0_57 = arith.constant 0 : index
    %c0_58 = arith.constant 0 : index
    %85 = vector.load %arg8[%c0_57, %c0_58] : memref<1x128xf32, #tpu.memory_space<vmem>>, vector<1x128xf32>
    tpu.vector_store %arg8[%c0_57, %c0_58], %84 {strides = array<i32>} : memref<1x128xf32, #tpu.memory_space<vmem>>, vector<1x128xf32>,
    %c0_59 = arith.constant 0 : index
    %c0_60 = arith.constant 0 : index
    %86 = vector.load %arg9[%c0_59, %c0_60] : memref<1x128xf32, #tpu.memory_space<vmem>>, vector<1x128xf32>
    %87 = arith.mulf %80, %80 : vector<144x128xf32>
    %cst_61 = arith.constant dense<0.000000e+00> : vector<128xf32>
    %88 = vector.multi_reduction <add>, %87, %cst_61 [0] : vector<144x128xf32> to vector<128xf32>
    %89 = vector.shape_cast %88 : vector<128xf32> to vector<1x128xf32>
    %90 = arith.addf %86, %89 : vector<1x128xf32>
    %c0_62 = arith.constant 0 : index
    %c0_63 = arith.constant 0 : index
    %91 = vector.load %arg9[%c0_62, %c0_63] : memref<1x128xf32, #tpu.memory_space<vmem>>, vector<1x128xf32>
    tpu.vector_store %arg9[%c0_62, %c0_63], %90 {strides = array<i32>} : memref<1x128xf32, #tpu.memory_space<vmem>>, vector<1x128xf32>,
    %92 = arith.truncf %57 : vector<144x128xf32> to vector<144x128xbf16>
    %c0_64 = arith.constant 0 : index
    %c0_65 = arith.constant 0 : index
    %c0_66 = arith.constant 0 : index
    %93 = vector.load %arg5[%c0_64, %c0_65, %c0_66] : memref<1x144x128xbf16, #tpu.memory_space<vmem>>, vector<1x144x128xbf16>
    %94 = vector.shape_cast %93 : vector<1x144x128xbf16> to vector<144x128xbf16>
    %95 = vector.shape_cast %92 : vector<144x128xbf16> to vector<1x144x128xbf16>
    tpu.vector_store %arg5[%c0_64, %c0_65, %c0_66], %95 {strides = array<i32>} : memref<1x144x128xbf16, #tpu.memory_space<vmem>>, vector<1x144x128xbf16>,
    %c3_i32 = arith.constant 3 : i32
    %96 = arith.cmpi eq, %arg0, %c3_i32 : i32
    %97 = arith.extui %96 : i1 to i32
    %c0_i32_67 = arith.constant 0 : i32
    %98 = arith.cmpi ne, %97, %c0_i32_67 : i32
    scf.if %98 {
      %c0_68 = arith.constant 0 : index
      %c0_69 = arith.constant 0 : index
      %99 = vector.load %arg8[%c0_68, %c0_69] : memref<1x128xf32, #tpu.memory_space<vmem>>, vector<1x128xf32>
      %cst_70 = arith.constant 0.001953125 : f32
      %100 = vector.broadcast %cst_70 : f32 to vector<1x128xf32>
      %101 = arith.mulf %99, %100 : vector<1x128xf32>
      %c0_71 = arith.constant 0 : index
      %c0_72 = arith.constant 0 : index
      %102 = vector.load %arg9[%c0_71, %c0_72] : memref<1x128xf32, #tpu.memory_space<vmem>>, vector<1x128xf32>
      %cst_73 = arith.constant 0.001953125 : f32
      %103 = vector.broadcast %cst_73 : f32 to vector<1x128xf32>
      %104 = arith.mulf %102, %103 : vector<1x128xf32>
      %105 = arith.mulf %101, %101 : vector<1x128xf32>
      %106 = arith.subf %104, %105 : vector<1x128xf32>
      %cst_74 = arith.constant 0.000000e+00 : f32
      %107 = vector.broadcast %cst_74 : f32 to vector<1x128xf32>
      %108 = arith.maximumf %106, %107 : vector<1x128xf32>
      %c0_75 = arith.constant 0 : index
      %c0_76 = arith.constant 0 : index
      %109 = vector.load %arg3[%c0_75, %c0_76] : memref<1x128xf32, #tpu.memory_space<vmem>>, vector<1x128xf32>
      %cst_77 = arith.constant 9.99999974E-6 : f32
      %110 = vector.broadcast %cst_77 : f32 to vector<1x128xf32>
      %111 = arith.addf %108, %110 : vector<1x128xf32>
      %112 = math.rsqrt %111 : vector<1x128xf32>
      %113 = arith.mulf %109, %112 : vector<1x128xf32>
      %c0_78 = arith.constant 0 : index
      %c0_79 = arith.constant 0 : index
      %114 = vector.load %arg6[%c0_78, %c0_79] : memref<1x128xf32, #tpu.memory_space<vmem>>, vector<1x128xf32>
      tpu.vector_store %arg6[%c0_78, %c0_79], %113 {strides = array<i32>} : memref<1x128xf32, #tpu.memory_space<vmem>>, vector<1x128xf32>,
      %c0_80 = arith.constant 0 : index
      %c0_81 = arith.constant 0 : index
      %115 = vector.load %arg4[%c0_80, %c0_81] : memref<1x128xf32, #tpu.memory_space<vmem>>, vector<1x128xf32>
      %116 = arith.mulf %101, %113 : vector<1x128xf32>
      %117 = arith.subf %115, %116 : vector<1x128xf32>
      %c0_82 = arith.constant 0 : index
      %c0_83 = arith.constant 0 : index
      %118 = vector.load %arg7[%c0_82, %c0_83] : memref<1x128xf32, #tpu.memory_space<vmem>>, vector<1x128xf32>
      tpu.vector_store %arg7[%c0_82, %c0_83], %117 {strides = array<i32>} : memref<1x128xf32, #tpu.memory_space<vmem>>, vector<1x128xf32>,
    } else {
    }
    return
  }
  func.func @transform_0(%arg0: i32) -> (i32, i32, i32) {
    %c0_i32 = arith.constant 0 : i32
    %c0_i32_0 = arith.constant 0 : i32
    %c0_i32_1 = arith.constant 0 : i32
    return %arg0, %c0_i32, %c0_i32_0 : i32, i32, i32
  }
  func.func @transform_1(%arg0: i32) -> (i32, i32, i32) {
    %c0_i32 = arith.constant 0 : i32
    %c0_i32_0 = arith.constant 0 : i32
    %c0_i32_1 = arith.constant 0 : i32
    %c0_i32_2 = arith.constant 0 : i32
    return %c0_i32, %c0_i32_0, %c0_i32_1 : i32, i32, i32
  }
  func.func @transform_2(%arg0: i32) -> (i32, i32) {
    %c0_i32 = arith.constant 0 : i32
    %c0_i32_0 = arith.constant 0 : i32
    %c0_i32_1 = arith.constant 0 : i32
    return %c0_i32, %c0_i32_0 : i32, i32
  }
  func.func @transform_3(%arg0: i32) -> (i32, i32) {
    %c0_i32 = arith.constant 0 : i32
    %c0_i32_0 = arith.constant 0 : i32
    %c0_i32_1 = arith.constant 0 : i32
    return %c0_i32, %c0_i32_0 : i32, i32
  }
  func.func @transform_4(%arg0: i32) -> (i32, i32, i32) {
    %c0_i32 = arith.constant 0 : i32
    %c0_i32_0 = arith.constant 0 : i32
    %c0_i32_1 = arith.constant 0 : i32
    return %arg0, %c0_i32, %c0_i32_0 : i32, i32, i32
  }
  func.func @transform_5(%arg0: i32) -> (i32, i32) {
    %c0_i32 = arith.constant 0 : i32
    %c0_i32_0 = arith.constant 0 : i32
    %c0_i32_1 = arith.constant 0 : i32
    return %c0_i32, %c0_i32_0 : i32, i32
  }
  func.func @transform_6(%arg0: i32) -> (i32, i32) {
    %c0_i32 = arith.constant 0 : i32
    %c0_i32_0 = arith.constant 0 : i32
    %c0_i32_1 = arith.constant 0 : i32
    return %c0_i32, %c0_i32_0 : i32, i32
  }
}

</mosaic_0001>

<bundles_post_ra>
// kernel: double_conv.5
= control target key start
LH: loop header
LB: loop body
LE: loop exit
PB: predicated region body
PF: predicated region fallthrough
CT: control target
= control target key end

     0   :  { %s637_s12 = smov 0   ;;  %s730_s0 = inlined_call_operand.vmem [shape: bf16[4,144,128], index: 0, kind: input, shape index: {}]   ;;  %s731_s1 = inlined_call_operand.vmem [shape: f32[1,128], index: 1, kind: input, shape index: {}]   ;;  %s732_s2 = inlined_call_operand.vmem [shape: f32[1,128], index: 2, kind: input, shape index: {}]   ;;  %s733_s3 = inlined_call_operand.vmem [shape: bf16[4,144,128], index: 3, kind: output, shape index: {}]  }
   0x1 LB: > { %s456_s13 = sadd.s32 4294967295, %s615_s12   ;;  %p460_p0 = scmp.ge.s32.totalorder %s615_s12, 1  ;;  %s615_s12 = sphi %s637_s12, %s13_s12  }
   0x2   : > { %p137_p1 = scmp.lt.s32.totalorder %s615_s12, 5 }
   0x4   : > { %p138_p2 = pnand %p460_p0, %p137_p1 }
   0x5   : > { %p161_p3 = scmp.lt.s32.totalorder (!%p138_p2), %s456_s13, 3  ;;  %v658_v0 = vld [vmem:[%s731_s1] ss:$0 sm:$0xff] (!%p138_p2) }
   0x6   : > { %141 = sbr.rel (%p138_p2) target bundleno = 54 (0x36), region = 32  ;;  %v667_v9 = vld [vmem:[%s732_s2] ss:$0 sm:$0xff] (!%p138_p2) }
   0xd   : > { %s735_s13 = smov (!%p161_p3, %s456_s13), 3 }
   0xe   : > { %s600_s14 = smul.u32 72, %s735_s13 }
  0x10   : > { %s653_s17 = scalar_lea.vmem %s730_s0, %s600_s14  ;;  %s690_s24 = scalar_lea.vmem %s733_s3, %s600_s14 }
  0x11   : > { %v504_v1 = vld [vmem:[%s653_s17] sm:$0xff]   ;;  %v584_v2 = vld [vmem:[%s653_s17 + $0x8] sm:$0xff]   ;;  %v585_v3 = vld [vmem:[%s653_s17 + $0x10] sm:$0xff]  }
  0x12   : > { %v505_v4 = vunpack.c.l.bf16 %v504_v1  ;;  %v506_v5 = vunpack.c.h.bf16 %v504_v1  ;;  %v509_v6 = vunpack.c.l.bf16 %v584_v2  ;;  %v510_v7 = vunpack.c.h.bf16 %v584_v2  ;;  %v586_v8 = vld [vmem:[%s653_s17 + $0x18] sm:$0xff]   ;;  %v587_v36 = vld [vmem:[%s653_s17 + $0x20] sm:$0xff]   ;;  %v588_v41 = vld [vmem:[%s653_s17 + $0x28] sm:$0xff]  }
  0x13   : > { %v513_v10 = vunpack.c.l.bf16 %v585_v3  ;;  %v514_v11 = vunpack.c.h.bf16 %v585_v3  ;;  %v517_v12 = vunpack.c.l.bf16 %v586_v8  ;;  %v518_v13 = vunpack.c.h.bf16 %v586_v8  ;;  %v589_v52 = vld [vmem:[%s653_s17 + $0x30] sm:$0xff]   ;;  %v590_v53 = vld [vmem:[%s653_s17 + $0x38] sm:$0xff]  }
  0x14   : > { %v214_v14 = vmul.f32 %v505_v4, %v658_v0  ;;  %v215_v15 = vmul.f32 %v506_v5, %v658_v0  ;;  %v216_v16 = vmul.f32 %v509_v6, %v658_v0  ;;  %v217_v17 = vmul.f32 %v510_v7, %v658_v0 }
  0x15   : > { %v218_v18 = vmul.f32 %v513_v10, %v658_v0  ;;  %v219_v19 = vmul.f32 %v514_v11, %v658_v0  ;;  %v220_v20 = vmul.f32 %v517_v12, %v658_v0  ;;  %v221_v21 = vmul.f32 %v518_v13, %v658_v0 }
  0x16   : > { %v239_v22 = vadd.f32 %v667_v9, %v214_v14  ;;  %v240_v23 = vadd.f32 %v667_v9, %v215_v15  ;;  %v241_v24 = vadd.f32 %v667_v9, %v216_v16  ;;  %v242_v25 = vadd.f32 %v667_v9, %v217_v17 }
  0x17   : > { %v243_v26 = vadd.f32 %v667_v9, %v218_v18  ;;  %v244_v27 = vadd.f32 %v667_v9, %v219_v19  ;;  %v245_v28 = vadd.f32 %v667_v9, %v220_v20  ;;  %v246_v29 = vadd.f32 %v667_v9, %v221_v21  ;;  %v591_v20 = vld [vmem:[%s653_s17 + $0x40] sm:$0xff]  }
  0x18   : > { %vm257_vm0 = vcmp.ge.f32.partialorder %v239_v22, 0.0  ;;  %vm258_vm1 = vcmp.ge.f32.partialorder %v240_v23, 0.0  ;;  %v275_v30 = vmul.f32 0.01, %v239_v22  ;;  %v276_v31 = vmul.f32 0.01, %v240_v23 }
  0x19   : > { %vm259_vm2 = vcmp.ge.f32.partialorder %v241_v24, 0.0  ;;  %vm260_vm3 = vcmp.ge.f32.partialorder %v242_v25, 0.0  ;;  %v277_v32 = vmul.f32 0.01, %v241_v24  ;;  %v278_v33 = vmul.f32 0.01, %v242_v25 }
  0x1a   : > { %v293_v34 = vsel %vm257_vm0, %v239_v22, %v275_v30  ;;  %v294_v35 = vsel %vm258_vm1, %v240_v23, %v276_v31  ;;  %vm261_vm4 = vcmp.ge.f32.partialorder %v243_v26, 0.0  ;;  %vm262_vm5 = vcmp.ge.f32.partialorder %v244_v27, 0.0 }
  0x1b   : > { %v542_v37 = vpack.c.bf16 %v294_v35, %v293_v34  ;;  %v295_v38 = vsel %vm259_vm2, %v241_v24, %v277_v32  ;;  %v296_v39 = vsel %vm260_vm3, %v242_v25, %v278_v33  ;;  %v279_v40 = vmul.f32 0.01, %v243_v26 }
  0x1c   : > { %v547_v42 = vpack.c.bf16 %v296_v39, %v295_v38  ;;  %v280_v43 = vmul.f32 0.01, %v244_v27  ;;  %vm263_vm6 = vcmp.ge.f32.partialorder %v245_v28, 0.0  ;;  %vm264_vm7 = vcmp.ge.f32.partialorder %v246_v29, 0.0 }
  0x1d   : > { %543 = vst [vmem:[%s690_s24] sm:$0xff] %v542_v37   ;;  %v297_v44 = vsel %vm261_vm4, %v243_v26, %v279_v40  ;;  %v281_v45 = vmul.f32 0.01, %v245_v28  ;;  %v282_v46 = vmul.f32 0.01, %v246_v29  ;;  %v521_v47 = vunpack.c.l.bf16 %v587_v36 }
  0x1e   : > { %592 = vst [vmem:[%s690_s24 + $0x8] sm:$0xff] %v547_v42   ;;  %v298_v48 = vsel %vm262_vm5, %v244_v27, %v280_v43  ;;  %v522_v49 = vunpack.c.h.bf16 %v587_v36  ;;  %v525_v50 = vunpack.c.l.bf16 %v588_v41  ;;  %v526_v51 = vunpack.c.h.bf16 %v588_v41 }
  0x1f   : > { %v552_v54 = vpack.c.bf16 %v298_v48, %v297_v44  ;;  %v299_v55 = vsel %vm263_vm6, %v245_v28, %v281_v45  ;;  %v300_v56 = vsel %vm264_vm7, %v246_v29, %v282_v46  ;;  %v222_v57 = vmul.f32 %v521_v47, %v658_v0 }
  0x20   : > { %v557_v58 = vpack.c.bf16 %v300_v56, %v299_v55  ;;  %v223_v59 = vmul.f32 %v522_v49, %v658_v0  ;;  %v224_v60 = vmul.f32 %v525_v50, %v658_v0  ;;  %v225_v61 = vmul.f32 %v526_v51, %v658_v0 }
  0x21   : > { %593 = vst [vmem:[%s690_s24 + $0x10] sm:$0xff] %v552_v54   ;;  %v247_v62 = vadd.f32 %v667_v9, %v222_v57  ;;  %v529_v63 = vunpack.c.l.bf16 %v589_v52  ;;  %v530_v1 = vunpack.c.h.bf16 %v589_v52  ;;  %v533_v2 = vunpack.c.l.bf16 %v590_v53 }
  0x22   : > { %594 = vst [vmem:[%s690_s24 + $0x18] sm:$0xff] %v557_v58   ;;  %v248_v3 = vadd.f32 %v667_v9, %v223_v59  ;;  %v249_v4 = vadd.f32 %v667_v9, %v224_v60  ;;  %v250_v5 = vadd.f32 %v667_v9, %v225_v61  ;;  %v534_v6 = vunpack.c.h.bf16 %v590_v53 }
  0x23   : > { %vm265_vm8 = vcmp.ge.f32.partialorder %v247_v62, 0.0  ;;  %v283_v7 = vmul.f32 0.01, %v247_v62  ;;  %v226_v8 = vmul.f32 %v529_v63, %v658_v0  ;;  %v227_v10 = vmul.f32 %v530_v1, %v658_v0 }
  0x24   : > { %vm266_vm9 = vcmp.ge.f32.partialorder %v248_v3, 0.0  ;;  %v284_v11 = vmul.f32 0.01, %v248_v3  ;;  %vm267_vm10 = vcmp.ge.f32.partialorder %v249_v4, 0.0  ;;  %vm268_vm11 = vcmp.ge.f32.partialorder %v250_v5, 0.0 }
  0x25   : > { %v301_v12 = vsel %vm265_vm8, %v247_v62, %v283_v7  ;;  %v285_v13 = vmul.f32 0.01, %v249_v4  ;;  %v286_v14 = vmul.f32 0.01, %v250_v5  ;;  %v251_v15 = vadd.f32 %v667_v9, %v226_v8 }
  0x26   : > { %v302_v16 = vsel %vm266_vm9, %v248_v3, %v284_v11  ;;  %v252_v17 = vadd.f32 %v667_v9, %v227_v10  ;;  %v228_v18 = vmul.f32 %v533_v2, %v658_v0  ;;  %v229_v19 = vmul.f32 %v534_v6, %v658_v0 }
  0x27   : > { %v562_v21 = vpack.c.bf16 %v302_v16, %v301_v12  ;;  %v303_v22 = vsel %vm267_vm10, %v249_v4, %v285_v13  ;;  %v304_v23 = vsel %vm268_vm11, %v250_v5, %v286_v14  ;;  %vm269_vm12 = vcmp.ge.f32.partialorder %v251_v15, 0.0 }
  0x28   : > { %v567_v24 = vpack.c.bf16 %v304_v23, %v303_v22  ;;  %vm270_vm13 = vcmp.ge.f32.partialorder %v252_v17, 0.0  ;;  %v287_v25 = vmul.f32 0.01, %v251_v15  ;;  %v288_v26 = vmul.f32 0.01, %v252_v17 }
  0x29   : > { %595 = vst [vmem:[%s690_s24 + $0x20] sm:$0xff] %v562_v21   ;;  %v253_v27 = vadd.f32 %v667_v9, %v228_v18  ;;  %v254_v28 = vadd.f32 %v667_v9, %v229_v19  ;;  %v537_v29 = vunpack.c.l.bf16 %v591_v20  ;;  %v538_v30 = vunpack.c.h.bf16 %v591_v20 }
  0x2a   : > { %596 = vst [vmem:[%s690_s24 + $0x28] sm:$0xff] %v567_v24   ;;  %v305_v31 = vsel %vm269_vm12, %v251_v15, %v287_v25  ;;  %v306_v32 = vsel %vm270_vm13, %v252_v17, %v288_v26 }
  0x2b   : > { %v572_v33 = vpack.c.bf16 %v306_v32, %v305_v31  ;;  %vm271_vm14 = vcmp.ge.f32.partialorder %v253_v27, 0.0  ;;  %vm272_vm15 = vcmp.ge.f32.partialorder %v254_v28, 0.0  ;;  %v289_v34 = vmul.f32 0.01, %v253_v27 }
  0x2c   : > { %v290_v35 = vmul.f32 0.01, %v254_v28  ;;  %v230_v36 = vmul.f32 %v537_v29, %v658_v0  ;;  %v231_v37 = vmul.f32 %v538_v30, %v658_v0 }
  0x2d   : > { %597 = vst [vmem:[%s690_s24 + $0x30] sm:$0xff] %v572_v33   ;;  %v307_v38 = vsel %vm271_vm14, %v253_v27, %v289_v34 }
  0x2e   : > { %v308_v39 = vsel %vm272_vm15, %v254_v28, %v290_v35  ;;  %v255_v40 = vadd.f32 %v667_v9, %v230_v36  ;;  %v256_v41 = vadd.f32 %v667_v9, %v231_v37 }
  0x2f   : > { %v577_v42 = vpack.c.bf16 %v308_v39, %v307_v38 }
  0x30   : > { %vm273_vm0 = vcmp.ge.f32.partialorder %v255_v40, 0.0  ;;  %vm274_vm1 = vcmp.ge.f32.partialorder %v256_v41, 0.0  ;;  %v291_v43 = vmul.f32 0.01, %v255_v40  ;;  %v292_v44 = vmul.f32 0.01, %v256_v41 }
  0x31   : > { %598 = vst [vmem:[%s690_s24 + $0x38] sm:$0xff] %v577_v42  }
  0x32   : > { %v309_v45 = vsel %vm273_vm0, %v255_v40, %v291_v43  ;;  %v310_v46 = vsel %vm274_vm1, %v256_v41, %v292_v44 }
  0x33   : > { %v582_v47 = vpack.c.bf16 %v310_v46, %v309_v45 }
  0x35   : > { %599 = vst [vmem:[%s690_s24 + $0x40] sm:$0xff] %v582_v47  }
  0x36 PF: > { %s13_s12 = sadd.s32 1, %s615_s12  }
  0x37   : > { %p10_p4 = scmp.ge.s32.totalorder %s13_s12, 6  }
  0x39   :  { %12 = sbr.rel (!%p10_p4) target bundleno = 1 (0x1), region = 62 }

// kernel: double_conv.4
= control target key start
LH: loop header
LB: loop body
LE: loop exit
PB: predicated region body
PF: predicated region fallthrough
CT: control target
= control target key end

     0   :  { %s3867_s21 = smov 0   ;;  %s4921_s0 = inlined_call_operand.vmem [shape: bf16[4,198,8], index: 0, kind: input, shape index: {}]   ;;  %s4922_s1 = inlined_call_operand.vmem [shape: bf16[9,8,128], index: 1, kind: input, shape index: {}]   ;;  %s4923_s2 = inlined_call_operand.vmem [shape: f32[1,128], index: 2, kind: input, shape index: {}]   ;;  %s4924_s3 = inlined_call_operand.vmem [shape: f32[1,128], index: 3, kind: input, shape index: {}]   ;;  %s4925_s4 = inlined_call_operand.vmem [shape: bf16[4,144,128], index: 4, kind: output, shape index: {0}]   ;;  %s4926_s5 = inlined_call_operand.vmem [shape: f32[1,128], index: 5, kind: output, shape index: {1}]   ;;  %s4927_s6 = inlined_call_operand.vmem [shape: f32[1,128], index: 6, kind: output, shape index: {2}]  }
   0x1 LB: > { %s3873_s22 = sadd.s32 4294967295, %s3827_s21   ;;  %p2811_p0 = scmp.ge.s32.totalorder %s3827_s21, 1  ;;  %s3827_s21 = sphi %s3867_s21, %s17_s21  }
   0x2   : > { %p207_p1 = scmp.lt.s32.totalorder %s3827_s21, 5 }
   0x4   : > { %p208_p2 = pnand %p2811_p0, %p207_p1 }
   0x5   : > { %p237_p3 = scmp.lt.s32.totalorder (!%p208_p2), %s3873_s22, 3  ;;  %p2814_p4 = scmp.ne.s32.totalorder (!%p208_p2), %s3873_s22, 0 }
   0x6   : > { %211 = sbr.rel (%p208_p2) target bundleno = 624 (0x270), region = 36 }
   0xd   : > { %s238_s23 = scalar_select %p237_p3, %s3873_s22, 3 }
   0xe   : > { %251 = sbr.rel (%p2814_p4) target bundleno = 21 (0x15), region = 40  ;;  %v3829_v0 = vmov (!%p2814_p4), 0.0  }
   0xf   : > { %s3735_s24 = smul.u32 100, %s238_s23  ;;  %252 = vst [vmem:[#allocation2] sm:$0x1] (!%p2814_p4), %v3829_v0  ;;  %253 = vst [vmem:[#allocation3] sm:$0x1] (!%p2814_p4), %v3829_v0 }
  0x10   : > { %s3736_s25 = smul.u32 72, %s238_s23 }
  0x11   : > { %s3882_s28 = scalar_lea.vmem %s4921_s0, %s3735_s24 }
  0x12   : > { %s3887_s7 = scalar_lea.vmem %s4925_s4, %s3736_s25 }
  0x15 PF: > { %vm429_vm0 = vcmask 1043456   ;;  %v2875_v1 = vld [vmem:[%s4922_s1 + $0x10] sm:$0xf]  ;;  %v2815_v2 = vld [vmem:[%s4922_s1 + $0x4] sm:$0xf]  ;;  %v3830_v3 = vmov 0.0  }
  0x16   : > { %3273 = vmatprep.subr.bf16.mxu0 %v3830_v3  ;;  %3121 = vmatprep.subr.bf16.mxu1 %v3830_v3  ;;  %v3899_v4 = vsel %vm429_vm0, %v2875_v1, 0  ;;  %v431_v5 = vsel %vm429_vm0, %v2815_v2, 0  ;;  %v254_v6 = vld [vmem:[%s3882_s28] sm:$0xf]  ;;  %v3904_v7 = vld [vmem:[%s3882_s28 + $0x8] sm:$0xff]   ;;  %vm3831_vm1 = vmmov 0  }
  0x17   : > { %3274 = vmatpush3.bf16.msra.mxu0 %v3899_v4  ;;  %3122 = vmatpush3.bf16.msra.mxu1 %v431_v5  ;;  %v3908_v8 = vld [vmem:[%s3882_s28 + $0x4] sm:$0xf]  ;;  %v333_v10 = vshll.u32 %v3904_v7, 16  ;;  %v843_v11 = vld [vmem:[%s3882_s28 + $0x8] sm:$0xe]  ;;  %v3930_v16 = vld [vmem:[%s3882_s28 + $0x10] sm:$0xff]  }
  0x18   : > { %3123 = vmatprep.mubr.msk.bf16.mxu1 %vm3831_vm1, %v3830_v3  ;;  %3275 = vmatprep.mubr.msk.bf16.mxu0 %vm3831_vm1, %v3830_v3  ;;  %v3915_v9 = vcombine.low %v254_v6, %v3908_v8  ;;  %v3921_v12 = vld [vmem:[%s3882_s28 + $0xc] sm:$0xf]  ;;  %vm324_vm2 = vsmask.f32 7424  ;;  %vm401_vm3 = vcmask 64512   ;;  %v3933_v18 = vld [vmem:[%s3882_s28 + $0x10] sm:$0xff]  }
  0x19   : > { %3311 = vmatprep.subr.bf16.mxu0 %v3830_v3  ;;  %3159 = vmatprep.subr.bf16.mxu1 %v3830_v3  ;;  %v3927_v15 = vcombine.low %v843_v11, %v3921_v12  ;;  %v335_v17 = vrot.slane %v333_v10, 1  ;;  %v1100_v22 = vshrl.u32 %v3930_v16, 16  ;;  %v2886_v23 = vld [vmem:[%s4922_s1 + $0x14] sm:$0xf]  ;;  %v1103_v24 = vshll.u32 %v3930_v16, 16  ;;  %v3948_v28 = vld [vmem:[%s3882_s28 + $0x18] sm:$0xff]  }
  0x1a   : > { %v326_v13 = vshrl.u32 %v3915_v9, 16  ;;  %v328_v14 = vshll.u32 %v3915_v9, 16  ;;  %v337_v25 = vshrl.u32 %v3904_v7, 16  ;;  %v341_v26 = vshll.u32 %v3933_v18, 16  ;;  %v272_v27 = vld [vmem:[%s4922_s1] sm:$0xf] }
  0x1b   : > { %v1092_v20 = vshrl.u32 %v3927_v15, 16  ;;  %v1095_v21 = vshll.u32 %v3927_v15, 16  ;;  %v1102_v32 = vrot.slane %v1100_v22, 1  ;;  %vm1090_vm4 = vsmask.f32 6400  ;;  %v3957_v41 = vld [vmem:[%s3882_s28 + $0x20] sm:$0xff]  }
  0x1c   : > { %v330_v19 = vrot.slane %v328_v14, 1  ;;  %v1105_v33 = vrot.slane %v1103_v24, 2  ;;  %v557_v34 = vsel %vm429_vm0, %v272_v27, 0  ;;  %v1109_v37 = vshrl.u32 %v3948_v28, 16  ;;  %v3962_v46 = vld [vmem:[%s3882_s28 + $0x18] sm:$0xff]   ;;  %v3978_v57 = vld [vmem:[%s3882_s28 + $0x28] sm:$0xff]  }
  0x1d   : > { %v1094_v30 = vrot.slane %v1092_v20, 1  ;;  %v1097_v31 = vrot.slane %v1095_v21, 2  ;;  %v1112_v38 = vshll.u32 %v3948_v28, 16  ;;  %v1387_v40 = vsel %vm429_vm0, %v2886_v23, 0  ;;  %v3983_v60 = vld [vmem:[%s3882_s28 + $0x20] sm:$0xff]   ;;  %v3996_v11 = vld [vmem:[%s3882_s28 + $0x30] sm:$0xff]  }
  0x1e   : > { %v331_v29 = vor.u32 %v330_v19, %v326_v13  ;;  %v1106_v39 = vor.u32 %v1105_v33, %v1102_v32  ;;  %v339_v42 = vor.u32 %v337_v25, %v335_v17  ;;  %v343_v43 = vrot.slane %v341_v26, 1  ;;  %v1333_v33 = vld [vmem:[%s3882_s28 + $0x8] sm:$0xc]  ;;  %p2957_p5 = scmp.ne.s32.totalorder %s3873_s22, 3 }
  0x1f   : > { %v1098_v36 = vor.u32 %v1097_v31, %v1094_v30  ;;  %v1111_v44 = vrot.slane %v1109_v37, 1  ;;  %v1114_v45 = vrot.slane %v1112_v38, 2  ;;  %v1118_v49 = vshrl.u32 %v3957_v41, 16  ;;  %v4016_v31 = vld [vmem:[%s3882_s28 + $0x30] sm:$0xff]  }
  0x20   : > { %v336_v35 = vsel %vm324_vm2, %v331_v29, %v335_v17  ;;  %v1121_v50 = vshll.u32 %v3957_v41, 16  ;;  %v344_v51 = vsel %vm324_vm2, %v339_v42, %v343_v43  ;;  %v345_v52 = vshrl.u32 %v3933_v18, 16  ;;  %v4001_v17 = vld [vmem:[%s3882_s28 + $0x28] sm:$0xff]   ;;  %v4034_v42 = vld [vmem:[%s3882_s28 + $0x38] sm:$0xff]  }
  0x21   : > { %3124 = vmatmul.mubr.msk.bf16.vlgmr.msra.gmra.mrb[0].mxu1 %vm401_vm3, %v336_v35  ;;  %v1107_v47 = vsel %vm1090_vm4, %v1098_v36, %v1106_v39  ;;  %v1115_v48 = vor.u32 %v1114_v45, %v1111_v44  ;;  %v349_v53 = vshll.u32 %v3962_v46, 16  ;;  %v1120_v55 = vrot.slane %v1118_v49, 1 }
  0x22   : > { %3127 = vmatprep.mubr.msk.bf16.mxu1 %vm3831_vm1, %v3830_v3  ;;  %3160 = vmatpush3.bf16.msra.mxu1 %v557_v34  ;;  %v1123_v56 = vrot.slane %v1121_v50, 2  ;;  %v347_v58 = vor.u32 %v345_v52, %v343_v43  ;;  %v1127_v62 = vshrl.u32 %v3978_v57, 16  ;;  %v1130_v63 = vshll.u32 %v3978_v57, 16 }
  0x23   : > { %3197 = vmatprep.subr.bf16.mxu1 %v3830_v3  ;;  %3276 = vmatmul.mubr.msk.bf16.vlgmr.msra.gmra.mrb[0].mxu0 %vm401_vm3, %v1107_v47  ;;  %v1116_v54 = vsel %vm1090_vm4, %v1106_v39, %v1115_v48  ;;  %v351_v59 = vrot.slane %v349_v53, 1  ;;  %v353_v1 = vshrl.u32 %v3962_v46, 16  ;;  %v357_v2 = vshll.u32 %v3983_v60, 16  ;;  %v4052_v53 = vld [vmem:[%s3882_s28 + $0x40] sm:$0xff]  }
  0x24   : > { %3312 = vmatpush3.bf16.msra.mxu0 %v1387_v40  ;;  %3279 = vmatprep.mubr.msk.bf16.mxu0 %vm3831_vm1, %v3830_v3  ;;  %v1124_v61 = vor.u32 %v1123_v56, %v1120_v55  ;;  %v1129_v6 = vrot.slane %v1127_v62, 1  ;;  %v1132_v10 = vrot.slane %v1130_v63, 2  ;;  %v1136_v20 = vshrl.u32 %v3996_v11, 16  ;;  %v4067_v63 = vld [vmem:[%s3882_s28 + $0x48] ss:$0 sps:$4 sm:$0x11]  }
  0x25   : > { %3349 = vmatprep.subr.bf16.mxu0 %v3830_v3  ;;  %v352_v0 = vsel %vm324_vm2, %v347_v58, %v351_v59  ;;  %v355_v13 = vor.u32 %v353_v1, %v351_v59  ;;  %v359_v14 = vrot.slane %v357_v2, 1  ;;  %v1139_v21 = vshll.u32 %v3996_v11, 16 }
  0x26   : > { %v1125_v5 = vsel %vm1090_vm4, %v1115_v48, %v1124_v61  ;;  %v1133_v19 = vor.u32 %v1132_v10, %v1129_v6  ;;  %v361_v23 = vshrl.u32 %v3983_v60, 16  ;;  %v365_v24 = vshll.u32 %v4001_v17, 16  ;;  %v2897_v48 = vld [vmem:[%s4922_s1 + $0x18] sm:$0xf] }
  0x27   : > { %v360_v22 = vsel %vm324_vm2, %v355_v13, %v359_v14  ;;  %v1138_v26 = vrot.slane %v1136_v20, 1  ;;  %v1141_v27 = vrot.slane %v1139_v21, 2  ;;  %v369_v35 = vshrl.u32 %v4001_v17, 16  ;;  %v2844_v21 = vld [vmem:[%s4922_s1 + $0x8] sm:$0xf] }
  0x28   : > { %v1134_v25 = vsel %vm1090_vm4, %v1124_v61, %v1133_v19  ;;  %v363_v29 = vor.u32 %v361_v23, %v359_v14  ;;  %v367_v30 = vrot.slane %v365_v24, 1  ;;  %v373_v36 = vshll.u32 %v4016_v31, 16 }
  0x29   : > { %3128 = vmatmul.mubr.msk.bf16.gmra.mrb[4].mxu1 %vm401_vm3, %v344_v51  ;;  %v4021_v32 = vor.u32 %v1141_v27, %v1138_v26  ;;  %v2887_v38 = vcombine.low %v1333_v33, %v3921_v12  ;;  %v1341_v44 = vrot.slane %v3930_v16, 2  ;;  %vm1339_vm5 = vcmask 1045504   ;;  %v4114_v27 = vld [vmem:[%s3882_s28 + $0x40] sm:$0xff]   ;;  %v4126_v33 = vld [vmem:[%s3882_s28 + $0x48] sm:$0xff]  }
  0x2a   : > { %3131 = vmatprep.mubr.msk.bf16.mxu1 %vm3831_vm1, %v3830_v3  ;;  %v368_v34 = vsel %vm324_vm2, %v363_v29, %v367_v30  ;;  %v371_v39 = vor.u32 %v369_v35, %v367_v30  ;;  %v375_v40 = vrot.slane %v373_v36, 1  ;;  %v377_v12 = vshrl.u32 %v4016_v31, 16  ;;  %v4138_v36 = vld [vmem:[%s3882_s28 + $0x50] ss:$0 sps:$4 sm:$0x33]  }
  0x2b   : > { %3280 = vmatmul.mubr.msk.bf16.gmra.mrb[4].mxu0 %vm401_vm3, %v1116_v54  ;;  %v1143_v37 = vsel %vm1090_vm4, %v1133_v19, %v4021_v32  ;;  %v1340_v43 = vrot.slane %v2887_v38, 2  ;;  %v381_v47 = vshll.u32 %v4034_v42, 16  ;;  %v1628_v50 = vsel %vm429_vm0, %v2897_v48, 0  ;;  %v1512_v38 = vld [vmem:[%s3882_s28 + $0x10] sm:$0xc] }
  0x2c   : > { %3283 = vmatprep.mubr.msk.bf16.mxu0 %vm3831_vm1, %v3830_v3  ;;  %v376_v45 = vsel %vm324_vm2, %v371_v39, %v375_v40  ;;  %v379_v51 = vor.u32 %v377_v12, %v375_v40  ;;  %v1343_v54 = vrot.slane %v3948_v28, 2  ;;  %v385_v56 = vshrl.u32 %v4034_v42, 16  ;;  %v4148_v39 = vld [vmem:[%s3882_s28 + $0x14] sm:$0xf] }
  0x2d   : > { %v1342_v49 = vsel %vm1339_vm5, %v1340_v43, %v1341_v44  ;;  %v383_v52 = vrot.slane %v381_v47, 1  ;;  %v389_v58 = vshll.u32 %v4052_v53, 16  ;;  %v393_v2 = vshrl.u32 %v4052_v53, 16  ;;  %v2917_v47 = vld [vmem:[%s4922_s1 + $0x1c] sm:$0xf] }
  0x2e   : > { %v1344_v59 = vsel %vm1339_vm5, %v1341_v44, %v1343_v54  ;;  %v1347_v14 = vrot.slane %v3978_v57, 2  ;;  %v718_v23 = vsel %vm429_vm0, %v2844_v21, 0  ;;  %v1353_v29 = vrot.slane %v4114_v27, 2  ;;  %v4157_v44 = vld [vmem:[%s3882_s28 + $0x18] sm:$0xff]  }
  0x2f   : > { %v384_v55 = vsel %vm324_vm2, %v379_v51, %v383_v52  ;;  %v387_v61 = vor.u32 %v385_v56, %v383_v52  ;;  %v391_v62 = vrot.slane %v389_v58, 1  ;;  %v4154_v43 = vcombine.low %v1512_v38, %v4148_v39  ;;  %v4199_v58 = vld [vmem:[%s3882_s28 + $0x30] sm:$0xff]  }
  0x30   : > { %v1582_v12 = vrot.slane %v4157_v44, 2  ;;  %vm670_vm6 = vcmask 1046528   ;;  %v680_v38 = vrot.slane %v4001_v17, 1  ;;  %vm1759_vm7 = vsmask.f32 5376 }
  0x31   : > { %3132 = vmatmul.mubr.msk.bf16.gmra.mrb[8].mxu1 %vm401_vm3, %v352_v0  ;;  %v1345_v0 = vrot.slane %v3957_v41, 2  ;;  %v392_v1 = vsel %vm324_vm2, %v387_v61, %v391_v62  ;;  %v395_v10 = vor.u32 %v393_v2, %v391_v62  ;;  %v1588_v61 = vrot.slane %v4199_v58, 2 }
  0x32   : > { %3135 = vmatprep.mubr.msk.bf16.mxu1 %vm3831_vm1, %v3830_v3  ;;  %vm2008_vm8 = vcmask 1044480  }
  0x33   : > { %3284 = vmatmul.mubr.msk.bf16.gmra.mrb[8].mxu0 %vm401_vm3, %v1125_v5  ;;  %v397_v5 = vshll.u32 %v4067_v63, 16  ;;  %v1346_v6 = vsel %vm1339_vm5, %v1343_v54, %v1345_v0  ;;  %v1348_v20 = vsel %vm1339_vm5, %v1345_v0, %v1347_v14  ;;  %v4187_v54 = vld [vmem:[%s3882_s28 + $0x28] sm:$0xff]  }
  0x34   : > { %3287 = vmatprep.mubr.msk.bf16.mxu0 %vm3831_vm1, %v3830_v3 }
  0x35   : > { %v399_v13 = vrot.slane %v397_v5, 1  ;;  %v672_v5 = vrot.slane %v3904_v7, 1 }
  0x37   : > { %v400_v19 = vsel %vm324_vm2, %v395_v10, %v399_v13 }
  0x39   : > { %3136 = vmatmul.mubr.msk.bf16.gmra.mrb[12].mxu1 %vm401_vm3, %v360_v22  ;;  %v1349_v22 = vrot.slane %v3996_v11, 2 }
  0x3a   : > { %3139 = vmatprep.mubr.msk.bf16.mxu1 %vm3831_vm1, %v3830_v3 }
  0x3b   : > { %3288 = vmatmul.mubr.msk.bf16.gmra.mrb[12].mxu0 %vm401_vm3, %v1134_v25  ;;  %v1350_v24 = vsel %vm1339_vm5, %v1347_v14, %v1349_v22  ;;  %v4101_v25 = vld [vmem:[%s3882_s28 + $0x38] sm:$0xff]   ;;  %v4230_v14 = vld [vmem:[%s3882_s28 + $0x40] sm:$0xff]  }
  0x3c   : > { %3291 = vmatprep.mubr.msk.bf16.mxu0 %vm3831_vm1, %v3830_v3  ;;  %v1351_v26 = vrot.slane %v4101_v25, 2 }
  0x3e   : > { %v1354_v30 = vsel %vm1339_vm5, %v1351_v26, %v1353_v29 }
  0x41   : > { %3140 = vmatmul.mubr.msk.bf16.gmra.mrb[16].mxu1 %vm401_vm3, %v368_v34  ;;  %v1355_v34 = vrot.slane %v4126_v33, 2 }
  0x42   : > { %3143 = vmatprep.mubr.msk.bf16.mxu1 %vm3831_vm1, %v3830_v3 }
  0x43   : > { %3292 = vmatmul.mubr.msk.bf16.gmra.mrb[16].mxu0 %vm401_vm3, %v1143_v37  ;;  %v1356_v35 = vsel %vm1339_vm5, %v1353_v29, %v1355_v34  ;;  %v1357_v37 = vrot.slane %v4138_v36, 2  ;;  %v4257_v29 = vld [vmem:[%s3882_s28 + $0x50] sm:$0xff]  }
  0x44   : > { %3313 = vmatprep.mubr.msk.bf16.mxu0 %vm3831_vm1, %v3830_v3 }
  0x45   : > { %v1358_v40 = vsel %vm1339_vm5, %v1355_v34, %v1357_v37 }
  0x49   : > { %3144 = vmatmul.mubr.msk.bf16.gmra.mrb[20].mxu1 %vm401_vm3, %v376_v45  ;;  %v1581_v45 = vrot.slane %v4154_v43, 2 }
  0x4a   : > { %3147 = vmatprep.mubr.msk.bf16.mxu1 %vm3831_vm1, %v3830_v3 }
  0x4b   : > { %3314 = vmatmul.mubr.msk.bf16.vlgmr.msra.gmra.mrb[0].mxu0 %vm401_vm3, %v1342_v49  ;;  %v1583_v48 = vsel %vm1339_vm5, %v1581_v45, %v1582_v12  ;;  %v4173_v49 = vld [vmem:[%s3882_s28 + $0x20] sm:$0xff]   ;;  %v1764_v45 = vshll.u32 %v4154_v43, 16 }
  0x4c   : > { %3350 = vmatpush3.bf16.msra.mxu0 %v1628_v50  ;;  %3317 = vmatprep.mubr.msk.bf16.mxu0 %vm3831_vm1, %v3830_v3  ;;  %v1877_v50 = vsel %vm429_vm0, %v2917_v47, 0  ;;  %v1584_v51 = vrot.slane %v4173_v49, 2  ;;  %v1772_v47 = vshll.u32 %v4157_v44, 16 }
  0x4d   : > { %3387 = vmatprep.subr.bf16.mxu0 %v3830_v3 }
  0x4e   : > { %v1585_v52 = vsel %vm1339_vm5, %v1582_v12, %v1584_v51  ;;  %v1769_v12 = vshrl.u32 %v4157_v44, 16 }
  0x51   : > { %3148 = vmatmul.mubr.msk.bf16.gmra.mrb[24].mxu1 %vm401_vm3, %v384_v55  ;;  %v1586_v55 = vrot.slane %v4187_v54, 2 }
  0x52   : > { %3151 = vmatprep.mubr.msk.bf16.mxu1 %vm3831_vm1, %v3830_v3 }
  0x53   : > { %3318 = vmatmul.mubr.msk.bf16.gmra.mrb[4].mxu0 %vm401_vm3, %v1344_v59  ;;  %v1587_v56 = vsel %vm1339_vm5, %v1584_v51, %v1586_v55  ;;  %v664_v59 = vld [vmem:[%s3882_s28] sm:$0xe]  ;;  %v1589_v0 = vsel %vm1339_vm5, %v1586_v55, %v1588_v61  ;;  %v1766_v51 = vrot.slane %v1764_v45, 3  ;;  %v1774_v55 = vrot.slane %v1772_v47, 3 }
  0x54   : > { %3321 = vmatprep.mubr.msk.bf16.mxu0 %vm3831_vm1, %v3830_v3  ;;  %v2845_v62 = vcombine.low %v664_v59, %v3908_v8  ;;  %v2855_v8 = vld [vmem:[%s4922_s1 + $0xc] sm:$0xf] }
  0x55   : > { %v959_v13 = vsel %vm429_vm0, %v2855_v8, 0 }
  0x56   : > { %v671_v2 = vrot.slane %v2845_v62, 1  ;;  %v1781_v62 = vshll.u32 %v4173_v49, 16 }
  0x58   : > { %v673_v10 = vsel %vm670_vm6, %v671_v2, %v672_v5  ;;  %v2928_v2 = vld [vmem:[%s4922_s1 + $0x20] sm:$0xf]  ;;  %v1783_v8 = vrot.slane %v1781_v62, 3 }
  0x59   : > { %3152 = vmatmul.mubr.msk.bf16.gmra.mrb[28].mxu1 %vm401_vm3, %v392_v1  ;;  %v4213_v1 = vld [vmem:[%s3882_s28 + $0x38] sm:$0xff]  }
  0x5a   : > { %3155 = vmatprep.mubr.msk.bf16.mxu1 %vm3831_vm1, %v3830_v3 }
  0x5b   : > { %3322 = vmatmul.mubr.msk.bf16.gmra.mrb[8].mxu0 %vm401_vm3, %v1346_v6  ;;  %v1590_v6 = vrot.slane %v4213_v1, 2 }
  0x5c   : > { %3325 = vmatprep.mubr.msk.bf16.mxu0 %vm3831_vm1, %v3830_v3 }
  0x61   : > { %3156 = vmatmul.mubr.msk.bf16.gmra.mrb[32].mxu1 %vm401_vm3, %v400_v19  ;;  %v674_v19 = vrot.slane %v3933_v18, 1 }
  0x62   : > { %3161 = vmatprep.mubr.msk.bf16.mxu1 %vm3831_vm1, %v3830_v3 }
  0x63   : > { %3326 = vmatmul.mubr.msk.bf16.gmra.mrb[12].mxu0 %vm401_vm3, %v1348_v20  ;;  %v1592_v20 = vrot.slane %v4230_v14, 2  ;;  %v675_v21 = vsel %vm670_vm6, %v672_v5, %v674_v19 }
  0x64   : > { %3329 = vmatprep.mubr.msk.bf16.mxu0 %vm3831_vm1, %v3830_v3 }
  0x69   : > { %3162 = vmatmul.mubr.msk.bf16.vlgmr.msra.gmra.mrb[0].mxu1 %vm401_vm3, %v3915_v9  ;;  %v1352_v9 = vsel %vm1339_vm5, %v1349_v22, %v1351_v26  ;;  %v1593_v22 = vsel %vm1339_vm5, %v1590_v6, %v1592_v20 }
  0x6a   : > { %3165 = vmatprep.mubr.msk.bf16.mxu1 %vm3831_vm1, %v3830_v3  ;;  %3198 = vmatpush3.bf16.msra.mxu1 %v718_v23  ;;  %v4244_v23 = vld [vmem:[%s3882_s28 + $0x48] sm:$0xff]  }
  0x6b   : > { %3235 = vmatprep.subr.bf16.mxu1 %v3830_v3  ;;  %3330 = vmatmul.mubr.msk.bf16.gmra.mrb[16].mxu0 %vm401_vm3, %v1350_v24  ;;  %v1594_v24 = vrot.slane %v4244_v23, 2 }
  0x6c   : > { %3333 = vmatprep.mubr.msk.bf16.mxu0 %vm3831_vm1, %v3830_v3 }
  0x71   : > { %3166 = vmatmul.mubr.msk.bf16.gmra.mrb[4].mxu1 %vm401_vm3, %v3904_v7  ;;  %v1591_v7 = vsel %vm1339_vm5, %v1588_v61, %v1590_v6  ;;  %v1778_v61 = vshrl.u32 %v4173_v49, 16  ;;  %v2056_v6 = vsel %vm429_vm0, %v2928_v2, 0 }
  0x72   : > { %3169 = vmatprep.mubr.msk.bf16.mxu1 %vm3831_vm1, %v3830_v3 }
  0x73   : > { %3334 = vmatmul.mubr.msk.bf16.gmra.mrb[20].mxu0 %vm401_vm3, %v1352_v9  ;;  %v1595_v9 = vsel %vm1339_vm5, %v1592_v20, %v1594_v24  ;;  %v1780_v5 = vrot.slane %v1778_v61, 2  ;;  %v1826_v61 = vshll.u32 %v4244_v23, 16 }
  0x74   : > { %3337 = vmatprep.mubr.msk.bf16.mxu0 %vm3831_vm1, %v3830_v3 }
  0x75   : > { %v1828_v2 = vrot.slane %v1826_v61, 3 }
  0x79   : > { %3170 = vmatmul.mubr.msk.bf16.gmra.mrb[8].mxu1 %vm401_vm3, %v3933_v18  ;;  %v676_v18 = vrot.slane %v3962_v46, 1 }
  0x7a   : > { %3173 = vmatprep.mubr.msk.bf16.mxu1 %vm3831_vm1, %v3830_v3 }
  0x7b   : > { %3338 = vmatmul.mubr.msk.bf16.gmra.mrb[24].mxu0 %vm401_vm3, %v1354_v30  ;;  %v677_v26 = vsel %vm670_vm6, %v674_v19, %v676_v18  ;;  %v1596_v30 = vrot.slane %v4257_v29, 2  ;;  %v1790_v19 = vshll.u32 %v4187_v54, 16 }
  0x7c   : > { %3341 = vmatprep.mubr.msk.bf16.mxu0 %vm3831_vm1, %v3830_v3 }
  0x7d   : > { %v1597_v37 = vsel %vm1339_vm5, %v1594_v24, %v1596_v30 }
  0x81   : > { %3174 = vmatmul.mubr.msk.bf16.gmra.mrb[12].mxu1 %vm401_vm3, %v3962_v46  ;;  %v678_v46 = vrot.slane %v3983_v60, 1 }
  0x82   : > { %3177 = vmatprep.mubr.msk.bf16.mxu1 %vm3831_vm1, %v3830_v3 }
  0x83   : > { %3342 = vmatmul.mubr.msk.bf16.gmra.mrb[28].mxu0 %vm401_vm3, %v1356_v35  ;;  %v679_v34 = vsel %vm670_vm6, %v676_v18, %v678_v46  ;;  %v3815_v35 = vld [vmem:[%s3882_s28 + $0x58] ss:$0 sps:$4 sm:$0x33]   ;;  %v1792_v18 = vrot.slane %v1790_v19, 3 }
  0x84   : > { %3345 = vmatprep.mubr.msk.bf16.mxu0 %vm3831_vm1, %v3830_v3  ;;  %v4367_v19 = vld [vmem:[%s3882_s28 + $0x58] ss:$0 sps:$4 sm:$0x77]  }
  0x89   : > { %3178 = vmatmul.mubr.msk.bf16.gmra.mrb[16].mxu1 %vm401_vm3, %v3983_v60  ;;  %v1598_v60 = vrot.slane %v3815_v35, 2 }
  0x8a   : > { %3181 = vmatprep.mubr.msk.bf16.mxu1 %vm3831_vm1, %v3830_v3 }
  0x8b   : > { %3346 = vmatmul.mubr.msk.bf16.gmra.mrb[32].mxu0 %vm401_vm3, %v1358_v40  ;;  %v1761_v40 = vshrl.u32 %v4154_v43, 16 }
  0x8c   : > { %3351 = vmatprep.mubr.msk.bf16.mxu0 %vm3831_vm1, %v3830_v3 }
  0x91   : > { %3182 = vmatmul.mubr.msk.bf16.gmra.mrb[20].mxu1 %vm401_vm3, %v4001_v17  ;;  %v1763_v17 = vrot.slane %v1761_v40, 2 }
  0x92   : > { %3185 = vmatprep.mubr.msk.bf16.mxu1 %vm3831_vm1, %v3830_v3 }
  0x93   : > { %3352 = vmatmul.mubr.msk.bf16.vlgmr.msra.gmra.mrb[0].mxu0 %vm401_vm3, %v1583_v48  ;;  %v681_v48 = vsel %vm670_vm6, %v678_v46, %v680_v38  ;;  %v1767_v43 = vor.u32 %v1766_v51, %v1763_v17  ;;  %v1814_v17 = vshrl.u32 %v4230_v14, 16  ;;  %v1817_v51 = vshll.u32 %v4230_v14, 16 }
  0x94   : > { %3388 = vmatpush3.bf16.msra.mxu0 %v1877_v50  ;;  %3355 = vmatprep.mubr.msk.bf16.mxu0 %vm3831_vm1, %v3830_v3  ;;  %v1599_v50 = vsel %vm1339_vm5, %v1596_v30, %v1598_v60  ;;  %v1808_v60 = vshll.u32 %v4213_v1, 16 }
  0x95   : > { %3425 = vmatprep.subr.bf16.mxu0 %v3830_v3 }
  0x96   : > { %v1810_v47 = vrot.slane %v1808_v60, 3  ;;  %v925_v60 = vrot.slane %v4114_v27, 1 }
  0x99   : > { %3186 = vmatmul.mubr.msk.bf16.gmra.mrb[24].mxu1 %vm401_vm3, %v4016_v31 }
  0x9a   : > { %3189 = vmatprep.mubr.msk.bf16.mxu1 %vm3831_vm1, %v3830_v3 }
  0x9b   : > { %3356 = vmatmul.mubr.msk.bf16.gmra.mrb[4].mxu0 %vm401_vm3, %v1585_v52  ;;  %v1771_v52 = vrot.slane %v1769_v12, 2 }
  0x9c   : > { %3359 = vmatprep.mubr.msk.bf16.mxu0 %vm3831_vm1, %v3830_v3 }
  0x9d   : > { %v1775_v59 = vor.u32 %v1774_v55, %v1771_v52 }
  0xa1   : > { %3190 = vmatmul.mubr.msk.bf16.gmra.mrb[28].mxu1 %vm401_vm3, %v4034_v42 }
  0xa2   : > { %3193 = vmatprep.mubr.msk.bf16.mxu1 %vm3831_vm1, %v3830_v3 }
  0xa3   : > { %3360 = vmatmul.mubr.msk.bf16.gmra.mrb[8].mxu0 %vm401_vm3, %v1587_v56  ;;  %v682_v56 = vrot.slane %v4016_v31, 1  ;;  %v1776_v31 = vsel %vm1759_vm7, %v1767_v43, %v1775_v59 }
  0xa4   : > { %3363 = vmatprep.mubr.msk.bf16.mxu0 %vm3831_vm1, %v3830_v3 }
  0xa9   : > { %3194 = vmatmul.mubr.msk.bf16.gmra.mrb[32].mxu1 %vm401_vm3, %v4052_v53 }
  0xaa   : > { %3199 = vmatprep.mubr.msk.bf16.mxu1 %vm3831_vm1, %v3830_v3 }
  0xab   : > { %3364 = vmatmul.mubr.msk.bf16.gmra.mrb[12].mxu0 %vm401_vm3, %v1589_v0  ;;  %v683_v0 = vsel %vm670_vm6, %v680_v38, %v682_v56  ;;  %v1805_v38 = vshrl.u32 %v4213_v1, 16 }
  0xac   : > { %3367 = vmatprep.mubr.msk.bf16.mxu0 %vm3831_vm1, %v3830_v3 }
  0xad   : > { %v1807_v12 = vrot.slane %v1805_v38, 2 }
  0xb1   : > { %3200 = vmatmul.mubr.msk.bf16.vlgmr.msra.gmra.mrb[0].mxu1 %vm401_vm3, %v673_v10  ;;  %v684_v10 = vrot.slane %v4034_v42, 1  ;;  %v686_v42 = vrot.slane %v4052_v53, 1  ;;  %v688_v53 = vrot.slane %v4067_v63, 1  ;;  %v912_v63 = vrot.slane %v3927_v15, 1 }
  0xb2   : > { %3203 = vmatprep.mubr.msk.bf16.mxu1 %vm3831_vm1, %v3830_v3  ;;  %3236 = vmatpush3.bf16.msra.mxu1 %v959_v13  ;;  %v1784_v13 = vor.u32 %v1783_v8, %v1780_v5  ;;  %v1819_v15 = vrot.slane %v1817_v51, 3  ;;  %v1832_v5 = vshrl.u32 %v4257_v29, 16  ;;  %v1835_v8 = vshll.u32 %v4257_v29, 16 }
  0xb3   : > { %3463 = vmatprep.subr.bf16.mxu1 %v3830_v3  ;;  %3368 = vmatmul.mubr.msk.bf16.gmra.mrb[16].mxu0 %vm401_vm3, %v1591_v7  ;;  %v1787_v7 = vshrl.u32 %v4187_v54, 16  ;;  %v685_v20 = vsel %vm670_vm6, %v682_v56, %v684_v10  ;;  %v687_v46 = vsel %vm670_vm6, %v684_v10, %v686_v42  ;;  %v689_v40 = vsel %vm670_vm6, %v686_v42, %v688_v53 }
  0xb4   : > { %3371 = vmatprep.mubr.msk.bf16.mxu0 %vm3831_vm1, %v3830_v3  ;;  %v1816_v56 = vrot.slane %v1814_v17, 2  ;;  %v1145_v17 = vshrl.u32 %v4101_v25, 16  ;;  %v1148_v51 = vshll.u32 %v4101_v25, 16 }
  0xb6   : > { %v1820_v43 = vor.u32 %v1819_v15, %v1816_v56  ;;  %v1150_v56 = vrot.slane %v1148_v51, 2 }
  0xb9   : > { %3204 = vmatmul.mubr.msk.bf16.gmra.mrb[4].mxu1 %vm401_vm3, %v675_v21  ;;  %v1785_v21 = vsel %vm1759_vm7, %v1775_v59, %v1784_v13  ;;  %v1823_v59 = vshrl.u32 %v4244_v23, 16 }
  0xba   : > { %3207 = vmatprep.mubr.msk.bf16.mxu1 %vm3831_vm1, %v3830_v3 }
  0xbb   : > { %3372 = vmatmul.mubr.msk.bf16.gmra.mrb[20].mxu0 %vm401_vm3, %v1593_v22  ;;  %v1789_v22 = vrot.slane %v1787_v7, 2  ;;  %v1837_v7 = vrot.slane %v1835_v8, 3 }
  0xbc   : > { %3375 = vmatprep.mubr.msk.bf16.mxu0 %vm3831_vm1, %v3830_v3 }
  0xbd   : > { %v1793_v24 = vor.u32 %v1792_v18, %v1789_v22  ;;  %v1844_v22 = vshll.u32 %v4367_v19, 16 }
  0xbf   : > { %v1794_v30 = vsel %vm1759_vm7, %v1784_v13, %v1793_v24  ;;  %v1834_v13 = vrot.slane %v1832_v5, 2 }
  0xc1   : > { %3208 = vmatmul.mubr.msk.bf16.gmra.mrb[8].mxu1 %vm401_vm3, %v677_v26  ;;  %v1796_v26 = vshrl.u32 %v4199_v58, 16 }
  0xc2   : > { %3211 = vmatprep.mubr.msk.bf16.mxu1 %vm3831_vm1, %v3830_v3 }
  0xc3   : > { %3376 = vmatmul.mubr.msk.bf16.gmra.mrb[24].mxu0 %vm401_vm3, %v1595_v9  ;;  %v1799_v9 = vshll.u32 %v4199_v58, 16 }
  0xc4   : > { %3379 = vmatprep.mubr.msk.bf16.mxu0 %vm3831_vm1, %v3830_v3 }
  0xc5   : > { %v1801_v35 = vrot.slane %v1799_v9, 3 }
  0xc9   : > { %3212 = vmatmul.mubr.msk.bf16.gmra.mrb[12].mxu1 %vm401_vm3, %v679_v34  ;;  %v1798_v34 = vrot.slane %v1796_v26, 2  ;;  %v1846_v26 = vrot.slane %v1844_v22, 3  ;;  %v2026_v22 = vrot.slane %v4367_v19, 3 }
  0xca   : > { %3215 = vmatprep.mubr.msk.bf16.mxu1 %vm3831_vm1, %v3830_v3 }
  0xcb   : > { %3380 = vmatmul.mubr.msk.bf16.gmra.mrb[28].mxu0 %vm401_vm3, %v1597_v37  ;;  %v1802_v37 = vor.u32 %v1801_v35, %v1798_v34 }
  0xcc   : > { %3383 = vmatprep.mubr.msk.bf16.mxu0 %vm3831_vm1, %v3830_v3 }
  0xcd   : > { %v1803_v45 = vsel %vm1759_vm7, %v1793_v24, %v1802_v37 }
  0xd1   : > { %3216 = vmatmul.mubr.msk.bf16.gmra.mrb[16].mxu1 %vm401_vm3, %v681_v48  ;;  %v913_v48 = vrot.slane %v3930_v16, 1  ;;  %v915_v16 = vrot.slane %v3948_v28, 1  ;;  %v1825_v28 = vrot.slane %v1823_v59, 2 }
  0xd2   : > { %3219 = vmatprep.mubr.msk.bf16.mxu1 %vm3831_vm1, %v3830_v3 }
  0xd3   : > { %3384 = vmatmul.mubr.msk.bf16.gmra.mrb[32].mxu0 %vm401_vm3, %v1599_v50  ;;  %v1811_v50 = vor.u32 %v1810_v47, %v1807_v12  ;;  %v914_v52 = vsel %vm670_vm6, %v912_v63, %v913_v48  ;;  %v916_v62 = vsel %vm670_vm6, %v913_v48, %v915_v16  ;;  %v927_v12 = vrot.slane %v4126_v33, 1  ;;  %v3818_v63 = vld [vmem:[%s3882_s28 + $0x50] ss:$0 sps:$4 sm:$0x11]  }
  0xd4   : > { %3389 = vmatprep.mubr.msk.bf16.mxu0 %vm3831_vm1, %v3830_v3  ;;  %v2014_v47 = vrot.slane %v4187_v54, 3  ;;  %v2016_v54 = vrot.slane %v4199_v58, 3  ;;  %v2018_v58 = vrot.slane %v4213_v1, 3 }
  0xd5   : > { %v1812_v55 = vsel %vm1759_vm7, %v1802_v37, %v1811_v50  ;;  %v2010_v37 = vrot.slane %v4157_v44, 3  ;;  %v2012_v44 = vrot.slane %v4173_v49, 3  ;;  %v928_v49 = vsel %vm670_vm6, %v925_v60, %v927_v12 }
  0xd6   : > { %v2017_v15 = vsel %vm2008_vm8, %v2014_v47, %v2016_v54 }
  0xd7   : > { %v2015_v48 = vsel %vm2008_vm8, %v2012_v44, %v2014_v47 }
  0xd9   : > { %3220 = vmatmul.mubr.msk.bf16.gmra.mrb[20].mxu1 %vm401_vm3, %v683_v0  ;;  %v1821_v0 = vsel %vm1759_vm7, %v1811_v50, %v1820_v43  ;;  %v929_v50 = vrot.slane %v3818_v63, 1 }
  0xda   : > { %3223 = vmatprep.mubr.msk.bf16.mxu1 %vm3831_vm1, %v3830_v3 }
  0xdb   : > { %3390 = vmatmul.mubr.msk.bf16.vlgmr.msra.gmra.mrb[0].mxu0 %vm401_vm3, %v1776_v31  ;;  %v1829_v31 = vor.u32 %v1828_v2, %v1825_v28  ;;  %v1163_v28 = vshrl.u32 %v4126_v33, 16  ;;  %v1166_v2 = vshll.u32 %v4126_v33, 16  ;;  %v1172_v33 = vshrl.u32 %v4138_v36, 16 }
  0xdc   : > { %3426 = vmatpush3.bf16.msra.mxu0 %v2056_v6  ;;  %3393 = vmatprep.mubr.msk.bf16.mxu0 %vm3831_vm1, %v3830_v3 }
  0xdd   : > { %v1830_v10 = vsel %vm1759_vm7, %v1820_v43, %v1829_v31  ;;  %v1157_v43 = vshll.u32 %v4114_v27, 16 }
  0xe1   : > { %3224 = vmatmul.mubr.msk.bf16.gmra.mrb[24].mxu1 %vm401_vm3, %v685_v20  ;;  %v1838_v20 = vor.u32 %v1837_v7, %v1834_v13  ;;  %v1174_v13 = vrot.slane %v1172_v33, 1 }
  0xe2   : > { %3227 = vmatprep.mubr.msk.bf16.mxu1 %vm3831_vm1, %v3830_v3 }
  0xe3   : > { %3394 = vmatmul.mubr.msk.bf16.gmra.mrb[4].mxu0 %vm401_vm3, %v1785_v21  ;;  %v1841_v21 = vshrl.u32 %v4367_v19, 16  ;;  %v1839_v42 = vsel %vm1759_vm7, %v1829_v31, %v1838_v20  ;;  %v1168_v31 = vrot.slane %v1166_v2, 2 }
  0xe4   : > { %3397 = vmatprep.mubr.msk.bf16.mxu0 %vm3831_vm1, %v3830_v3 }
  0xe5   : > { %v1843_v24 = vrot.slane %v1841_v21, 2 }
  0xe7   : > { %v1847_v9 = vor.u32 %v1846_v26, %v1843_v24  ;;  %v2181_v26 = vlaneseq }
  0xe9   : > { %3228 = vmatmul.mubr.msk.bf16.gmra.mrb[28].mxu1 %vm401_vm3, %v687_v46  ;;  %v1848_v34 = vsel %vm1759_vm7, %v1838_v20, %v1847_v9  ;;  %v4486_v9 = vshrl.u32 %v2181_v26, 7 }
  0xea   : > { %3231 = vmatprep.mubr.msk.bf16.mxu1 %vm3831_vm1, %v3830_v3 }
  0xeb   : > { %3398 = vmatmul.mubr.msk.bf16.gmra.mrb[8].mxu0 %vm401_vm3, %v1794_v30  ;;  %v2002_v30 = vld [vmem:[%s3882_s28 + $0x10] sm:$0x8] }
  0xec   : > { %3401 = vmatprep.mubr.msk.bf16.mxu0 %vm3831_vm1, %v3830_v3  ;;  %v2929_v35 = vcombine.low %v2002_v30, %v4148_v39 }
  0xee   : > { %v2009_v53 = vrot.slane %v2929_v35, 3 }
  0xf0   : > { %v2011_v39 = vsel %vm2008_vm8, %v2009_v53, %v2010_v37 }
  0xf1   : > { %3232 = vmatmul.mubr.msk.bf16.gmra.mrb[32].mxu1 %vm401_vm3, %v689_v40 }
  0xf2   : > { %3237 = vmatprep.mubr.msk.bf16.mxu1 %vm3831_vm1, %v3830_v3 }
  0xf3   : > { %3402 = vmatmul.mubr.msk.bf16.gmra.mrb[12].mxu0 %vm401_vm3, %v1803_v45  ;;  %v2013_v45 = vsel %vm2008_vm8, %v2010_v37, %v2012_v44 }
  0xf4   : > { %3405 = vmatprep.mubr.msk.bf16.mxu0 %vm3831_vm1, %v3830_v3 }
  0xf9   : > { %3238 = vmatmul.mubr.msk.bf16.vlgmr.msra.gmra.mrb[0].mxu1 %vm401_vm3, %v914_v52  ;;  %v930_v52 = vsel %vm670_vm6, %v927_v12, %v929_v50  ;;  %v2186_v50 = vadd.s32 32, %v4486_v9 }
  0xfa   : > { %3241 = vmatprep.mubr.msk.bf16.mxu1 %vm3831_vm1, %v3830_v3  ;;  %3464 = vmatpush3.bf16.msra.mxu1 %v3899_v4  ;;  %v917_v4 = vrot.slane %v3957_v41, 1  ;;  %v919_v41 = vrot.slane %v3978_v57, 1  ;;  %v921_v57 = vrot.slane %v3996_v11, 1  ;;  %v923_v11 = vrot.slane %v4101_v25, 1 }
  0xfb   : > { %3406 = vmatmul.mubr.msk.bf16.gmra.mrb[16].mxu0 %vm401_vm3, %v1812_v55  ;;  %v1147_v55 = vrot.slane %v1145_v17, 1  ;;  %v1154_v25 = vshrl.u32 %v4114_v27, 16  ;;  %v2187_v17 = vadd.s32 40, %v4486_v9 }
  0xfc   : > { %3409 = vmatprep.mubr.msk.bf16.mxu0 %vm3831_vm1, %v3830_v3  ;;  %v918_v6 = vsel %vm670_vm6, %v915_v16, %v917_v4  ;;  %v920_v18 = vsel %vm670_vm6, %v917_v4, %v919_v41  ;;  %v922_v46 = vsel %vm670_vm6, %v919_v41, %v921_v57  ;;  %v924_v38 = vsel %vm670_vm6, %v921_v57, %v923_v11 }
  0xfd   : > { %v926_v40 = vsel %vm670_vm6, %v923_v11, %v925_v60  ;;  %v1151_v16 = vor.u32 %v1150_v56, %v1147_v55  ;;  %v1156_v61 = vrot.slane %v1154_v25, 1  ;;  %v1165_v4 = vrot.slane %v1163_v28, 1 }
  0xfe   : > { %v4494_v35 = vmul.u32.u64.low 3817748708, %v4486_v9  ;;  %v4495_v11 = vmul.u32.u64.high 3817748708, %v4486_v9, %v4494_v35  ;;  %v4518_v55 = vmul.u32.u64.low 3817748708, %v2186_v50  ;;  %v4519_v56 = vmul.u32.u64.high 3817748708, %v2186_v50, %v4518_v55 }
  0xff   : > { %v1152_v59 = vsel %vm1090_vm4, %v4021_v32, %v1151_v16  ;;  %v2020_v32 = vrot.slane %v4230_v14, 3  ;;  %v1169_v8 = vor.u32 %v1168_v31, %v1165_v4  ;;  %v2022_v14 = vrot.slane %v4244_v23, 3 }
 0x100   : > { %v4533_v28 = vadd.s32 56, %v4486_v9 }
 0x101   : > { %3242 = vmatmul.mubr.msk.bf16.gmra.mrb[4].mxu1 %vm401_vm3, %v916_v62  ;;  %v1159_v62 = vrot.slane %v1157_v43, 2  ;;  %v2021_v5 = vsel %vm2008_vm8, %v2018_v58, %v2020_v32  ;;  %v2023_v41 = vsel %vm2008_vm8, %v2020_v32, %v2022_v14 }
 0x102   : > { %3245 = vmatprep.mubr.msk.bf16.mxu1 %vm3831_vm1, %v3830_v3 }
 0x103   : > { %3410 = vmatmul.mubr.msk.bf16.gmra.mrb[20].mxu0 %vm401_vm3, %v1821_v0  ;;  %v2019_v0 = vsel %vm2008_vm8, %v2016_v54, %v2018_v58  ;;  %v1160_v27 = vor.u32 %v1159_v62, %v1156_v61 }
 0x104   : > { %3413 = vmatprep.mubr.msk.bf16.mxu0 %vm3831_vm1, %v3830_v3 }
 0x105   : > { %v1161_v1 = vsel %vm1090_vm4, %v1151_v16, %v1160_v27  ;;  %v4521_v16 = vmul.u32.u64.low 3817748708, %v2187_v17  ;;  %v4522_v25 = vmul.u32.u64.high 3817748708, %v2187_v17, %v4521_v16 }
 0x109   : > { %3246 = vmatmul.mubr.msk.bf16.gmra.mrb[8].mxu1 %vm401_vm3, %v918_v6  ;;  %v1175_v6 = vshll.u32 %v4138_v36, 16  ;;  %v2024_v36 = vrot.slane %v4257_v29, 3 }
 0x10a   : > { %3249 = vmatprep.mubr.msk.bf16.mxu1 %vm3831_vm1, %v3830_v3 }
 0x10b   : > { %3414 = vmatmul.mubr.msk.bf16.gmra.mrb[24].mxu0 %vm401_vm3, %v1830_v10  ;;  %v1170_v10 = vsel %vm1090_vm4, %v1160_v27, %v1169_v8  ;;  %v1177_v7 = vrot.slane %v1175_v6, 2  ;;  %v2025_v21 = vsel %vm2008_vm8, %v2022_v14, %v2024_v36  ;;  %v4530_v27 = vadd.s32 48, %v4486_v9 }
 0x10c   : > { %3417 = vmatprep.mubr.msk.bf16.mxu0 %vm3831_vm1, %v3830_v3  ;;  %v4543_v33 = vmul.u32.u64.low 3817748708, %v4533_v28  ;;  %v4544_v6 = vmul.u32.u64.high 3817748708, %v4533_v28, %v4543_v33 }
 0x10d   : > { %v1178_v20 = vor.u32 %v1177_v7, %v1174_v13  ;;  %v4536_v4 = vmul.u32.u64.low 3817748708, %v4530_v27  ;;  %v4537_v31 = vmul.u32.u64.high 3817748708, %v4530_v27, %v4536_v4  ;;  %v2261_v13 = vshrl.u32 %v4522_v25, 4 }
 0x10f   : > { %v1179_v23 = vsel %vm1090_vm4, %v1169_v8, %v1178_v20  ;;  %v2250_v8 = vshrl.u32 %v4519_v56, 4  ;;  %v2262_v26 = vmul.u32 18, %v2261_v13 }
 0x111   : > { %3250 = vmatmul.mubr.msk.bf16.gmra.mrb[12].mxu1 %vm401_vm3, %v920_v18  ;;  %v2027_v18 = vsel %vm2008_vm8, %v2024_v36, %v2026_v22 }
 0x112   : > { %3253 = vmatprep.mubr.msk.bf16.mxu1 %vm3831_vm1, %v3830_v3 }
 0x113   : > { %3418 = vmatmul.mubr.msk.bf16.gmra.mrb[28].mxu0 %vm401_vm3, %v1839_v42 }
 0x114   : > { %3421 = vmatprep.mubr.msk.bf16.mxu0 %vm3831_vm1, %v3830_v3 }
 0x119   : > { %3254 = vmatmul.mubr.msk.bf16.gmra.mrb[16].mxu1 %vm401_vm3, %v922_v46 }
 0x11a   : > { %3257 = vmatprep.mubr.msk.bf16.mxu1 %vm3831_vm1, %v3830_v3 }
 0x11b   : > { %3422 = vmatmul.mubr.msk.bf16.gmra.mrb[32].mxu0 %vm401_vm3, %v1848_v34 }
 0x11c   : > { %3427 = vmatprep.mubr.msk.bf16.mxu0 %vm3831_vm1, %v3830_v3 }
 0x121   : > { %3258 = vmatmul.mubr.msk.bf16.gmra.mrb[20].mxu1 %vm401_vm3, %v924_v38  ;;  %v2184_v38 = vadd.s32 16, %v4486_v9 }
 0x122   : > { %3261 = vmatprep.mubr.msk.bf16.mxu1 %vm3831_vm1, %v3830_v3 }
 0x123   : > { %3428 = vmatmul.mubr.msk.bf16.vlgmr.msra.gmra.mrb[0].mxu0 %vm401_vm3, %v2011_v39  ;;  %v2185_v39 = vadd.s32 24, %v4486_v9 }
 0x124   : > { %3431 = vmatprep.mubr.msk.bf16.mxu0 %vm3831_vm1, %v3830_v3 }
 0x129   : > { %3262 = vmatmul.mubr.msk.bf16.gmra.mrb[24].mxu1 %vm401_vm3, %v926_v40 }
 0x12a   : > { %3265 = vmatprep.mubr.msk.bf16.mxu1 %vm3831_vm1, %v3830_v3 }
 0x12b   : > { %3432 = vmatmul.mubr.msk.bf16.gmra.mrb[4].mxu0 %vm401_vm3, %v2013_v45  ;;  %v4506_v45 = vmul.u32.u64.low 3817748708, %v2184_v38  ;;  %v4507_v12 = vmul.u32.u64.high 3817748708, %v2184_v38, %v4506_v45 }
 0x12c   : > { %3435 = vmatprep.mubr.msk.bf16.mxu0 %vm3831_vm1, %v3830_v3  ;;  %v4590_v45 = vsub.s32 %v2187_v17, %v2262_v26  ;;  %v4609_v17 = vadd.s32 80, %v4486_v9 }
 0x131   : > { %3266 = vmatmul.mubr.msk.bf16.gmra.mrb[28].mxu1 %vm401_vm3, %v928_v49  ;;  %v4509_v47 = vmul.u32.u64.low 3817748708, %v2185_v39  ;;  %v4510_v49 = vmul.u32.u64.high 3817748708, %v2185_v39, %v4509_v47 }
 0x132   : > { %3269 = vmatprep.mubr.msk.bf16.mxu1 %vm3831_vm1, %v3830_v3 }
 0x133   : > { %3436 = vmatmul.mubr.msk.bf16.gmra.mrb[8].mxu0 %vm401_vm3, %v2015_v48  ;;  %v2206_v48 = vshrl.u32 %v4495_v11, 4  ;;  %v2239_v61 = vshrl.u32 %v4510_v49, 4 }
 0x134   : > { %3439 = vmatprep.mubr.msk.bf16.mxu0 %vm3831_vm1, %v3830_v3 }
 0x135   : > { %v2207_v54 = vmul.u32 18, %v2206_v48 }
 0x139   : > { %3270 = vmatmul.mubr.msk.bf16.gmra.mrb[32].mxu1 %vm401_vm3, %v930_v52 }
 0x13a   : > { %3295 = vmatprep.mubr.msk.bf16.mxu1 %vm3831_vm1, %v3830_v3 }
 0x13b   : > { %3440 = vmatmul.mubr.msk.bf16.gmra.mrb[12].mxu0 %vm401_vm3, %v2017_v15 }
 0x13c   : > { %3443 = vmatprep.mubr.msk.bf16.mxu0 %vm3831_vm1, %v3830_v3 }
 0x141   : > { %3296 = vmatmul.mubr.msk.bf16.vlgmr.msra.gmra.mrb[20].mxu1 %vm401_vm3, %v1152_v59  ;;  %v2228_v59 = vshrl.u32 %v4507_v12, 4 }
 0x142   : > { %3299 = vmatprep.mubr.msk.bf16.mxu1 %vm3831_vm1, %v3830_v3 }
 0x143   : > { %3444 = vmatmul.mubr.msk.bf16.gmra.mrb[16].mxu0 %vm401_vm3, %v2019_v0  ;;  %v2208_v0 = vsub.s32 %v4486_v9, %v2207_v54  ;;  %v2229_v32 = vmul.u32 18, %v2228_v59 }
 0x144   : > { %3447 = vmatprep.mubr.msk.bf16.mxu0 %vm3831_vm1, %v3830_v3 }
 0x145   : > { %vm2398_vm9 = vcmp.ne.s32.totalorder %v2208_v0, 0  ;;  %vm2416_vm10 = vcmp.lt.s32.totalorder %v2208_v0, 0 }
 0x146   : > { %vm4554_vm13 = vmand %vm2416_vm10, %vm2398_vm9  ;;  %vm2403_vm9 = vcmp.ne.s32.totalorder %v4590_v45, 0  ;;  %vm2421_vm10 = vcmp.lt.s32.totalorder %v4590_v45, 0 }
 0x149   : > { %3300 = vmatmul.mubr.msk.bf16.gmra.mrb[24].mxu1 %vm401_vm3, %v1161_v1  ;;  %v2240_v1 = vmul.u32 18, %v2239_v61 }
 0x14a   : > { %3303 = vmatprep.mubr.msk.bf16.mxu1 %vm3831_vm1, %v3830_v3 }
 0x14b   : > { %3448 = vmatmul.mubr.msk.bf16.gmra.mrb[20].mxu0 %vm401_vm3, %v2021_v5  ;;  %v4551_v20 = vsub.s32 %v2185_v39, %v2240_v1  ;;  %v4636_v1 = vmul.u32.u64.low 3817748708, %v4609_v17  ;;  %v4637_v4 = vmul.u32.u64.high 3817748708, %v4609_v17, %v4636_v1 }
 0x14c   : > { %3451 = vmatprep.mubr.msk.bf16.mxu0 %vm3831_vm1, %v3830_v3 }
 0x14d   : > { %vm2419_vm2 = vcmp.lt.s32.totalorder %v4551_v20, 0 }
 0x151   : > { %3304 = vmatmul.mubr.msk.bf16.gmra.mrb[28].mxu1 %vm401_vm3, %v1170_v10  ;;  %v2452_v10 = vadd.s32 18, %v2208_v0 }
 0x152   : > { %3307 = vmatprep.mubr.msk.bf16.mxu1 %vm3831_vm1, %v3830_v3 }
 0x153   : > { %3452 = vmatmul.mubr.msk.bf16.gmra.mrb[24].mxu0 %vm401_vm3, %v2023_v41  ;;  %v4549_v41 = vsub.s32 %v2184_v38, %v2229_v32  ;;  %v2283_v38 = vshrl.u32 %v4544_v6, 4 }
 0x154   : > { %3455 = vmatprep.mubr.msk.bf16.mxu0 %vm3831_vm1, %v3830_v3 }
 0x155   : > { %vm2400_vm15 = vcmp.ne.s32.totalorder %v4549_v41, 0  ;;  %vm2418_vm0 = vcmp.lt.s32.totalorder %v4549_v41, 0  ;;  %v2284_v56 = vmul.u32 18, %v2283_v38 }
 0x157   : > { %v4646_v33 = vsub.s32 %v4533_v28, %v2284_v56  ;;  %v4662_v28 = vadd.s32 88, %v4486_v9 }
 0x159   : > { %3308 = vmatmul.mubr.msk.bf16.gmra.mrb[32].mxu1 %vm401_vm3, %v1179_v23  ;;  %v4683_v38 = vmul.u32.u64.low 3817748708, %v4662_v28  ;;  %v4684_v39 = vmul.u32.u64.high 3817748708, %v4662_v28, %v4683_v38 }
 0x15b   : > { %3456 = vmatmul.mubr.msk.bf16.gmra.mrb[28].mxu0 %vm401_vm3, %v2025_v21  ;;  %v4559_v21 = vadd.s32 64, %v4486_v9 }
 0x15c   : > { %3459 = vmatprep.mubr.msk.bf16.mxu0 %vm3831_vm1, %v3830_v3  ;;  %v2183_v3 = vadd.s32 8, %v4486_v9  ;;  %vm2401_vm1 = vcmp.ne.s32.totalorder %v4551_v20, 0 }
 0x15d   : > { %vm4596_vm4 = vmand %vm2419_vm2, %vm2401_vm1  ;;  %vm2405_vm1 = vcmp.ne.s32.totalorder %v4646_v33, 0  ;;  %vm2423_vm2 = vcmp.lt.s32.totalorder %v4646_v33, 0 }
 0x15e   : > { %v4497_v53 = vmul.u32.u64.low 3817748708, %v2183_v3  ;;  %v4498_v37 = vmul.u32.u64.high 3817748708, %v2183_v3, %v4497_v53 }
 0x15f   : > { %v2454_v53 = vadd.s32 18, %v4549_v41 }
 0x160   : > { %v2217_v51 = vshrl.u32 %v4498_v37, 4 }
 0x162   : > { %v2218_v58 = vmul.u32 18, %v2217_v51 }
 0x163   : > { %3460 = vmatmul.mubr.msk.bf16.gmra.mrb[32].mxu0 %vm401_vm3, %v2027_v18  ;;  %v2251_v18 = vmul.u32 18, %v2250_v8  ;;  %vm4585_vm3 = vmand %vm2418_vm0, %vm2400_vm15 }
 0x164   : > { %v2219_v2 = vsub.s32 %v2183_v3, %v2218_v58  ;;  %v2272_v3 = vshrl.u32 %v4537_v31, 4  ;;  %v2472_v16 = vsel %vm4585_vm3, %v2454_v53, %v4549_v41 }
 0x165   : > { %v4582_v37 = vsub.s32 %v2186_v50, %v2251_v18 }
 0x166   : > { %vm2399_vm11 = vcmp.ne.s32.totalorder %v2219_v2, 0  ;;  %vm2417_vm12 = vcmp.lt.s32.totalorder %v2219_v2, 0  ;;  %v2453_v22 = vadd.s32 18, %v2219_v2  ;;  %v2273_v51 = vmul.u32 18, %v2272_v3 }
 0x167   : > { %vm4561_vm14 = vmand %vm2417_vm12, %vm2399_vm11  ;;  %vm2402_vm7 = vcmp.ne.s32.totalorder %v4582_v37, 0  ;;  %vm2420_vm8 = vcmp.lt.s32.totalorder %v4582_v37, 0  ;;  %v2456_v61 = vadd.s32 18, %v4582_v37  ;;  %v4674_v3 = vadd.s32 96, %v4486_v9 }
 0x168   : > { %v2471_v11 = vsel %vm4561_vm14, %v2453_v22, %v2219_v2  ;;  %vm4627_vm11 = vmand %vm2420_vm8, %vm2402_vm7  ;;  %v4632_v2 = vsub.s32 %v4530_v27, %v2273_v51 }
 0x169   : > { %vm4604_vm6 = vcmp.lt.s32.totalorder %v2471_v11, 16  ;;  %vm4641_vm12 = vmand %vm2421_vm10, %vm2403_vm9  ;;  %v4701_v48 = vmul.u32.u64.low 3817748708, %v4674_v3  ;;  %v4702_v50 = vmul.u32.u64.high 3817748708, %v4674_v3, %v4701_v48 }
 0x16a   : > { %vm2404_vm15 = vcmp.ne.s32.totalorder %v4632_v2, 0  ;;  %vm2422_vm0 = vcmp.lt.s32.totalorder %v4632_v2, 0 }
 0x16b   : > { %vm4696_vm3 = vmand %vm2422_vm0, %vm2404_vm15  ;;  %v2338_v13 = vshrl.u32 %v4702_v50, 4 }
 0x1cc   : > { %v4482_v42 = vpop.f32.mrb[0].mxu1 }
 0x1cd   : > { %v3239_v29 = vpop.f32.mrb[1].mxu1 }
 0x1ce   : > { %v4484_v24 = vpop.f32.mrb[2].mxu1 }
 0x1cf   : > { %v3240_v57 = vpop.f32.mrb[3].mxu1 }
 0x1d0   : > { %v4566_v57 = vadd.s32 72, %v4486_v9 }
 0x1d2   : > { %v4593_v12 = vmul.u32.u64.low 3817748708, %v4566_v57  ;;  %v4594_v47 = vmul.u32.u64.high 3817748708, %v4566_v57, %v4593_v12 }
 0x1d4   : > { %v4488_v46 = vpop.f32.mrb[4].mxu1 }
 0x1d5   : > { %v3243_v30 = vpop.f32.mrb[5].mxu1 }
 0x1d6   : > { %v4490_v34 = vpop.f32.mrb[6].mxu1  ;;  %v2470_v30 = vsel %vm4554_vm13, %v2452_v10, %v2208_v0  ;;  %v2305_v10 = vshrl.u32 %v4594_v47, 4  ;;  %vm4650_vm13 = vcmp.lt.s32.totalorder %v2472_v16, 16  ;;  %v2316_v47 = vshrl.u32 %v4637_v4, 4 }
 0x1d7   : > { %v3244_v19 = vpop.f32.mrb[7].mxu1  ;;  %vm4600_vm5 = vcmp.lt.s32.totalorder %v2470_v30, 16  ;;  %v4671_v30 = vadd.s32 18, %v4632_v2 }
 0x1d8   : > { %v4576_v19 = vmul.u32.u64.low 3817748708, %v4559_v21  ;;  %v4577_v35 = vmul.u32.u64.high 3817748708, %v4559_v21, %v4576_v19  ;;  %v2306_v11 = vmul.u32 18, %v2305_v10 }
 0x1da   : > { %v2294_v32 = vshrl.u32 %v4577_v35, 4  ;;  %v2459_v35 = vadd.s32 18, %v4646_v33  ;;  %v4713_v56 = vsub.s32 %v4566_v57, %v2306_v11 }
 0x1dc   : > { %v4502_v60 = vpop.f32.mrb[8].mxu1  ;;  %v2295_v18 = vmul.u32 18, %v2294_v32  ;;  %vm2407_vm9 = vcmp.ne.s32.totalorder %v4713_v56, 0  ;;  %vm2425_vm10 = vcmp.lt.s32.totalorder %v4713_v56, 0 }
 0x1dd   : > { %v3247_v44 = vpop.f32.mrb[9].mxu1 }
 0x1de   : > { %v4504_v40 = vpop.f32.mrb[10].mxu1  ;;  %v2455_v44 = vadd.s32 18, %v4551_v20  ;;  %v4687_v12 = vsub.s32 %v4559_v21, %v2295_v18 }
 0x1df   : > { %v3248_v63 = vpop.f32.mrb[11].mxu1 }
 0x1e0   : > { %v2473_v25 = vsel %vm4596_vm4, %v2455_v44, %v4551_v20  ;;  %v2474_v20 = vsel %vm4627_vm11, %v2456_v61, %v4582_v37  ;;  %vm4708_vm4 = vmand %vm2423_vm2, %vm2405_vm1  ;;  %vm2406_vm7 = vcmp.ne.s32.totalorder %v4687_v12, 0  ;;  %vm2424_vm8 = vcmp.lt.s32.totalorder %v4687_v12, 0 }
 0x1e1   : > { %vm4654_vm14 = vcmp.lt.s32.totalorder %v2473_v25, 16  ;;  %v2477_v61 = vsel %vm4708_vm4, %v2459_v35, %v4646_v33  ;;  %v2460_v32 = vadd.s32 18, %v4687_v12  ;;  %v2461_v33 = vadd.s32 18, %v4713_v56  ;;  %vm4747_vm11 = vmand %vm2424_vm8, %vm2406_vm7 }
 0x1e3   : > { %v2478_v35 = vsel %vm4747_vm11, %v2460_v32, %v4687_v12 }
 0x1e4   : > { %v4516_v52 = vpop.f32.mrb[12].mxu1  ;;  %vm2496_vm2 = vcmp.lt.s32.totalorder %v2478_v35, 16 }
 0x1e5   : > { %v3251_v15 = vpop.f32.mrb[13].mxu1 }
 0x1e6   : > { %v4524_v43 = vpop.f32.mrb[14].mxu1 }
 0x1e7   : > { %v3252_v62 = vpop.f32.mrb[15].mxu1 }
 0x1e8   : > { %v2457_v62 = vadd.s32 18, %v4590_v45 }
 0x1ea   : > { %v2475_v22 = vsel %vm4641_vm12, %v2457_v62, %v4590_v45  ;;  %v2317_v62 = vmul.u32 18, %v2316_v47  ;;  %vm4759_vm12 = vmand %vm2425_vm10, %vm2407_vm9 }
 0x1eb   : > { %v2479_v11 = vsel %vm4759_vm12, %v2461_v33, %v4713_v56 }
 0x1ec   : > { %v4539_v5 = vpop.f32.mrb[16].mxu1  ;;  %v4752_v10 = vsub.s32 %v4609_v17, %v2317_v62 }
 0x1ed   : > { %v3255_v14 = vpop.f32.mrb[17].mxu1 }
 0x1ee   : > { %v4547_v7 = vpop.f32.mrb[18].mxu1  ;;  %vm2408_vm15 = vcmp.ne.s32.totalorder %v4752_v10, 0  ;;  %vm2426_vm0 = vcmp.lt.s32.totalorder %v4752_v10, 0 }
 0x1ef   : > { %v3256_v36 = vpop.f32.mrb[19].mxu1  ;;  %vm4807_vm1 = vmand %vm2426_vm0, %vm2408_vm15 }
 0x1f6   : > { %v2092_v63 = vpop.f32.mrb[0].mxu0 }
 0x1f7   : > { %v3465_v54 = vadd.f32 %v2092_v63, %v4482_v42  ;;  %v3429_v55 = vpop.f32.mrb[1].mxu0 }
 0x1f8   : > { %v2095_v15 = vpop.f32.mrb[2].mxu0 }
 0x1f9   : > { %v2542_v42 = vsel %vm4600_vm5, %v3465_v54, 0.0  ;;  %v3466_v58 = vadd.f32 %v2095_v15, %v4484_v24  ;;  %v3430_v59 = vpop.f32.mrb[3].mxu0  ;;  %v4717_v15 = vadd.s32 104, %v4486_v9  ;;  %vm2492_vm5 = vcmp.lt.s32.totalorder %v2474_v20, 16 }
 0x1fa   : > { %v2587_v6 = vmul.f32 %v2542_v42, %v2542_v42 }
 0x1fb   : > { %v2543_v24 = vsel %vm4604_vm6, %v3466_v58, 0.0  ;;  %v2981_v31 = vpack.c.bf16 %v3466_v58, %v3465_v54  ;;  %vm4719_vm6 = vcmp.lt.s32.totalorder %v2475_v22, 16  ;;  %v2476_v58 = vsel %vm4696_vm3, %v4671_v30, %v4632_v2 }
 0x1fc   : > { %v2561_v27 = vadd.f32 %v2543_v24, %v2542_v42  ;;  %v2588_v14 = vmul.f32 %v2543_v24, %v2543_v24  ;;  %v4738_v4 = vmul.u32.u64.low 3817748708, %v4717_v15  ;;  %v4739_v24 = vmul.u32.u64.high 3817748708, %v4717_v15, %v4738_v4 }
 0x1fd   : > { %2982 = vst [vmem:[%s3887_s7] sm:$0xff] %v2981_v31   ;;  %v4764_v22 = vadd.s32 112, %v4486_v9  ;;  %vm4814_vm3 = vcmp.lt.s32.totalorder %v2479_v11, 16 }
 0x1fe   : > { %v2605_v36 = vadd.f32 %v2588_v14, %v2587_v6  ;;  %v2100_v23 = vpop.f32.mrb[4].mxu0  ;;  %v2327_v6 = vshrl.u32 %v4684_v39, 4  ;;  %v2349_v12 = vshrl.u32 %v4739_v24, 4 }
 0x1ff   : > { %v3467_v29 = vadd.f32 %v2100_v23, %v4488_v46  ;;  %v3433_v26 = vpop.f32.mrb[5].mxu0  ;;  %v4783_v38 = vmul.u32.u64.low 3817748708, %v4764_v22  ;;  %v4784_v39 = vmul.u32.u64.high 3817748708, %v4764_v22, %v4783_v38 }
 0x200   : > { %v2103_v19 = vpop.f32.mrb[6].mxu0  ;;  %v4772_v26 = vadd.s32 120, %v4486_v9  ;;  %v2350_v62 = vmul.u32 18, %v2349_v12 }
 0x201   : > { %v2544_v46 = vsel %vm4650_vm13, %v3467_v29, 0.0  ;;  %v3468_v53 = vadd.f32 %v2103_v19, %v4490_v34  ;;  %v3434_v37 = vpop.f32.mrb[7].mxu0  ;;  %vm2494_vm13 = vcmp.lt.s32.totalorder %v2476_v58, 16  ;;  %v2360_v24 = vshrl.u32 %v4784_v39, 4 }
 0x202   : > { %v2562_v44 = vadd.f32 %v2561_v27, %v2544_v46  ;;  %v2589_v45 = vmul.f32 %v2544_v46, %v2544_v46  ;;  %v2328_v46 = vmul.u32 18, %v2327_v6  ;;  %v2339_v37 = vmul.u32 18, %v2338_v13 }
 0x203   : > { %v2545_v49 = vsel %vm4654_vm14, %v3468_v53, 0.0  ;;  %v2986_v63 = vpack.c.bf16 %v3468_v53, %v3467_v29  ;;  %vm4767_vm14 = vcmp.lt.s32.totalorder %v2477_v61, 16 }
 0x204   : > { %v2606_v21 = vadd.f32 %v2605_v36, %v2589_v45  ;;  %v2563_v51 = vadd.f32 %v2562_v44, %v2545_v49  ;;  %v2590_v54 = vmul.f32 %v2545_v49, %v2545_v49 }
 0x205   : > { %3023 = vst [vmem:[%s3887_s7 + $0x8] sm:$0xff] %v2986_v63   ;;  %v4790_v63 = vmul.u32.u64.low 3817748708, %v4772_v26  ;;  %v4791_v34 = vmul.u32.u64.high 3817748708, %v4772_v26, %v4790_v63 }
 0x206   : > { %v2607_v16 = vadd.f32 %v2606_v21, %v2590_v54  ;;  %v2108_v25 = vpop.f32.mrb[8].mxu0 }
 0x207   : > { %v3469_v59 = vadd.f32 %v2108_v25, %v4502_v60  ;;  %v3437_v57 = vpop.f32.mrb[9].mxu0  ;;  %v4800_v25 = vsub.s32 %v4674_v3, %v2339_v37 }
 0x208   : > { %v2111_v0 = vpop.f32.mrb[10].mxu0 }
 0x209   : > { %v2546_v2 = vsel %vm2492_vm5, %v3469_v59, 0.0  ;;  %v3470_v60 = vadd.f32 %v2111_v0, %v4504_v40  ;;  %v3438_v1 = vpop.f32.mrb[11].mxu0  ;;  %v4840_v40 = vsub.s32 %v4717_v15, %v2350_v62  ;;  %vm2428_vm8 = vcmp.lt.s32.totalorder %v4800_v25, 0 }
 0x20a   : > { %v2564_v31 = vadd.f32 %v2563_v51, %v2546_v2  ;;  %v2591_v8 = vmul.f32 %v2546_v2, %v2546_v2  ;;  %v2462_v51 = vadd.s32 18, %v4752_v10  ;;  %v4822_v2 = vadd.s32 136, %v4486_v9 }
 0x20b   : > { %v2547_v27 = vsel %vm4719_vm6, %v3470_v60, 0.0  ;;  %v2991_v14 = vpack.c.bf16 %v3470_v60, %v3469_v59  ;;  %vm2410_vm6 = vcmp.ne.s32.totalorder %v4800_v25, 0  ;;  %vm2411_vm11 = vcmp.ne.s32.totalorder %v4840_v40, 0 }
 0x20c   : > { %v2608_v41 = vadd.f32 %v2607_v16, %v2591_v8  ;;  %v2565_v20 = vadd.f32 %v2564_v31, %v2547_v27  ;;  %v2592_v36 = vmul.f32 %v2547_v27, %v2547_v27  ;;  %v2480_v1 = vsel %vm4807_vm1, %v2462_v51, %v4752_v10  ;;  %vm4857_vm10 = vmand %vm2428_vm8, %vm2410_vm6 }
 0x20d   : > { %3024 = vst [vmem:[%s3887_s7 + $0x10] sm:$0xff] %v2991_v14   ;;  %v2371_v10 = vshrl.u32 %v4791_v34, 4  ;;  %vm2498_vm9 = vcmp.lt.s32.totalorder %v2480_v1, 16  ;;  %vm2429_vm12 = vcmp.lt.s32.totalorder %v4840_v40, 0 }
 0x20e   : > { %v2609_v18 = vadd.f32 %v2608_v41, %v2592_v36  ;;  %v2116_v17 = vpop.f32.mrb[12].mxu0 }
 0x20f   : > { %v3471_v30 = vadd.f32 %v2116_v17, %v4516_v52  ;;  %v3441_v19 = vpop.f32.mrb[13].mxu0 }
 0x210   : > { %v2119_v53 = vpop.f32.mrb[14].mxu0  ;;  %v2361_v19 = vmul.u32 18, %v2360_v24 }
 0x211   : > { %v2548_v44 = vsel %vm2494_vm13, %v3471_v30, 0.0  ;;  %v3472_v52 = vadd.f32 %v2119_v53, %v4524_v43  ;;  %v3442_v45 = vpop.f32.mrb[15].mxu0  ;;  %v4797_v43 = vsub.s32 %v4662_v28, %v2328_v46  ;;  %v4812_v28 = vadd.s32 128, %v4486_v9 }
 0x212   : > { %v2566_v47 = vadd.f32 %v2565_v20, %v2548_v44  ;;  %v2593_v49 = vmul.f32 %v2548_v44, %v2548_v44  ;;  %v4846_v20 = vmul.u32.u64.low 3817748708, %v4822_v2  ;;  %v4847_v36 = vmul.u32.u64.high 3817748708, %v4822_v2, %v4846_v20 }
 0x213   : > { %v2549_v48 = vsel %vm4767_vm14, %v3472_v52, 0.0  ;;  %v2996_v50 = vpack.c.bf16 %v3472_v52, %v3471_v30  ;;  %vm2409_vm4 = vcmp.ne.s32.totalorder %v4797_v43, 0  ;;  %vm2427_vm5 = vcmp.lt.s32.totalorder %v4797_v43, 0  ;;  %vm4871_vm14 = vmand %vm2429_vm12, %vm2411_vm11 }
 0x214   : > { %v1284_v21 = vpop.f32.mrb[20].mxu1  ;;  %v2610_v54 = vadd.f32 %v2609_v18, %v2593_v49  ;;  %v2567_v55 = vadd.f32 %v2566_v47, %v2549_v48  ;;  %v2594_v56 = vmul.f32 %v2549_v48, %v2549_v48  ;;  %v2463_v4 = vadd.s32 18, %v4797_v43  ;;  %vm4835_vm7 = vmand %vm2427_vm5, %vm2409_vm4 }
 0x215   : > { %v3297_v16 = vpop.f32.mrb[21].mxu1  ;;  %3025 = vst [vmem:[%s3887_s7 + $0x18] sm:$0xff] %v2996_v50   ;;  %v4832_v33 = vmul.u32.u64.low 3817748708, %v4812_v28  ;;  %v4833_v9 = vmul.u32.u64.high 3817748708, %v4812_v28, %v4832_v33  ;;  %v2464_v53 = vadd.s32 18, %v4800_v25  ;;  %v2372_v44 = vmul.u32 18, %v2371_v10 }
 0x216   : > { %v1287_v42 = vpop.f32.mrb[22].mxu1  ;;  %v2611_v59 = vadd.f32 %v2610_v54, %v2594_v56  ;;  %v2124_v57 = vpop.f32.mrb[16].mxu0  ;;  %v2481_v30 = vsel %vm4835_vm7, %v2463_v4, %v4797_v43  ;;  %v2465_v45 = vadd.s32 18, %v4840_v40  ;;  %v2362_v63 = vsub.s32 %v4764_v22, %v2361_v19 }
 0x217   : > { %v3298_v3 = vpop.f32.mrb[23].mxu1  ;;  %v3473_v0 = vadd.f32 %v2124_v57, %v4539_v5  ;;  %v3445_v32 = vpop.f32.mrb[17].mxu0  ;;  %vm2499_vm13 = vcmp.lt.s32.totalorder %v2481_v30, 16  ;;  %v2382_v34 = vshrl.u32 %v4833_v9, 4  ;;  %v2373_v56 = vsub.s32 %v4772_v26, %v2372_v44 }
 0x218   : > { %v2127_v60 = vpop.f32.mrb[18].mxu0  ;;  %v2393_v22 = vshrl.u32 %v4847_v36, 4  ;;  %vm2412_vm15 = vcmp.ne.s32.totalorder %v2362_v63, 0  ;;  %vm2430_vm0 = vcmp.lt.s32.totalorder %v2362_v63, 0  ;;  %v2466_v26 = vadd.s32 18, %v2362_v63 }
 0x219   : > { %v2550_v5 = vsel %vm2496_vm2, %v3473_v0, 0.0  ;;  %v3474_v31 = vadd.f32 %v2127_v60, %v4547_v7  ;;  %v3446_v8 = vpop.f32.mrb[19].mxu0  ;;  %v2383_v61 = vmul.u32 18, %v2382_v34  ;;  %vm2413_vm2 = vcmp.ne.s32.totalorder %v2373_v56, 0  ;;  %vm4882_vm5 = vmand %vm2430_vm0, %vm2412_vm15 }
 0x21a   : > { %v2568_v6 = vadd.f32 %v2567_v55, %v2550_v5  ;;  %v2595_v27 = vmul.f32 %v2550_v5, %v2550_v5  ;;  %v2394_v1 = vmul.u32 18, %v2393_v22  ;;  %v2467_v33 = vadd.s32 18, %v2373_v56 }
 0x21b   : > { %v2551_v7 = vsel %vm4814_vm3, %v3474_v31, 0.0  ;;  %v3001_v13 = vpack.c.bf16 %v3474_v31, %v3473_v0  ;;  %vm2431_vm3 = vcmp.lt.s32.totalorder %v2373_v56, 0  ;;  %v2384_v9 = vsub.s32 %v4812_v28, %v2383_v61 }
 0x21c   : > { %v1292_v41 = vpop.f32.mrb[24].mxu1  ;;  %v2612_v23 = vadd.f32 %v2611_v59, %v2595_v27  ;;  %v2569_v18 = vadd.f32 %v2568_v6, %v2551_v7  ;;  %v2596_v17 = vmul.f32 %v2551_v7, %v2551_v7  ;;  %vm4887_vm6 = vmand %vm2431_vm3, %vm2413_vm2 }
 0x21d   : > { %v3301_v29 = vpop.f32.mrb[25].mxu1  ;;  %3026 = vst [vmem:[%s3887_s7 + $0x20] sm:$0xff] %v3001_v13   ;;  %v2484_v13 = vsel %vm4882_vm5, %v2466_v26, %v2362_v63  ;;  %vm2414_vm7 = vcmp.ne.s32.totalorder %v2384_v9, 0  ;;  %vm2432_vm8 = vcmp.lt.s32.totalorder %v2384_v9, 0 }
 0x21e   : > { %v1295_v15 = vpop.f32.mrb[26].mxu1  ;;  %v2613_v35 = vadd.f32 %v2612_v23, %v2596_v17  ;;  %v2132_v11 = vpop.f32.mrb[20].mxu0  ;;  %v2485_v17 = vsel %vm4887_vm6, %v2467_v33, %v2373_v56 }
 0x21f   : > { %v3302_v46 = vpop.f32.mrb[27].mxu1  ;;  %v3475_v37 = vadd.f32 %v2132_v11, %v1284_v21  ;;  %v3449_v38 = vpop.f32.mrb[21].mxu0  ;;  %v2482_v21 = vsel %vm4857_vm10, %v2464_v53, %v4800_v25  ;;  %v2483_v25 = vsel %vm4871_vm14, %v2465_v45, %v4840_v40  ;;  %v2468_v11 = vadd.s32 18, %v2384_v9 }
 0x220   : > { %v2135_v52 = vpop.f32.mrb[22].mxu0  ;;  %vm2500_vm1 = vcmp.lt.s32.totalorder %v2482_v21, 16  ;;  %vm2501_vm4 = vcmp.lt.s32.totalorder %v2483_v25, 16  ;;  %vm2503_vm12 = vcmp.lt.s32.totalorder %v2485_v17, 16 }
 0x221   : > { %v2552_v12 = vsel %vm2498_vm9, %v3475_v37, 0.0  ;;  %v3476_v47 = vadd.f32 %v2135_v52, %v1287_v42  ;;  %v3450_v49 = vpop.f32.mrb[23].mxu0  ;;  %vm2502_vm9 = vcmp.lt.s32.totalorder %v2484_v13, 16 }
 0x222   : > { %v2570_v48 = vadd.f32 %v2569_v18, %v2552_v12  ;;  %v2597_v50 = vmul.f32 %v2552_v12, %v2552_v12 }
 0x223   : > { %v2553_v43 = vsel %vm2499_vm13, %v3476_v47, 0.0  ;;  %v3006_v54 = vpack.c.bf16 %v3476_v47, %v3475_v37  ;;  %vm4897_vm13 = vmand %vm2432_vm8, %vm2414_vm7 }
 0x224   : > { %v1300_v55 = vpop.f32.mrb[28].mxu1  ;;  %v2614_v16 = vadd.f32 %v2613_v35, %v2597_v50  ;;  %v2571_v42 = vadd.f32 %v2570_v48, %v2553_v43  ;;  %v2598_v58 = vmul.f32 %v2553_v43, %v2553_v43  ;;  %v2486_v47 = vsel %vm4897_vm13, %v2468_v11, %v2384_v9  ;;  %v2586_v9 = vld [vmem:[#allocation3] sm:$0x1] }
 0x225   : > { %v3305_v59 = vpop.f32.mrb[29].mxu1  ;;  %3027 = vst [vmem:[%s3887_s7 + $0x28] sm:$0xff] %v3006_v54   ;;  %vm2504_vm15 = vcmp.lt.s32.totalorder %v2486_v47, 16 }
 0x226   : > { %v1303_v57 = vpop.f32.mrb[30].mxu1  ;;  %v2615_v3 = vadd.f32 %v2614_v16, %v2598_v58  ;;  %v2140_v62 = vpop.f32.mrb[24].mxu0 }
 0x227   : > { %v3306_v0 = vpop.f32.mrb[31].mxu1  ;;  %v3477_v32 = vadd.f32 %v2140_v62, %v1292_v41  ;;  %v3453_v60 = vpop.f32.mrb[25].mxu0  ;;  %v2395_v41 = vsub.s32 %v4822_v2, %v2394_v1 }
 0x228   : > { %v2143_v4 = vpop.f32.mrb[26].mxu0 }
 0x229   : > { %v2554_v5 = vsel %vm2500_vm1, %v3477_v32, 0.0  ;;  %v3478_v31 = vadd.f32 %v2143_v4, %v1295_v15  ;;  %v3454_v8 = vpop.f32.mrb[27].mxu0  ;;  %vm2415_vm10 = vcmp.ne.s32.totalorder %v2395_v41, 0  ;;  %vm2433_vm11 = vcmp.lt.s32.totalorder %v2395_v41, 0 }
 0x22a   : > { %v2572_v6 = vadd.f32 %v2571_v42, %v2554_v5  ;;  %v2599_v27 = vmul.f32 %v2554_v5, %v2554_v5  ;;  %v2469_v39 = vadd.s32 18, %v2395_v41  ;;  %vm2451_vm14 = vmand %vm2433_vm11, %vm2415_vm10 }
 0x22b   : > { %v2555_v40 = vsel %vm2501_vm4, %v3478_v31, 0.0  ;;  %v3011_v10 = vpack.c.bf16 %v3478_v31, %v3477_v32  ;;  %v2560_v31 = vld [vmem:[#allocation2] sm:$0x1] }
 0x22c   : > { %v1308_v7 = vpop.f32.mrb[32].mxu1  ;;  %v2616_v20 = vadd.f32 %v2615_v3, %v2599_v27  ;;  %v2573_v36 = vadd.f32 %v2572_v6, %v2555_v40  ;;  %v2600_v23 = vmul.f32 %v2555_v40, %v2555_v40  ;;  %v2487_v48 = vsel %vm2451_vm14, %v2469_v39, %v2395_v41 }
 0x22d   : > { %v3309_v18 = vpop.f32.mrb[33].mxu1  ;;  %3028 = vst [vmem:[%s3887_s7 + $0x30] sm:$0xff] %v3011_v10   ;;  %vm2505_vm0 = vcmp.lt.s32.totalorder %v2487_v48, 16 }
 0x22e   : > { %v1311_v28 = vpop.f32.mrb[34].mxu1  ;;  %v2617_v29 = vadd.f32 %v2616_v20, %v2600_v23  ;;  %v2148_v15 = vpop.f32.mrb[28].mxu0  ;;  %v2731_v18 = vld [vmem:[%s4923_s2] sm:$0x1] (!%p2957_p5) }
 0x22f   : > { %v3310_v30 = vpop.f32.mrb[35].mxu1  ;;  %v3479_v19 = vadd.f32 %v2148_v15, %v1300_v55  ;;  %v3457_v35 = vpop.f32.mrb[29].mxu0 }
 0x230   : > { %v2151_v2 = vpop.f32.mrb[30].mxu0 }
 0x231   : > { %v2556_v53 = vsel %vm2502_vm9, %v3479_v19, 0.0  ;;  %v3480_v37 = vadd.f32 %v2151_v2, %v1303_v57  ;;  %v3458_v38 = vpop.f32.mrb[31].mxu0 }
 0x232   : > { %v2574_v44 = vadd.f32 %v2573_v36, %v2556_v53  ;;  %v2601_v52 = vmul.f32 %v2556_v53, %v2556_v53 }
 0x233   : > { %v2557_v45 = vsel %vm2503_vm12, %v3480_v37, 0.0  ;;  %v3016_v12 = vpack.c.bf16 %v3480_v37, %v3479_v19 }
 0x234   : > { %v2618_v49 = vadd.f32 %v2617_v29, %v2601_v52  ;;  %v2575_v63 = vadd.f32 %v2574_v44, %v2557_v45  ;;  %v2602_v34 = vmul.f32 %v2557_v45, %v2557_v45  ;;  %v2736_v29 = vld [vmem:[%s4924_s3] sm:$0x1] (!%p2957_p5) }
 0x235   : > { %3029 = vst [vmem:[%s3887_s7 + $0x38] sm:$0xff] %v3016_v12  }
 0x236   : > { %v2619_v50 = vadd.f32 %v2618_v49, %v2602_v34  ;;  %v2156_v21 = vpop.f32.mrb[32].mxu0 }
 0x237   : > { %v3481_v51 = vadd.f32 %v2156_v21, %v1308_v7  ;;  %v3461_v43 = vpop.f32.mrb[33].mxu0 }
 0x238   : > { %v2159_v54 = vpop.f32.mrb[34].mxu0 }
 0x239   : > { %v2558_v55 = vsel %vm2504_vm15, %v3481_v51, 0.0  ;;  %v3482_v56 = vadd.f32 %v2159_v54, %v1311_v28  ;;  %v3462_v22 = vpop.f32.mrb[35].mxu0 }
 0x23a   : > { %v2576_v16 = vadd.f32 %v2575_v63, %v2558_v55  ;;  %v2603_v42 = vmul.f32 %v2558_v55, %v2558_v55 }
 0x23b   : > { %v2559_v58 = vsel %vm2505_vm0, %v3482_v56, 0.0  ;;  %v3021_v59 = vpack.c.bf16 %v3482_v56, %v3481_v51 }
 0x23c   : > { %v2620_v57 = vadd.f32 %v2619_v50, %v2603_v42  ;;  %v2577_v25 = vadd.f32 %v2576_v16, %v2559_v58  ;;  %v2604_v61 = vmul.f32 %v2559_v58, %v2559_v58 }
 0x23d   : > { %3030 = vst [vmem:[%s3887_s7 + $0x40] sm:$0xff] %v3021_v59  }
 0x23e   : > { %v2578_v3 = vrot.slane %v2577_v25, 4  ;;  %v2621_v62 = vadd.f32 %v2620_v57, %v2604_v61 }
 0x240   : > { %v2579_v0 = vadd.f32 %v2578_v3, %v2577_v25  ;;  %v2622_v26 = vrot.slane %v2621_v62, 4 }
 0x242   : > { %v2580_v32 = vrot.slane %v2579_v0, 2  ;;  %v2623_v60 = vadd.f32 %v2622_v26, %v2621_v62 }
 0x244   : > { %v2581_v1 = vadd.f32 %v2580_v32, %v2579_v0  ;;  %v2624_v4 = vrot.slane %v2623_v60, 2 }
 0x246   : > { %v2582_v24 = vrot.slane %v2581_v1, 1  ;;  %v2625_v5 = vadd.f32 %v2624_v4, %v2623_v60 }
 0x248   : > { %v2583_v8 = vadd.f32 %v2582_v24, %v2581_v1  ;;  %v2626_v33 = vrot.slane %v2625_v5, 1  ;;  %2723 = sbr.rel (%p2957_p5) target bundleno = 624 (0x270), region = 44 }
 0x24a   : > { %v2584_v6 = vadd.f32 %v2583_v8, %v2560_v31  ;;  %v2627_v27 = vadd.f32 %v2626_v33, %v2625_v5 }
 0x24c   : > { %2585 = vst [vmem:[#allocation2] sm:$0x1] %v2584_v6  ;;  %v2628_v14 = vadd.f32 %v2627_v27, %v2586_v9 }
 0x24e   : > { %2629 = vst [vmem:[#allocation3] sm:$0x1] %v2628_v14 }
 0x253   : > { %v2724_v40 = vld [vmem:[#allocation2] sm:$0x1] }
 0x254   : > { %v2725_v7 = vmul.f32 0.001953125, %v2724_v40 }
 0x255   : > { %v2726_v10 = vld [vmem:[#allocation3] sm:$0x1] }
 0x256   : > { %v2727_v13 = vmul.f32 0.001953125, %v2726_v10  ;;  %v2728_v41 = vmul.f32 %v2725_v7, %v2725_v7 }
 0x258   : > { %v2729_v20 = vsub.f32 %v2727_v13, %v2728_v41 }
 0x25a   : > { %v2730_v36 = vmax.f32 %v2729_v20, 0.0 }
 0x25c   : > { %v2732_v23 = vadd.f32 1e-05, %v2730_v36 }
 0x25e   : > { %3819 = vrsqrt.f32 %v2732_v23 }
 0x268   : > { %v3820_v28 = vpop.eup %3819 }
 0x269   : > { %v2734_v17 = vmul.f32 %v3820_v28, %v2731_v18 }
 0x26b   : > { %2735 = vst [vmem:[%s4926_s5] sm:$0x1] %v2734_v17  ;;  %v2737_v15 = vmul.f32 %v2734_v17, %v2725_v7 }
 0x26d   : > { %v2738_v30 = vsub.f32 %v2736_v29, %v2737_v15 }
 0x26f   : > { %2739 = vst [vmem:[%s4927_s6] sm:$0x1] %v2738_v30 }
 0x270 PF: > { %s17_s21 = sadd.s32 1, %s3827_s21  }
 0x271   : > { %p14_p6 = scmp.ge.s32.totalorder %s17_s21, 6  }
 0x273   :  { %16 = sbr.rel (!%p14_p6) target bundleno = 1 (0x1), region = 98 }

// kernel: double_conv.7
= control target key start
LH: loop header
LB: loop body
LE: loop exit
PB: predicated region body
PF: predicated region fallthrough
CT: control target
= control target key end

     0   :  { %s477_s12 = smov 0   ;;  %s575_s0 = inlined_call_operand.vmem [shape: bf16[4,144,128], index: 0, kind: input, shape index: {}]   ;;  %s576_s1 = inlined_call_operand.vmem [shape: f32[1,128], index: 1, kind: input, shape index: {}]   ;;  %s577_s2 = inlined_call_operand.vmem [shape: f32[1,128], index: 2, kind: input, shape index: {}]   ;;  %s578_s3 = inlined_call_operand.vmem [shape: f32[4,144,128], index: 3, kind: output, shape index: {}]  }
   0x1 LB: > { %s384_s13 = sadd.s32 4294967295, %s455_s12   ;;  %p388_p0 = scmp.ge.s32.totalorder %s455_s12, 1  ;;  %s455_s12 = sphi %s477_s12, %s13_s12  }
   0x2   : > { %p137_p1 = scmp.lt.s32.totalorder %s455_s12, 5 }
   0x4   : > { %p138_p2 = pnand %p388_p0, %p137_p1 }
   0x5   : > { %p161_p3 = scmp.lt.s32.totalorder (!%p138_p2), %s384_s13, 3  ;;  %v496_v0 = vld [vmem:[%s576_s1] ss:$0 sm:$0xff] (!%p138_p2) }
   0x6   : > { %141 = sbr.rel (%p138_p2) target bundleno = 49 (0x31), region = 32  ;;  %v505_v9 = vld [vmem:[%s577_s2] ss:$0 sm:$0xff] (!%p138_p2) }
   0xd   : > { %s580_s13 = smov (!%p161_p3, %s384_s13), 3 }
   0xe   : > { %s439_s14 = smul.u32 72, %s580_s13 }
   0xf   : > { %s440_s22 = smul.u32 144, %s580_s13 }
  0x10   : > { %s491_s17 = scalar_lea.vmem %s575_s0, %s439_s14 }
  0x11   : > { %v396_v1 = vld [vmem:[%s491_s17] sm:$0xff]   ;;  %v431_v2 = vld [vmem:[%s491_s17 + $0x8] sm:$0xff]   ;;  %v432_v3 = vld [vmem:[%s491_s17 + $0x10] sm:$0xff]   ;;  %s527_s25 = scalar_lea.vmem %s578_s3, %s440_s22 }
  0x12   : > { %v397_v4 = vunpack.c.l.bf16 %v396_v1  ;;  %v398_v5 = vunpack.c.h.bf16 %v396_v1  ;;  %v401_v6 = vunpack.c.l.bf16 %v431_v2  ;;  %v402_v7 = vunpack.c.h.bf16 %v431_v2  ;;  %v433_v8 = vld [vmem:[%s491_s17 + $0x18] sm:$0xff]   ;;  %v434_v37 = vld [vmem:[%s491_s17 + $0x20] sm:$0xff]   ;;  %v435_v41 = vld [vmem:[%s491_s17 + $0x28] sm:$0xff]  }
  0x13   : > { %v405_v10 = vunpack.c.l.bf16 %v432_v3  ;;  %v406_v11 = vunpack.c.h.bf16 %v432_v3  ;;  %v409_v12 = vunpack.c.l.bf16 %v433_v8  ;;  %v410_v13 = vunpack.c.h.bf16 %v433_v8  ;;  %v436_v42 = vld [vmem:[%s491_s17 + $0x30] sm:$0xff]   ;;  %v437_v49 = vld [vmem:[%s491_s17 + $0x38] sm:$0xff]  }
  0x14   : > { %v214_v14 = vmul.f32 %v397_v4, %v496_v0  ;;  %v215_v15 = vmul.f32 %v398_v5, %v496_v0  ;;  %v216_v16 = vmul.f32 %v401_v6, %v496_v0  ;;  %v217_v17 = vmul.f32 %v402_v7, %v496_v0  ;;  %v438_v7 = vld [vmem:[%s491_s17 + $0x40] sm:$0xff]  }
  0x15   : > { %v218_v18 = vmul.f32 %v405_v10, %v496_v0  ;;  %v219_v19 = vmul.f32 %v406_v11, %v496_v0  ;;  %v220_v20 = vmul.f32 %v409_v12, %v496_v0  ;;  %v221_v21 = vmul.f32 %v410_v13, %v496_v0 }
  0x16   : > { %v239_v22 = vadd.f32 %v505_v9, %v214_v14  ;;  %v240_v23 = vadd.f32 %v505_v9, %v215_v15  ;;  %v241_v24 = vadd.f32 %v505_v9, %v216_v16  ;;  %v242_v25 = vadd.f32 %v505_v9, %v217_v17 }
  0x17   : > { %v243_v26 = vadd.f32 %v505_v9, %v218_v18  ;;  %v244_v27 = vadd.f32 %v505_v9, %v219_v19  ;;  %v245_v28 = vadd.f32 %v505_v9, %v220_v20  ;;  %v246_v29 = vadd.f32 %v505_v9, %v221_v21 }
  0x18   : > { %vm257_vm0 = vcmp.ge.f32.partialorder %v239_v22, 0.0  ;;  %v275_v30 = vmul.f32 0.01, %v239_v22  ;;  %vm258_vm1 = vcmp.ge.f32.partialorder %v240_v23, 0.0  ;;  %v276_v31 = vmul.f32 0.01, %v240_v23 }
  0x19   : > { %vm259_vm2 = vcmp.ge.f32.partialorder %v241_v24, 0.0  ;;  %v277_v32 = vmul.f32 0.01, %v241_v24  ;;  %vm260_vm3 = vcmp.ge.f32.partialorder %v242_v25, 0.0  ;;  %v278_v33 = vmul.f32 0.01, %v242_v25 }
  0x1a   : > { %v293_v34 = vsel %vm257_vm0, %v239_v22, %v275_v30  ;;  %v294_v35 = vsel %vm258_vm1, %v240_v23, %v276_v31  ;;  %vm261_vm4 = vcmp.ge.f32.partialorder %v243_v26, 0.0  ;;  %v279_v36 = vmul.f32 0.01, %v243_v26 }
  0x1b   : > { %311 = vst [vmem:[%s527_s25] sm:$0xff] %v293_v34  ;;  %312 = vst [vmem:[%s527_s25 + $0x8] sm:$0xff] %v294_v35  ;;  %v295_v38 = vsel %vm259_vm2, %v241_v24, %v277_v32  ;;  %v296_v39 = vsel %vm260_vm3, %v242_v25, %v278_v33  ;;  %vm262_vm5 = vcmp.ge.f32.partialorder %v244_v27, 0.0  ;;  %v280_v40 = vmul.f32 0.01, %v244_v27 }
  0x1c   : > { %313 = vst [vmem:[%s527_s25 + $0x10] sm:$0xff] %v295_v38  ;;  %314 = vst [vmem:[%s527_s25 + $0x18] sm:$0xff] %v296_v39  ;;  %v297_v43 = vsel %vm261_vm4, %v243_v26, %v279_v36  ;;  %vm263_vm6 = vcmp.ge.f32.partialorder %v245_v28, 0.0  ;;  %v281_v44 = vmul.f32 0.01, %v245_v28  ;;  %vm264_vm7 = vcmp.ge.f32.partialorder %v246_v29, 0.0 }
  0x1d   : > { %315 = vst [vmem:[%s527_s25 + $0x20] sm:$0xff] %v297_v43  ;;  %v298_v45 = vsel %vm262_vm5, %v244_v27, %v280_v40  ;;  %v282_v46 = vmul.f32 0.01, %v246_v29  ;;  %v413_v47 = vunpack.c.l.bf16 %v434_v37  ;;  %v414_v48 = vunpack.c.h.bf16 %v434_v37 }
  0x1e   : > { %316 = vst [vmem:[%s527_s25 + $0x28] sm:$0xff] %v298_v45  ;;  %v299_v50 = vsel %vm263_vm6, %v245_v28, %v281_v44  ;;  %v417_v51 = vunpack.c.l.bf16 %v435_v41  ;;  %v418_v52 = vunpack.c.h.bf16 %v435_v41  ;;  %v421_v53 = vunpack.c.l.bf16 %v436_v42 }
  0x1f   : > { %317 = vst [vmem:[%s527_s25 + $0x30] sm:$0xff] %v299_v50  ;;  %v300_v54 = vsel %vm264_vm7, %v246_v29, %v282_v46  ;;  %v222_v55 = vmul.f32 %v413_v47, %v496_v0  ;;  %v223_v56 = vmul.f32 %v414_v48, %v496_v0  ;;  %v422_v57 = vunpack.c.h.bf16 %v436_v42 }
  0x20   : > { %318 = vst [vmem:[%s527_s25 + $0x38] sm:$0xff] %v300_v54  ;;  %v224_v58 = vmul.f32 %v417_v51, %v496_v0  ;;  %v225_v59 = vmul.f32 %v418_v52, %v496_v0  ;;  %v226_v60 = vmul.f32 %v421_v53, %v496_v0  ;;  %v425_v61 = vunpack.c.l.bf16 %v437_v49 }
  0x21   : > { %v247_v62 = vadd.f32 %v505_v9, %v222_v55  ;;  %v248_v63 = vadd.f32 %v505_v9, %v223_v56  ;;  %v227_v1 = vmul.f32 %v422_v57, %v496_v0  ;;  %v426_v2 = vunpack.c.h.bf16 %v437_v49 }
  0x22   : > { %v249_v3 = vadd.f32 %v505_v9, %v224_v58  ;;  %v250_v4 = vadd.f32 %v505_v9, %v225_v59  ;;  %v251_v5 = vadd.f32 %v505_v9, %v226_v60  ;;  %v228_v6 = vmul.f32 %v425_v61, %v496_v0 }
  0x23   : > { %vm265_vm8 = vcmp.ge.f32.partialorder %v247_v62, 0.0  ;;  %v283_v8 = vmul.f32 0.01, %v247_v62  ;;  %vm266_vm9 = vcmp.ge.f32.partialorder %v248_v63, 0.0  ;;  %v284_v10 = vmul.f32 0.01, %v248_v63 }
  0x24   : > { %vm267_vm10 = vcmp.ge.f32.partialorder %v249_v3, 0.0  ;;  %v285_v11 = vmul.f32 0.01, %v249_v3  ;;  %vm268_vm11 = vcmp.ge.f32.partialorder %v250_v4, 0.0  ;;  %v286_v12 = vmul.f32 0.01, %v250_v4 }
  0x25   : > { %v301_v13 = vsel %vm265_vm8, %v247_v62, %v283_v8  ;;  %v302_v14 = vsel %vm266_vm9, %v248_v63, %v284_v10  ;;  %vm269_vm12 = vcmp.ge.f32.partialorder %v251_v5, 0.0  ;;  %v287_v15 = vmul.f32 0.01, %v251_v5 }
  0x26   : > { %319 = vst [vmem:[%s527_s25 + $0x40] sm:$0xff] %v301_v13  ;;  %320 = vst [vmem:[%s527_s25 + $0x48] sm:$0xff] %v302_v14  ;;  %v303_v16 = vsel %vm267_vm10, %v249_v3, %v285_v11  ;;  %v304_v17 = vsel %vm268_vm11, %v250_v4, %v286_v12  ;;  %v252_v18 = vadd.f32 %v505_v9, %v227_v1  ;;  %v429_v22 = vunpack.c.l.bf16 %v438_v7 }
  0x27   : > { %v253_v19 = vadd.f32 %v505_v9, %v228_v6  ;;  %321 = vst [vmem:[%s527_s25 + $0x50] sm:$0xff] %v303_v16  ;;  %322 = vst [vmem:[%s527_s25 + $0x58] sm:$0xff] %v304_v17  ;;  %v305_v20 = vsel %vm269_vm12, %v251_v5, %v287_v15  ;;  %v229_v21 = vmul.f32 %v426_v2, %v496_v0  ;;  %v430_v23 = vunpack.c.h.bf16 %v438_v7 }
  0x28   : > { %323 = vst [vmem:[%s527_s25 + $0x60] sm:$0xff] %v305_v20  ;;  %vm270_vm13 = vcmp.ge.f32.partialorder %v252_v18, 0.0  ;;  %v288_v24 = vmul.f32 0.01, %v252_v18  ;;  %v230_v27 = vmul.f32 %v429_v22, %v496_v0 }
  0x29   : > { %vm271_vm14 = vcmp.ge.f32.partialorder %v253_v19, 0.0  ;;  %v289_v25 = vmul.f32 0.01, %v253_v19  ;;  %v254_v26 = vadd.f32 %v505_v9, %v229_v21  ;;  %v231_v28 = vmul.f32 %v430_v23, %v496_v0 }
  0x2a   : > { %v306_v29 = vsel %vm270_vm13, %v252_v18, %v288_v24  ;;  %v255_v32 = vadd.f32 %v505_v9, %v230_v27 }
  0x2b   : > { %v307_v30 = vsel %vm271_vm14, %v253_v19, %v289_v25  ;;  %324 = vst [vmem:[%s527_s25 + $0x68] sm:$0xff] %v306_v29  ;;  %vm272_vm15 = vcmp.ge.f32.partialorder %v254_v26, 0.0  ;;  %v290_v31 = vmul.f32 0.01, %v254_v26  ;;  %v256_v33 = vadd.f32 %v505_v9, %v231_v28 }
  0x2c   : > { %325 = vst [vmem:[%s527_s25 + $0x70] sm:$0xff] %v307_v30  ;;  %vm273_vm0 = vcmp.ge.f32.partialorder %v255_v32, 0.0  ;;  %v291_v35 = vmul.f32 0.01, %v255_v32 }
  0x2d   : > { %v308_v34 = vsel %vm272_vm15, %v254_v26, %v290_v31  ;;  %vm274_vm1 = vcmp.ge.f32.partialorder %v256_v33, 0.0  ;;  %v292_v36 = vmul.f32 0.01, %v256_v33 }
  0x2e   : > { %326 = vst [vmem:[%s527_s25 + $0x78] sm:$0xff] %v308_v34  ;;  %v309_v37 = vsel %vm273_vm0, %v255_v32, %v291_v35 }
  0x2f   : > { %327 = vst [vmem:[%s527_s25 + $0x80] sm:$0xff] %v309_v37  ;;  %v310_v0 = vsel %vm274_vm1, %v256_v33, %v292_v36 }
  0x30   : > { %328 = vst [vmem:[%s527_s25 + $0x88] sm:$0xff] %v310_v0 }
  0x31 PF: > { %s13_s12 = sadd.s32 1, %s455_s12  }
  0x32   : > { %p10_p4 = scmp.ge.s32.totalorder %s13_s12, 6  }
  0x34   :  { %12 = sbr.rel (!%p10_p4) target bundleno = 1 (0x1), region = 62 }

// kernel: double_conv.6
= control target key start
LH: loop header
LB: loop body
LE: loop exit
PB: predicated region body
PF: predicated region fallthrough
CT: control target
= control target key end

     0   :  { %s4652_s21 = smov 0   ;;  %s5855_s0 = inlined_call_operand.vmem [shape: bf16[4,198,128], index: 0, kind: input, shape index: {}]   ;;  %s5856_s1 = inlined_call_operand.vmem [shape: bf16[9,128,128], index: 1, kind: input, shape index: {}]   ;;  %s5857_s2 = inlined_call_operand.vmem [shape: f32[1,128], index: 2, kind: input, shape index: {}]   ;;  %s5858_s3 = inlined_call_operand.vmem [shape: f32[1,128], index: 3, kind: input, shape index: {}]   ;;  %s5859_s4 = inlined_call_operand.vmem [shape: bf16[4,144,128], index: 4, kind: output, shape index: {0}]   ;;  %s5860_s5 = inlined_call_operand.vmem [shape: f32[1,128], index: 5, kind: output, shape index: {1}]   ;;  %s5861_s6 = inlined_call_operand.vmem [shape: f32[1,128], index: 6, kind: output, shape index: {2}]  }
   0x1 LB: > { %s4658_s22 = sadd.s32 4294967295, %s4612_s21   ;;  %p3196_p0 = scmp.ge.s32.totalorder %s4612_s21, 1  ;;  %s4612_s21 = sphi %s4652_s21, %s17_s21  }
   0x2   : > { %p207_p1 = scmp.lt.s32.totalorder %s4612_s21, 5 }
   0x4   : > { %p208_p2 = pnand %p3196_p0, %p207_p1 }
   0x5   : > { %p237_p3 = scmp.lt.s32.totalorder (!%p208_p2), %s4658_s22, 3  ;;  %p3199_p4 = scmp.ne.s32.totalorder (!%p208_p2), %s4658_s22, 0 }
   0x6   : > { %211 = sbr.rel (%p208_p2) target bundleno = 643 (0x283), region = 36 }
   0xd   : > { %s238_s23 = scalar_select %p237_p3, %s4658_s22, 3 }
   0xe   : > { %251 = sbr.rel (%p3199_p4) target bundleno = 21 (0x15), region = 40  ;;  %v4614_v0 = vmov (!%p3199_p4), 0.0  }
   0xf   : > { %s4434_s24 = smul.u32 100, %s238_s23  ;;  %252 = vst [vmem:[#allocation2] sm:$0x1] (!%p3199_p4), %v4614_v0  ;;  %253 = vst [vmem:[#allocation3] sm:$0x1] (!%p3199_p4), %v4614_v0 }
  0x10   : > { %s4435_s25 = smul.u32 72, %s238_s23 }
  0x11   : > { %s4667_s28 = scalar_lea.vmem %s5855_s0, %s4434_s24 }
  0x12   : > { %s4672_s7 = scalar_lea.vmem %s5859_s4, %s4435_s25 }
  0x15 PF: > { %v4483_v1 = vld [vmem:[%s5856_s1 + $0x40] sm:$0xff]   ;;  %v4615_v2 = vmov 0.0   ;;  %v4485_v4 = vld [vmem:[%s5856_s1 + $0x48] sm:$0xff]   ;;  %vm4616_vm0 = vmmov 0   ;;  %v4487_v6 = vld [vmem:[%s5856_s1 + $0x50] sm:$0xff]   ;;  %vm1571_vm3 = vcmask 1045504  }
  0x16   : > { %3680 = vmatprep.subr.bf16.mxu1 %v4615_v2  ;;  %3888 = vmatprep.subr.bf16.mxu0 %v4615_v2  ;;  %v4484_v3 = vld [vmem:[%s5856_s1 + $0x100] sm:$0xff]   ;;  %v4486_v5 = vld [vmem:[%s5856_s1 + $0x108] sm:$0xff]   ;;  %v4488_v7 = vld [vmem:[%s5856_s1 + $0x110] sm:$0xff]   ;;  %vm354_vm1 = vsmask.f32 7424  ;;  %vm776_vm4 = vcmask 1046528  }
  0x17   : > { %3681 = vmatpush3.bf16.msra.mxu1 %v4483_v1  ;;  %3696 = vmatprep.mubr.msk.bf16.mxu1 %vm4616_vm0, %v4615_v2  ;;  %v4489_v8 = vld [vmem:[%s5856_s1 + $0x58] sm:$0xff]   ;;  %v4491_v10 = vld [vmem:[%s5856_s1 + $0x60] sm:$0xff]   ;;  %v4493_v12 = vld [vmem:[%s5856_s1 + $0x68] sm:$0xff]   ;;  %vm1280_vm2 = vsmask.f32 6400  ;;  %vm2366_vm6 = vcmask 1044480  }
  0x18   : > { %3889 = vmatpush3.bf16.msra.mxu0 %v4484_v3  ;;  %3682 = vmatprep.subr.bf16.mxu1 %v4615_v2  ;;  %v4490_v9 = vld [vmem:[%s5856_s1 + $0x118] sm:$0xff]   ;;  %v4492_v11 = vld [vmem:[%s5856_s1 + $0x120] sm:$0xff]   ;;  %v4727_v16 = vld [vmem:[%s4667_s28 + $0x8] sm:$0xff]   ;;  %vm2075_vm5 = vsmask.f32 5376  ;;  %p3453_p5 = scmp.ne.s32.totalorder %s4658_s22, 3 }
  0x19   : > { %3890 = vmatprep.subr.bf16.mxu0 %v4615_v2  ;;  %3904 = vmatprep.mubr.msk.bf16.mxu0 %vm4616_vm0, %v4615_v2  ;;  %v254_v13 = vld [vmem:[%s4667_s28] sm:$0xf]  ;;  %v255_v14 = vld [vmem:[%s4667_s28 + $0x4] sm:$0xf]  ;;  %v4730_v17 = vld [vmem:[%s4667_s28 + $0x10] sm:$0xff]   ;;  %v363_v31 = vshll.u32 %v4727_v16, 16 }
  0x1a   : > { %v4724_v15 = vcombine.low %v254_v13, %v255_v14  ;;  %v976_v18 = vld [vmem:[%s4667_s28 + $0x8] sm:$0xe]  ;;  %v4734_v19 = vld [vmem:[%s4667_s28 + $0xc] sm:$0xf]  ;;  %v4495_v23 = vld [vmem:[%s5856_s1 + $0x70] sm:$0xff]   ;;  %v1290_v24 = vshrl.u32 %v4730_v17, 16 }
  0x1b   : > { %3683 = vmatpush3.bf16.msra.mxu1 %v4485_v4  ;;  %v4494_v20 = vld [vmem:[%s5856_s1 + $0x128] sm:$0xff]   ;;  %v4742_v22 = vcombine.low %v976_v18, %v4734_v19  ;;  %v1293_v25 = vshll.u32 %v4730_v17, 16  ;;  %v4496_v26 = vld [vmem:[%s5856_s1 + $0x130] sm:$0xff]   ;;  %v4497_v36 = vld [vmem:[%s5856_s1 + $0x78] sm:$0xff]   ;;  %v365_v40 = vrot.slane %v363_v31, 1  ;;  %v367_v49 = vshrl.u32 %v4727_v16, 16 }
  0x1c   : > { %3891 = vmatpush3.bf16.msra.mxu0 %v4486_v5  ;;  %3684 = vmatprep.subr.bf16.mxu1 %v4615_v2  ;;  %v358_v21 = vshll.u32 %v4724_v15, 16  ;;  %v356_v27 = vshrl.u32 %v4724_v15, 16  ;;  %v1292_v34 = vrot.slane %v1290_v24, 1  ;;  %v4498_v37 = vld [vmem:[%s5856_s1 + $0x138] sm:$0xff]   ;;  %v4766_v38 = vld [vmem:[%s4667_s28 + $0x10] sm:$0xff]   ;;  %v4503_v46 = vld [vmem:[%s5856_s1] sm:$0xff]  }
  0x1d   : > { %3892 = vmatprep.subr.bf16.mxu0 %v4615_v2  ;;  %v1282_v28 = vshrl.u32 %v4742_v22, 16  ;;  %v1285_v29 = vshll.u32 %v4742_v22, 16  ;;  %v1295_v35 = vrot.slane %v1293_v25, 2  ;;  %v4769_v41 = vld [vmem:[%s4667_s28 + $0x18] sm:$0xff]   ;;  %v4504_v48 = vld [vmem:[%s5856_s1 + $0x140] sm:$0xff]   ;;  %v371_v50 = vshll.u32 %v4766_v38, 16 }
  0x1e   : > { %v360_v30 = vrot.slane %v358_v21, 1  ;;  %v1299_v44 = vshrl.u32 %v4769_v41, 16  ;;  %v1302_v45 = vshll.u32 %v4769_v41, 16  ;;  %v4787_v54 = vld [vmem:[%s4667_s28 + $0x20] sm:$0xff]   ;;  %v4505_v55 = vld [vmem:[%s5856_s1 + $0x148] sm:$0xff]   ;;  %v369_v57 = vor.u32 %v367_v49, %v365_v40  ;;  %v4797_v59 = vld [vmem:[%s4667_s28 + $0x18] sm:$0xff]  }
  0x1f   : > { %3685 = vmatpush3.bf16.msra.mxu1 %v4487_v6  ;;  %v1284_v32 = vrot.slane %v1282_v28, 1  ;;  %v1287_v33 = vrot.slane %v1285_v29, 2  ;;  %v1296_v43 = vor.u32 %v1295_v35, %v1292_v34  ;;  %v4509_v56 = vld [vmem:[%s5856_s1 + $0x8] sm:$0xff]   ;;  %v373_v58 = vrot.slane %v371_v50, 1  ;;  %v4508_v5 = vld [vmem:[%s5856_s1 + $0x150] sm:$0xff]   ;;  %v4513_v21 = vld [vmem:[%s5856_s1 + $0x160] sm:$0xff]  }
  0x20   : > { %3893 = vmatpush3.bf16.msra.mxu0 %v4488_v7  ;;  %3686 = vmatprep.subr.bf16.mxu1 %v4615_v2  ;;  %v361_v39 = vor.u32 %v360_v30, %v356_v27  ;;  %v1301_v51 = vrot.slane %v1299_v44, 1  ;;  %v1304_v53 = vrot.slane %v1302_v45, 2  ;;  %v1308_v61 = vshrl.u32 %v4787_v54, 16  ;;  %v4811_v3 = vld [vmem:[%s4667_s28 + $0x28] sm:$0xff]   ;;  %v4523_v29 = vld [vmem:[%s5856_s1 + $0x20] sm:$0xff]   ;;  %v4880_v45 = vld [vmem:[%s4667_s28 + $0x30] sm:$0xff]  }
  0x21   : > { %3894 = vmatprep.subr.bf16.mxu0 %v4615_v2  ;;  %v1288_v42 = vor.u32 %v1287_v33, %v1284_v32  ;;  %v1311_v62 = vshll.u32 %v4787_v54, 16  ;;  %v375_v63 = vshrl.u32 %v4766_v38, 16  ;;  %v374_v0 = vsel %vm354_vm1, %v369_v57, %v373_v58  ;;  %v4854_v32 = vld [vmem:[%s4667_s28 + $0x28] sm:$0xff]   ;;  %v4520_v49 = vld [vmem:[%s5856_s1 + $0x178] sm:$0xff]  }
  0x22   : > { %v366_v47 = vsel %vm354_vm1, %v361_v39, %v365_v40  ;;  %v1305_v60 = vor.u32 %v1304_v53, %v1301_v51  ;;  %v379_v1 = vshll.u32 %v4797_v59, 16  ;;  %v1310_v6 = vrot.slane %v1308_v61, 1  ;;  %v4515_v33 = vld [vmem:[%s5856_s1 + $0x168] sm:$0xff]   ;;  %v4518_v39 = vld [vmem:[%s5856_s1 + $0x170] sm:$0xff]   ;;  %v4533_v51 = vld [vmem:[%s5856_s1 + $0x38] sm:$0xff]  }
  0x23   : > { %3687 = vmatpush3.bf16.msra.mxu1 %v4489_v8  ;;  %v1297_v52 = vsel %vm1280_vm2, %v1288_v42, %v1296_v43  ;;  %v1313_v7 = vrot.slane %v1311_v62, 2  ;;  %v4514_v8 = vld [vmem:[%s5856_s1 + $0x10] sm:$0xff]   ;;  %v1317_v13 = vshrl.u32 %v4811_v3, 16  ;;  %v1320_v14 = vshll.u32 %v4811_v3, 16  ;;  %v1550_v35 = vld [vmem:[%s4667_s28 + $0x8] sm:$0xc] }
  0x24   : > { %3895 = vmatpush3.bf16.msra.mxu0 %v4490_v9  ;;  %3688 = vmatprep.subr.bf16.mxu1 %v4615_v2  ;;  %v1306_v4 = vsel %vm1280_vm2, %v1296_v43, %v1305_v60  ;;  %v4510_v9 = vld [vmem:[%s5856_s1 + $0x158] sm:$0xff]   ;;  %v383_v24 = vshrl.u32 %v4797_v59, 16  ;;  %v395_v42 = vshll.u32 %v4854_v32, 16  ;;  %v3342_v44 = vcombine.low %v1550_v35, %v4734_v19  ;;  %v4528_v62 = vld [vmem:[%s5856_s1 + $0x188] sm:$0xff]  }
  0x25   : > { %3896 = vmatprep.subr.bf16.mxu0 %v4615_v2  ;;  %v1314_v18 = vor.u32 %v1313_v7, %v1310_v6  ;;  %v1319_v27 = vrot.slane %v1317_v13, 1  ;;  %v1322_v28 = vrot.slane %v1320_v14, 2  ;;  %v1573_v19 = vrot.slane %v4730_v17, 2  ;;  %v4931_v7 = vld [vmem:[%s4667_s28 + $0x40] sm:$0xff]   ;;  %v4547_v35 = vld [vmem:[%s5856_s1 + $0x1b8] sm:$0xff]  }
  0x26   : > { %v1572_v50 = vrot.slane %v3342_v44, 2  ;;  %v403_v17 = vshll.u32 %v4880_v45, 16  ;;  %v399_v53 = vshrl.u32 %v4854_v32, 16  ;;  %v1575_v61 = vrot.slane %v4769_v41, 2  ;;  %v4531_v41 = vld [vmem:[%s5856_s1 + $0x190] sm:$0xff]  }
  0x27   : > { %3689 = vmatpush3.bf16.msra.mxu1 %v4491_v10  ;;  %v377_v10 = vor.u32 %v375_v63, %v373_v58  ;;  %v4861_v34 = vor.u32 %v1322_v28, %v1319_v27  ;;  %v4908_v58 = vld [vmem:[%s4667_s28 + $0x38] sm:$0xff]   ;;  %v419_v13 = vshll.u32 %v4931_v7, 16  ;;  %v4964_v28 = vld [vmem:[%s4667_s28 + $0x30] sm:$0xff]  }
  0x28   : > { %3897 = vmatpush3.bf16.msra.mxu0 %v4492_v11  ;;  %3690 = vmatprep.subr.bf16.mxu1 %v4615_v2  ;;  %v381_v11 = vrot.slane %v379_v1, 1  ;;  %v405_v57 = vrot.slane %v403_v17, 1  ;;  %v411_v1 = vshll.u32 %v4908_v58, 16  ;;  %v4550_v17 = vld [vmem:[%s5856_s1 + $0xa0] sm:$0xff]  }
  0x29   : > { %3898 = vmatprep.subr.bf16.mxu0 %v4615_v2  ;;  %v1324_v43 = vsel %vm1280_vm2, %v1314_v18, %v4861_v34 }
  0x2a   : > { %v385_v30 = vor.u32 %v383_v24, %v381_v11  ;;  %v413_v6 = vrot.slane %v411_v1, 1  ;;  %v4541_v24 = vld [vmem:[%s5856_s1 + $0x1a8] sm:$0xff]   ;;  %v4559_v1 = vld [vmem:[%s5856_s1 + $0xb8] sm:$0xff]  }
  0x2b   : > { %3691 = vmatpush3.bf16.msra.mxu1 %v4493_v12  ;;  %v4828_v12 = vld [vmem:[%s4667_s28 + $0x20] sm:$0xff]  }
  0x2c   : > { %3899 = vmatpush3.bf16.msra.mxu0 %v4494_v20  ;;  %3692 = vmatprep.subr.bf16.mxu1 %v4615_v2  ;;  %v4519_v20 = vld [vmem:[%s5856_s1 + $0x18] sm:$0xff]   ;;  %v387_v25 = vshll.u32 %v4828_v12, 16  ;;  %v391_v40 = vshrl.u32 %v4828_v12, 16 }
  0x2d   : > { %3900 = vmatprep.subr.bf16.mxu0 %v4615_v2 }
  0x2e   : > { %v389_v31 = vrot.slane %v387_v25, 1  ;;  %v423_v25 = vshrl.u32 %v4931_v7, 16 }
  0x2f   : > { %3693 = vmatpush3.bf16.msra.mxu1 %v4495_v23  ;;  %v382_v23 = vsel %vm354_vm1, %v377_v10, %v381_v11  ;;  %v415_v11 = vshrl.u32 %v4908_v58, 16 }
  0x30   : > { %3901 = vmatpush3.bf16.msra.mxu0 %v4496_v26  ;;  %3694 = vmatprep.subr.bf16.mxu1 %v4615_v2  ;;  %v1315_v26 = vsel %vm1280_vm2, %v1305_v60, %v1314_v18  ;;  %v4949_v18 = vld [vmem:[%s4667_s28 + $0x48] ss:$0 sps:$4 sm:$0x11]  }
  0x31   : > { %3902 = vmatprep.subr.bf16.mxu0 %v4615_v2  ;;  %v427_v27 = vshll.u32 %v4949_v18, 16 }
  0x33   : > { %3695 = vmatpush3.bf16.msra.mxu1 %v4497_v36  ;;  %v4526_v36 = vld [vmem:[%s5856_s1 + $0x28] sm:$0xff]  }
  0x34   : > { %3903 = vmatpush3.bf16.msra.mxu0 %v4498_v37  ;;  %3732 = vmatprep.subr.bf16.mxu1 %v4615_v2  ;;  %v390_v37 = vsel %vm354_vm1, %v385_v30, %v389_v31 }
  0x35   : > { %3940 = vmatprep.subr.bf16.mxu0 %v4615_v2 }
  0x36   : > { %3697 = vmatmul.mubr.bf16.vlgmr.msra.gmra.mrb[0].mxu1 %v366_v47  ;;  %v393_v47 = vor.u32 %v391_v40, %v389_v31  ;;  %v429_v31 = vrot.slane %v427_v27, 1  ;;  %v4571_v27 = vld [vmem:[%s5856_s1 + $0x1f0] sm:$0xff]  }
  0x37   : > { %3905 = vmatmul.mubr.bf16.vlgmr.msra.gmra.mrb[0].mxu0 %v1297_v52  ;;  %3733 = vmatpush3.bf16.msra.mxu1 %v4503_v46  ;;  %v4529_v46 = vld [vmem:[%s5856_s1 + $0x30] sm:$0xff]  }
  0x38   : > { %3941 = vmatpush3.bf16.msra.mxu0 %v4504_v48  ;;  %3700 = vmatprep.mubr.msk.bf16.mxu1 %vm4616_vm0, %v4615_v2  ;;  %v397_v48 = vrot.slane %v395_v42, 1  ;;  %v4537_v42 = vld [vmem:[%s5856_s1 + $0x80] sm:$0xff]  }
  0x39   : > { %3942 = vmatprep.subr.bf16.mxu0 %v4615_v2  ;;  %3908 = vmatprep.mubr.msk.bf16.mxu0 %vm4616_vm0, %v4615_v2 }
  0x3a   : > { %3734 = vmatprep.subr.bf16.mxu1 %v4615_v2  ;;  %v398_v52 = vsel %vm354_vm1, %v393_v47, %v397_v48  ;;  %v401_v60 = vor.u32 %v399_v53, %v397_v48  ;;  %v5010_v48 = vld [vmem:[%s4667_s28 + $0x48] sm:$0xff]  }
  0x3b   : > { %3735 = vmatpush3.bf16.msra.mxu1 %v4509_v56  ;;  %v4525_v56 = vld [vmem:[%s5856_s1 + $0x180] sm:$0xff]   ;;  %v4553_v53 = vld [vmem:[%s5856_s1 + $0xa8] sm:$0xff]  }
  0x3c   : > { %3943 = vmatpush3.bf16.msra.mxu0 %v4505_v55  ;;  %3736 = vmatprep.subr.bf16.mxu1 %v4615_v2  ;;  %v1574_v55 = vsel %vm1571_vm3, %v1572_v50, %v1573_v19  ;;  %v406_v63 = vsel %vm354_vm1, %v401_v60, %v405_v57  ;;  %v4546_v50 = vld [vmem:[%s5856_s1 + $0x98] sm:$0xff]  }
  0x3d   : > { %3944 = vmatprep.subr.bf16.mxu0 %v4615_v2 }
  0x3e   : > { %3701 = vmatmul.mubr.bf16.gmra.mrb[4].mxu1 %v374_v0  ;;  %v407_v0 = vshrl.u32 %v4880_v45, 16 }
  0x3f   : > { %3909 = vmatmul.mubr.bf16.gmra.mrb[4].mxu0 %v1306_v4  ;;  %3704 = vmatprep.mubr.msk.bf16.mxu1 %vm4616_vm0, %v4615_v2  ;;  %v1576_v4 = vsel %vm1571_vm3, %v1573_v19, %v1575_v61  ;;  %v4543_v19 = vld [vmem:[%s5856_s1 + $0x90] sm:$0xff]  }
  0x40   : > { %3945 = vmatpush3.bf16.msra.mxu0 %v4508_v5  ;;  %3912 = vmatprep.mubr.msk.bf16.mxu0 %vm4616_vm0, %v4615_v2  ;;  %v409_v5 = vor.u32 %v407_v0, %v405_v57 }
  0x41   : > { %3946 = vmatprep.subr.bf16.mxu0 %v4615_v2  ;;  %3737 = vmatpush3.bf16.msra.mxu1 %v4514_v8  ;;  %v1577_v8 = vrot.slane %v4787_v54, 2  ;;  %v4538_v54 = vld [vmem:[%s5856_s1 + $0x1a0] sm:$0xff]  }
  0x42   : > { %3738 = vmatprep.subr.bf16.mxu1 %v4615_v2  ;;  %v414_v10 = vsel %vm354_vm1, %v409_v5, %v413_v6  ;;  %v4552_v5 = vld [vmem:[%s5856_s1 + $0x1c0] sm:$0xff]  }
  0x43   : > { %v1578_v14 = vsel %vm1571_vm3, %v1575_v61, %v1577_v8  ;;  %v5053_v61 = vld [vmem:[%s4667_s28 + $0x18] sm:$0xff]  }
  0x44   : > { %3947 = vmatpush3.bf16.msra.mxu0 %v4510_v9  ;;  %v4535_v9 = vld [vmem:[%s5856_s1 + $0x198] sm:$0xff]   ;;  %v1856_v0 = vrot.slane %v5053_v61, 2 }
  0x45   : > { %3948 = vmatprep.subr.bf16.mxu0 %v4615_v2  ;;  %3739 = vmatpush3.bf16.msra.mxu1 %v4519_v20  ;;  %v417_v20 = vor.u32 %v415_v11, %v413_v6  ;;  %v4558_v11 = vld [vmem:[%s5856_s1 + $0x1d0] sm:$0xff]  }
  0x46   : > { %3705 = vmatmul.mubr.bf16.gmra.mrb[8].mxu1 %v382_v23  ;;  %3740 = vmatprep.subr.bf16.mxu1 %v4615_v2  ;;  %v1579_v23 = vrot.slane %v4811_v3, 2  ;;  %v4544_v3 = vld [vmem:[%s5856_s1 + $0x1b0] sm:$0xff]  }
  0x47   : > { %3913 = vmatmul.mubr.bf16.gmra.mrb[8].mxu0 %v1315_v26  ;;  %3708 = vmatprep.mubr.msk.bf16.mxu1 %vm4616_vm0, %v4615_v2 }
  0x48   : > { %3949 = vmatpush3.bf16.msra.mxu0 %v4513_v21  ;;  %3916 = vmatprep.mubr.msk.bf16.mxu0 %vm4616_vm0, %v4615_v2  ;;  %v421_v21 = vrot.slane %v419_v13, 1 }
  0x49   : > { %3950 = vmatprep.subr.bf16.mxu0 %v4615_v2  ;;  %3741 = vmatpush3.bf16.msra.mxu1 %v4523_v29  ;;  %v1580_v29 = vsel %vm1571_vm3, %v1577_v8, %v1579_v23  ;;  %v4555_v8 = vld [vmem:[%s5856_s1 + $0x1c8] sm:$0xff]  }
  0x4a   : > { %3742 = vmatprep.subr.bf16.mxu1 %v4615_v2  ;;  %v422_v26 = vsel %vm354_vm1, %v417_v20, %v421_v21  ;;  %v425_v30 = vor.u32 %v423_v25, %v421_v21  ;;  %v5108_v20 = vld [vmem:[%s4667_s28 + $0x30] sm:$0xff]   ;;  %v4565_v21 = vld [vmem:[%s5856_s1 + $0x1e0] sm:$0xff]  }
  0x4c   : > { %3951 = vmatpush3.bf16.msra.mxu0 %v4515_v33  ;;  %v1581_v33 = vrot.slane %v4964_v28, 2 }
  0x4d   : > { %3952 = vmatprep.subr.bf16.mxu0 %v4615_v2  ;;  %3743 = vmatpush3.bf16.msra.mxu1 %v4526_v36  ;;  %v430_v36 = vsel %vm354_vm1, %v425_v30, %v429_v31  ;;  %v4574_v30 = vld [vmem:[%s5856_s1 + $0x1f8] sm:$0xff]   ;;  %v4590_v31 = vld [vmem:[%s4667_s28 + $0x4] sm:$0xf] }
  0x4e   : > { %3709 = vmatmul.mubr.bf16.gmra.mrb[12].mxu1 %v390_v37  ;;  %3744 = vmatprep.subr.bf16.mxu1 %v4615_v2  ;;  %v1582_v37 = vsel %vm1571_vm3, %v1579_v23, %v1581_v33  ;;  %v1862_v23 = vrot.slane %v5108_v20, 2 }
  0x4f   : > { %3917 = vmatmul.mubr.bf16.gmra.mrb[12].mxu0 %v1324_v43  ;;  %3712 = vmatprep.mubr.msk.bf16.mxu1 %vm4616_vm0, %v4615_v2  ;;  %v4995_v43 = vld [vmem:[%s4667_s28 + $0x40] sm:$0xff]  }
  0x50   : > { %3953 = vmatpush3.bf16.msra.mxu0 %v4518_v39  ;;  %3956 = vmatprep.mubr.msk.bf16.mxu0 %vm4616_vm0, %v4615_v2  ;;  %v4983_v39 = vld [vmem:[%s4667_s28 + $0x38] sm:$0xff]   ;;  %v1585_v47 = vrot.slane %v4995_v43, 2 }
  0x51   : > { %3954 = vmatprep.subr.bf16.mxu0 %v4615_v2  ;;  %3745 = vmatpush3.bf16.msra.mxu1 %v4529_v46  ;;  %v1583_v40 = vrot.slane %v4983_v39, 2  ;;  %v4540_v46 = vld [vmem:[%s5856_s1 + $0x88] sm:$0xff]  }
  0x52   : > { %3746 = vmatprep.subr.bf16.mxu1 %v4615_v2 }
  0x53   : > { %v1584_v44 = vsel %vm1571_vm3, %v1581_v33, %v1583_v40 }
  0x54   : > { %3955 = vmatpush3.bf16.msra.mxu0 %v4520_v49  ;;  %v1587_v49 = vrot.slane %v5010_v48, 2 }
  0x55   : > { %3992 = vmatprep.subr.bf16.mxu0 %v4615_v2  ;;  %3747 = vmatpush3.bf16.msra.mxu1 %v4533_v51  ;;  %v5028_v51 = vld [vmem:[%s4667_s28 + $0x50] ss:$0 sps:$4 sm:$0x33]  }
  0x56   : > { %3713 = vmatmul.mubr.bf16.gmra.mrb[16].mxu1 %v398_v52  ;;  %3784 = vmatprep.subr.bf16.mxu1 %v4615_v2  ;;  %v1589_v52 = vrot.slane %v5028_v51, 2 }
  0x57   : > { %3957 = vmatmul.mubr.bf16.vlgmr.msra.gmra.mrb[0].mxu0 %v1574_v55  ;;  %3716 = vmatprep.mubr.msk.bf16.mxu1 %vm4616_vm0, %v4615_v2  ;;  %v1771_v55 = vld [vmem:[%s4667_s28 + $0x10] sm:$0xc] }
  0x58   : > { %3960 = vmatprep.mubr.msk.bf16.mxu0 %vm4616_vm0, %v4615_v2  ;;  %3993 = vmatpush3.bf16.msra.mxu0 %v4525_v56  ;;  %v5045_v56 = vld [vmem:[%s4667_s28 + $0x14] sm:$0xf]  ;;  %v1590_v57 = vsel %vm1571_vm3, %v1587_v49, %v1589_v52 }
  0x59   : > { %3994 = vmatprep.subr.bf16.mxu0 %v4615_v2  ;;  %v5050_v60 = vcombine.low %v1771_v55, %v5045_v56  ;;  %v5177_v52 = vld [vmem:[%s4667_s28 + $0x50] sm:$0xff]   ;;  %v782_v55 = vrot.slane %v4797_v59, 1 }
  0x5c   : > { %3995 = vmatpush3.bf16.msra.mxu0 %v4528_v62  ;;  %v4556_v62 = vld [vmem:[%s5856_s1 + $0xb0] sm:$0xff]  }
  0x5d   : > { %3996 = vmatprep.subr.bf16.mxu0 %v4615_v2 }
  0x5e   : > { %3717 = vmatmul.mubr.bf16.gmra.mrb[20].mxu1 %v406_v63  ;;  %v1855_v63 = vrot.slane %v5050_v60, 2 }
  0x5f   : > { %3961 = vmatmul.mubr.bf16.gmra.mrb[4].mxu0 %v1576_v4  ;;  %3720 = vmatprep.mubr.msk.bf16.mxu1 %vm4616_vm0, %v4615_v2 }
  0x60   : > { %3964 = vmatprep.mubr.msk.bf16.mxu0 %vm4616_vm0, %v4615_v2  ;;  %3997 = vmatpush3.bf16.msra.mxu0 %v4531_v41  ;;  %v1857_v4 = vsel %vm1571_vm3, %v1855_v63, %v1856_v0  ;;  %v5072_v41 = vld [vmem:[%s4667_s28 + $0x20] sm:$0xff]  }
  0x61   : > { %3998 = vmatprep.subr.bf16.mxu0 %v4615_v2  ;;  %v1858_v6 = vrot.slane %v5072_v41, 2 }
  0x64   : > { %3999 = vmatpush3.bf16.msra.mxu0 %v4535_v9  ;;  %v1859_v9 = vsel %vm1571_vm3, %v1856_v0, %v1858_v6 }
  0x65   : > { %4000 = vmatprep.subr.bf16.mxu0 %v4615_v2 }
  0x66   : > { %3721 = vmatmul.mubr.bf16.gmra.mrb[24].mxu1 %v414_v10  ;;  %v5090_v10 = vld [vmem:[%s4667_s28 + $0x28] sm:$0xff]  }
  0x67   : > { %3965 = vmatmul.mubr.bf16.gmra.mrb[8].mxu0 %v1578_v14  ;;  %3724 = vmatprep.mubr.msk.bf16.mxu1 %vm4616_vm0, %v4615_v2  ;;  %v1860_v13 = vrot.slane %v5090_v10, 2  ;;  %v4561_v14 = vld [vmem:[%s5856_s1 + $0x1d8] sm:$0xff]  }
  0x68   : > { %3968 = vmatprep.mubr.msk.bf16.mxu0 %vm4616_vm0, %v4615_v2  ;;  %4001 = vmatpush3.bf16.msra.mxu0 %v4538_v54 }
  0x69   : > { %4002 = vmatprep.subr.bf16.mxu0 %v4615_v2  ;;  %v1861_v54 = vsel %vm1571_vm3, %v1858_v6, %v1860_v13  ;;  %v1863_v25 = vsel %vm1571_vm3, %v1860_v13, %v1862_v23  ;;  %v4577_v13 = vld [vmem:[%s5856_s1 + $0xe8] sm:$0xff]  }
  0x6c   : > { %4003 = vmatpush3.bf16.msra.mxu0 %v4541_v24  ;;  %v4568_v24 = vld [vmem:[%s5856_s1 + $0x1e8] sm:$0xff]  }
  0x6d   : > { %4004 = vmatprep.subr.bf16.mxu0 %v4615_v2 }
  0x6e   : > { %3725 = vmatmul.mubr.bf16.gmra.mrb[28].mxu1 %v422_v26  ;;  %v5126_v26 = vld [vmem:[%s4667_s28 + $0x38] sm:$0xff]  }
  0x6f   : > { %3969 = vmatmul.mubr.bf16.gmra.mrb[12].mxu0 %v1580_v29  ;;  %3728 = vmatprep.mubr.msk.bf16.mxu1 %vm4616_vm0, %v4615_v2  ;;  %v1864_v29 = vrot.slane %v5126_v26, 2 }
  0x70   : > { %3972 = vmatprep.mubr.msk.bf16.mxu0 %vm4616_vm0, %v4615_v2  ;;  %4005 = vmatpush3.bf16.msra.mxu0 %v4544_v3  ;;  %v755_v3 = vld [vmem:[%s4667_s28] sm:$0xe] }
  0x71   : > { %4006 = vmatprep.subr.bf16.mxu0 %v4615_v2  ;;  %v3258_v33 = vcombine.low %v755_v3, %v4590_v31  ;;  %v2094_v3 = vshrl.u32 %v5072_v41, 16  ;;  %v4581_v31 = vld [vmem:[%s5856_s1 + $0xf8] sm:$0xff]  }
  0x74   : > { %4007 = vmatpush3.bf16.msra.mxu0 %v4547_v35  ;;  %v1865_v35 = vsel %vm1571_vm3, %v1862_v23, %v1864_v29 }
  0x75   : > { %4044 = vmatprep.subr.bf16.mxu0 %v4615_v2 }
  0x76   : > { %3729 = vmatmul.mubr.bf16.gmra.mrb[32].mxu1 %v430_v36  ;;  %v5146_v36 = vld [vmem:[%s4667_s28 + $0x40] sm:$0xff]  }
  0x77   : > { %3973 = vmatmul.mubr.bf16.gmra.mrb[16].mxu0 %v1582_v37  ;;  %3748 = vmatprep.mubr.msk.bf16.mxu1 %vm4616_vm0, %v4615_v2  ;;  %v777_v37 = vrot.slane %v3258_v33, 1 }
  0x78   : > { %3976 = vmatprep.mubr.msk.bf16.mxu0 %vm4616_vm0, %v4615_v2 }
  0x7e   : > { %3749 = vmatmul.mubr.bf16.vlgmr.msra.gmra.mrb[0].mxu1 %v4724_v15  ;;  %v1586_v15 = vsel %vm1571_vm3, %v1583_v40, %v1585_v47  ;;  %v4591_v40 = vld [vmem:[%s4667_s28 + $0x8] sm:$0xff]  }
  0x7f   : > { %3977 = vmatmul.mubr.bf16.gmra.mrb[20].mxu0 %v1584_v44  ;;  %3785 = vmatpush3.bf16.msra.mxu1 %v4537_v42  ;;  %v778_v42 = vrot.slane %v4591_v40, 1  ;;  %v1866_v44 = vrot.slane %v5146_v36, 2  ;;  %v4576_v40 = vld [vmem:[%s5856_s1 + $0x200] sm:$0xff]  }
  0x80   : > { %3752 = vmatprep.mubr.msk.bf16.mxu1 %vm4616_vm0, %v4615_v2  ;;  %3980 = vmatprep.mubr.msk.bf16.mxu0 %vm4616_vm0, %v4615_v2 }
  0x81   : > { %3786 = vmatprep.subr.bf16.mxu1 %v4615_v2 }
  0x83   : > { %3787 = vmatpush3.bf16.msra.mxu1 %v4540_v46  ;;  %v779_v46 = vsel %vm776_vm4, %v777_v37, %v778_v42 }
  0x84   : > { %3788 = vmatprep.subr.bf16.mxu1 %v4615_v2 }
  0x86   : > { %3753 = vmatmul.mubr.bf16.gmra.mrb[4].mxu1 %v4727_v16  ;;  %v1588_v16 = vsel %vm1571_vm3, %v1585_v47, %v1587_v49  ;;  %v4564_v47 = vld [vmem:[%s5856_s1 + $0xc0] sm:$0xff]   ;;  %v780_v49 = vrot.slane %v4766_v38, 1 }
  0x87   : > { %3981 = vmatmul.mubr.bf16.gmra.mrb[24].mxu0 %v1586_v15  ;;  %3756 = vmatprep.mubr.msk.bf16.mxu1 %vm4616_vm0, %v4615_v2  ;;  %v1867_v15 = vsel %vm1571_vm3, %v1864_v29, %v1866_v44 }
  0x88   : > { %3984 = vmatprep.mubr.msk.bf16.mxu0 %vm4616_vm0, %v4615_v2  ;;  %3789 = vmatpush3.bf16.msra.mxu1 %v4543_v19  ;;  %v5162_v19 = vld [vmem:[%s4667_s28 + $0x48] sm:$0xff]   ;;  %v783_v63 = vsel %vm776_vm4, %v780_v49, %v782_v55 }
  0x89   : > { %3790 = vmatprep.subr.bf16.mxu1 %v4615_v2 }
  0x8c   : > { %3791 = vmatpush3.bf16.msra.mxu1 %v4546_v50  ;;  %v4567_v50 = vld [vmem:[%s5856_s1 + $0xc8] sm:$0xff]  }
  0x8d   : > { %3792 = vmatprep.subr.bf16.mxu1 %v4615_v2 }
  0x8e   : > { %3757 = vmatmul.mubr.bf16.gmra.mrb[8].mxu1 %v4766_v38 }
  0x8f   : > { %3985 = vmatmul.mubr.bf16.gmra.mrb[28].mxu0 %v1588_v16  ;;  %3760 = vmatprep.mubr.msk.bf16.mxu1 %vm4616_vm0, %v4615_v2  ;;  %v1868_v16 = vrot.slane %v5162_v19, 2 }
  0x90   : > { %3988 = vmatprep.mubr.msk.bf16.mxu0 %vm4616_vm0, %v4615_v2  ;;  %3793 = vmatpush3.bf16.msra.mxu1 %v4550_v17  ;;  %v781_v17 = vsel %vm776_vm4, %v778_v42, %v780_v49  ;;  %v788_v42 = vrot.slane %v4880_v45, 1 }
  0x91   : > { %3794 = vmatprep.subr.bf16.mxu1 %v4615_v2  ;;  %v1869_v38 = vsel %vm1571_vm3, %v1866_v44, %v1868_v16 }
  0x94   : > { %3795 = vmatpush3.bf16.msra.mxu1 %v4553_v53  ;;  %v4570_v53 = vld [vmem:[%s5856_s1 + $0xd0] sm:$0xff]  }
  0x95   : > { %3796 = vmatprep.subr.bf16.mxu1 %v4615_v2 }
  0x96   : > { %3761 = vmatmul.mubr.bf16.gmra.mrb[12].mxu1 %v4797_v59  ;;  %v4575_v59 = vld [vmem:[%s5856_s1 + $0xe0] sm:$0xff]  }
  0x97   : > { %3989 = vmatmul.mubr.bf16.gmra.mrb[32].mxu0 %v1590_v57  ;;  %3764 = vmatprep.mubr.msk.bf16.mxu1 %vm4616_vm0, %v4615_v2  ;;  %v1870_v57 = vrot.slane %v5177_v52, 2 }
  0x98   : > { %4008 = vmatprep.mubr.msk.bf16.mxu0 %vm4616_vm0, %v4615_v2  ;;  %3797 = vmatpush3.bf16.msra.mxu1 %v4556_v62  ;;  %v4573_v62 = vld [vmem:[%s5856_s1 + $0xd8] sm:$0xff]  }
  0x99   : > { %3798 = vmatprep.subr.bf16.mxu1 %v4615_v2  ;;  %v1871_v0 = vsel %vm1571_vm3, %v1868_v16, %v1870_v57 }
  0x9c   : > { %3799 = vmatpush3.bf16.msra.mxu1 %v4559_v1  ;;  %v4572_v1 = vld [vmem:[%s4667_s28 + $0x58] ss:$0 sps:$4 sm:$0x33]  }
  0x9d   : > { %3836 = vmatprep.subr.bf16.mxu1 %v4615_v2  ;;  %v1872_v6 = vrot.slane %v4572_v1, 2 }
  0x9e   : > { %3765 = vmatmul.mubr.bf16.gmra.mrb[16].mxu1 %v4828_v12 }
  0x9f   : > { %4009 = vmatmul.mubr.bf16.vlgmr.msra.gmra.mrb[0].mxu0 %v1857_v4  ;;  %3768 = vmatprep.mubr.msk.bf16.mxu1 %vm4616_vm0, %v4615_v2  ;;  %v784_v4 = vrot.slane %v4828_v12, 1 }
  0xa0   : > { %4012 = vmatprep.mubr.msk.bf16.mxu0 %vm4616_vm0, %v4615_v2  ;;  %4045 = vmatpush3.bf16.msra.mxu0 %v4552_v5  ;;  %v2077_v5 = vshrl.u32 %v5050_v60, 16 }
  0xa1   : > { %4046 = vmatprep.subr.bf16.mxu0 %v4615_v2  ;;  %v785_v12 = vsel %vm776_vm4, %v782_v55, %v784_v4  ;;  %v2112_v55 = vshrl.u32 %v5108_v20, 16 }
  0xa4   : > { %4047 = vmatpush3.bf16.msra.mxu0 %v4555_v8  ;;  %v2080_v8 = vshll.u32 %v5050_v60, 16  ;;  %v4579_v60 = vld [vmem:[%s5856_s1 + $0xf0] sm:$0xff]  }
  0xa5   : > { %4048 = vmatprep.subr.bf16.mxu0 %v4615_v2 }
  0xa6   : > { %3769 = vmatmul.mubr.bf16.gmra.mrb[20].mxu1 %v4854_v32 }
  0xa7   : > { %4013 = vmatmul.mubr.bf16.gmra.mrb[4].mxu0 %v1859_v9  ;;  %3772 = vmatprep.mubr.msk.bf16.mxu1 %vm4616_vm0, %v4615_v2  ;;  %v2085_v9 = vshrl.u32 %v5053_v61, 16 }
  0xa8   : > { %4016 = vmatprep.mubr.msk.bf16.mxu0 %vm4616_vm0, %v4615_v2  ;;  %4049 = vmatpush3.bf16.msra.mxu0 %v4558_v11  ;;  %v2088_v11 = vshll.u32 %v5053_v61, 16 }
  0xa9   : > { %4050 = vmatprep.subr.bf16.mxu0 %v4615_v2  ;;  %v2087_v23 = vrot.slane %v2085_v9, 2  ;;  %v4584_v9 = vld [vmem:[%s5856_s1 + $0x228] sm:$0xff]  }
  0xac   : > { %4051 = vmatpush3.bf16.msra.mxu0 %v4561_v14  ;;  %v2079_v14 = vrot.slane %v2077_v5, 2 }
  0xad   : > { %4052 = vmatprep.subr.bf16.mxu0 %v4615_v2 }
  0xae   : > { %3773 = vmatmul.mubr.bf16.gmra.mrb[24].mxu1 %v4880_v45 }
  0xaf   : > { %4017 = vmatmul.mubr.bf16.gmra.mrb[8].mxu0 %v1861_v54  ;;  %3776 = vmatprep.mubr.msk.bf16.mxu1 %vm4616_vm0, %v4615_v2  ;;  %v1873_v54 = vsel %vm1571_vm3, %v1870_v57, %v1872_v6  ;;  %v2115_v57 = vshll.u32 %v5108_v20, 16  ;;  %v2121_v6 = vshrl.u32 %v5126_v26, 16 }
  0xb0   : > { %4020 = vmatprep.mubr.msk.bf16.mxu0 %vm4616_vm0, %v4615_v2  ;;  %4053 = vmatpush3.bf16.msra.mxu0 %v4565_v21  ;;  %v2082_v21 = vrot.slane %v2080_v8, 3  ;;  %v2124_v8 = vshll.u32 %v5126_v26, 16 }
  0xb1   : > { %4054 = vmatprep.subr.bf16.mxu0 %v4615_v2  ;;  %v2117_v1 = vrot.slane %v2115_v57, 3  ;;  %v4596_v57 = vld [vmem:[%s4667_s28 + $0x20] sm:$0xff]  }
  0xb4   : > { %4055 = vmatpush3.bf16.msra.mxu0 %v4568_v24  ;;  %v2090_v24 = vrot.slane %v2088_v11, 3 }
  0xb5   : > { %4056 = vmatprep.subr.bf16.mxu0 %v4615_v2 }
  0xb6   : > { %3777 = vmatmul.mubr.bf16.gmra.mrb[28].mxu1 %v4908_v58  ;;  %v2091_v29 = vor.u32 %v2090_v24, %v2087_v23  ;;  %v2130_v23 = vshrl.u32 %v5146_v36, 16  ;;  %v2133_v24 = vshll.u32 %v5146_v36, 16 }
  0xb7   : > { %4021 = vmatmul.mubr.bf16.gmra.mrb[12].mxu0 %v1863_v25  ;;  %3780 = vmatprep.mubr.msk.bf16.mxu1 %vm4616_vm0, %v4615_v2  ;;  %v786_v25 = vrot.slane %v4854_v32, 1 }
  0xb8   : > { %4024 = vmatprep.mubr.msk.bf16.mxu0 %vm4616_vm0, %v4615_v2  ;;  %4057 = vmatpush3.bf16.msra.mxu0 %v4571_v27  ;;  %v2083_v27 = vor.u32 %v2082_v21, %v2079_v14  ;;  %v4585_v14 = vld [vmem:[%s5856_s1 + $0x230] sm:$0xff]  }
  0xb9   : > { %4058 = vmatprep.subr.bf16.mxu0 %v4615_v2  ;;  %v787_v33 = vsel %vm776_vm4, %v784_v4, %v786_v25  ;;  %v789_v49 = vsel %vm776_vm4, %v786_v25, %v788_v42  ;;  %v792_v4 = vrot.slane %v4931_v7, 1 }
  0xba   : > { %v2092_v32 = vsel %vm2075_vm5, %v2083_v27, %v2091_v29  ;;  %v2132_v27 = vrot.slane %v2130_v23, 2  ;;  %v4601_v23 = vld [vmem:[%s5856_s1 + $0x128] sm:$0xff]  }
  0xbc   : > { %4059 = vmatpush3.bf16.msra.mxu0 %v4574_v30  ;;  %v2097_v30 = vshll.u32 %v5072_v41, 16 }
  0xbd   : > { %4096 = vmatprep.subr.bf16.mxu0 %v4615_v2 }
  0xbe   : > { %3781 = vmatmul.mubr.bf16.gmra.mrb[32].mxu1 %v4931_v7  ;;  %v2099_v37 = vrot.slane %v2097_v30, 3  ;;  %v2123_v7 = vrot.slane %v2121_v6, 2  ;;  %v4592_v30 = vld [vmem:[%s4667_s28 + $0x10] sm:$0xff]  }
  0xbf   : > { %4025 = vmatmul.mubr.bf16.gmra.mrb[16].mxu0 %v1865_v35  ;;  %3800 = vmatprep.mubr.msk.bf16.mxu1 %vm4616_vm0, %v4615_v2  ;;  %v2096_v35 = vrot.slane %v2094_v3, 2  ;;  %v1060_v3 = vrot.slane %v4742_v22, 1  ;;  %v4593_v22 = vld [vmem:[%s5856_s1 + $0x100] sm:$0xff]  }
  0xc0   : > { %4028 = vmatprep.mubr.msk.bf16.mxu0 %vm4616_vm0, %v4615_v2 }
  0xc1   : > { %v2100_v44 = vor.u32 %v2099_v37, %v2096_v35  ;;  %v2142_v35 = vshll.u32 %v5162_v19, 16 }
  0xc6   : > { %3801 = vmatmul.mubr.bf16.vlgmr.msra.gmra.mrb[0].mxu1 %v779_v46  ;;  %v2103_v46 = vshrl.u32 %v5090_v10, 16 }
  0xc7   : > { %4029 = vmatmul.mubr.bf16.gmra.mrb[20].mxu0 %v1867_v15  ;;  %3837 = vmatpush3.bf16.msra.mxu1 %v4564_v47  ;;  %v2106_v47 = vshll.u32 %v5090_v10, 16  ;;  %v4578_v15 = vld [vmem:[%s5856_s1 + $0x208] sm:$0xff]  }
  0xc8   : > { %3804 = vmatprep.mubr.msk.bf16.mxu1 %vm4616_vm0, %v4615_v2  ;;  %4032 = vmatprep.mubr.msk.bf16.mxu0 %vm4616_vm0, %v4615_v2  ;;  %v2105_v45 = vrot.slane %v2103_v46, 2  ;;  %v4594_v46 = vld [vmem:[%s4667_s28 + $0x18] sm:$0xff]  }
  0xc9   : > { %3838 = vmatprep.subr.bf16.mxu1 %v4615_v2  ;;  %v2108_v16 = vrot.slane %v2106_v47, 3  ;;  %v1063_v47 = vrot.slane %v4594_v46, 1  ;;  %v1326_v46 = vshrl.u32 %v4964_v28, 16 }
  0xcb   : > { %3839 = vmatpush3.bf16.msra.mxu1 %v4567_v50  ;;  %v2101_v50 = vsel %vm2075_vm5, %v2091_v29, %v2100_v44  ;;  %v2135_v29 = vrot.slane %v2133_v24, 3  ;;  %v1069_v24 = vrot.slane %v4964_v28, 1 }
  0xcc   : > { %3840 = vmatprep.subr.bf16.mxu1 %v4615_v2 }
  0xce   : > { %3805 = vmatmul.mubr.bf16.gmra.mrb[4].mxu1 %v781_v17  ;;  %v4580_v17 = vld [vmem:[%s5856_s1 + $0x210] sm:$0xff]  }
  0xcf   : > { %4033 = vmatmul.mubr.bf16.gmra.mrb[24].mxu0 %v1869_v38  ;;  %3808 = vmatprep.mubr.msk.bf16.mxu1 %vm4616_vm0, %v4615_v2  ;;  %v790_v38 = vrot.slane %v4908_v58, 1  ;;  %v2114_v58 = vrot.slane %v2112_v55, 2  ;;  %v5328_v55 = vld [vmem:[%s4667_s28 + $0x58] ss:$0 sps:$4 sm:$0x77]  }
  0xd0   : > { %4036 = vmatprep.mubr.msk.bf16.mxu0 %vm4616_vm0, %v4615_v2  ;;  %3841 = vmatpush3.bf16.msra.mxu1 %v4570_v53  ;;  %v2109_v53 = vor.u32 %v2108_v16, %v2105_v45  ;;  %v4595_v16 = vld [vmem:[%s5856_s1 + $0x108] sm:$0xff]  }
  0xd1   : > { %3842 = vmatprep.subr.bf16.mxu1 %v4615_v2  ;;  %v2118_v5 = vor.u32 %v2117_v1, %v2114_v58  ;;  %v793_v11 = vsel %vm776_vm4, %v790_v38, %v792_v4  ;;  %v2157_v58 = vshrl.u32 %v5328_v55, 16  ;;  %v2160_v1 = vshll.u32 %v5328_v55, 16 }
  0xd3   : > { %v2162_v6 = vrot.slane %v2160_v1, 3 }
  0xd4   : > { %3843 = vmatpush3.bf16.msra.mxu1 %v4573_v62  ;;  %v4582_v62 = vld [vmem:[%s5856_s1 + $0x218] sm:$0xff]  }
  0xd5   : > { %3844 = vmatprep.subr.bf16.mxu1 %v4615_v2 }
  0xd6   : > { %3809 = vmatmul.mubr.bf16.gmra.mrb[8].mxu1 %v783_v63  ;;  %v791_v63 = vsel %vm776_vm4, %v788_v42, %v790_v38 }
  0xd7   : > { %4037 = vmatmul.mubr.bf16.gmra.mrb[28].mxu0 %v1871_v0  ;;  %3812 = vmatprep.mubr.msk.bf16.mxu1 %vm4616_vm0, %v4615_v2  ;;  %v2110_v0 = vsel %vm2075_vm5, %v2100_v44, %v2109_v53  ;;  %v2144_v44 = vrot.slane %v2142_v35, 3 }
  0xd8   : > { %4040 = vmatprep.mubr.msk.bf16.mxu0 %vm4616_vm0, %v4615_v2  ;;  %3845 = vmatpush3.bf16.msra.mxu1 %v4575_v59  ;;  %v4583_v59 = vld [vmem:[%s5856_s1 + $0x220] sm:$0xff]  }
  0xd9   : > { %3846 = vmatprep.subr.bf16.mxu1 %v4615_v2 }
  0xdc   : > { %3847 = vmatpush3.bf16.msra.mxu1 %v4577_v13  ;;  %v2119_v13 = vsel %vm2075_vm5, %v2109_v53, %v2118_v5 }
  0xdd   : > { %3848 = vmatprep.subr.bf16.mxu1 %v4615_v2 }
  0xde   : > { %3813 = vmatmul.mubr.bf16.gmra.mrb[12].mxu1 %v785_v12  ;;  %v2126_v12 = vrot.slane %v2124_v8, 3  ;;  %v4598_v8 = vld [vmem:[%s5856_s1 + $0x118] sm:$0xff]  }
  0xdf   : > { %4041 = vmatmul.mubr.bf16.gmra.mrb[32].mxu0 %v1873_v54  ;;  %3816 = vmatprep.mubr.msk.bf16.mxu1 %vm4616_vm0, %v4615_v2  ;;  %v794_v54 = vrot.slane %v4949_v18, 1 }
  0xe0   : > { %4060 = vmatprep.mubr.msk.bf16.mxu0 %vm4616_vm0, %v4615_v2  ;;  %3849 = vmatpush3.bf16.msra.mxu1 %v4579_v60  ;;  %v2127_v21 = vor.u32 %v2126_v12, %v2123_v7  ;;  %v4587_v60 = vld [vmem:[%s5856_s1 + $0x238] sm:$0xff]   ;;  %v4600_v7 = vld [vmem:[%s5856_s1 + $0x120] sm:$0xff]   ;;  %v2345_v12 = vld [vmem:[%s4667_s28 + $0x10] sm:$0x8] }
  0xe1   : > { %3850 = vmatprep.subr.bf16.mxu1 %v4615_v2  ;;  %v795_v25 = vsel %vm776_vm4, %v792_v4, %v794_v54 }
  0xe2   : > { %v2128_v18 = vsel %vm2075_vm5, %v2118_v5, %v2127_v21  ;;  %v2159_v5 = vrot.slane %v2157_v58, 2 }
  0xe4   : > { %3851 = vmatpush3.bf16.msra.mxu1 %v4581_v31  ;;  %v1061_v31 = vrot.slane %v4592_v30, 1 }
  0xe5   : > { %4148 = vmatprep.subr.bf16.mxu1 %v4615_v2 }
  0xe6   : > { %3817 = vmatmul.mubr.bf16.gmra.mrb[16].mxu1 %v787_v33  ;;  %v2136_v33 = vor.u32 %v2135_v29, %v2132_v27  ;;  %v1062_v37 = vsel %vm776_vm4, %v1060_v3, %v1061_v31  ;;  %v1064_v45 = vsel %vm776_vm4, %v1061_v31, %v1063_v47  ;;  %v4603_v29 = vld [vmem:[%s5856_s1 + $0x138] sm:$0xff]   ;;  %v2370_v3 = vrot.slane %v5072_v41, 3 }
  0xe7   : > { %4061 = vmatmul.mubr.bf16.vlgmr.msra.gmra.mrb[0].mxu0 %v2092_v32  ;;  %3820 = vmatprep.mubr.msk.bf16.mxu1 %vm4616_vm0, %v4615_v2  ;;  %v2139_v32 = vshrl.u32 %v5162_v19, 16 }
  0xe8   : > { %4064 = vmatprep.mubr.msk.bf16.mxu0 %vm4616_vm0, %v4615_v2  ;;  %4097 = vmatpush3.bf16.msra.mxu0 %v4576_v40  ;;  %v2137_v40 = vsel %vm2075_vm5, %v2127_v21, %v2136_v33  ;;  %v3426_v21 = vcombine.low %v2345_v12, %v5045_v56  ;;  %v2368_v56 = vrot.slane %v5053_v61, 3  ;;  %v1071_v61 = vrot.slane %v4983_v39, 1 }
  0xe9   : > { %4098 = vmatprep.subr.bf16.mxu0 %v4615_v2  ;;  %v2141_v42 = vrot.slane %v2139_v32, 2  ;;  %v2372_v32 = vrot.slane %v5090_v10, 3 }
  0xea   : > { %v1072_v30 = vsel %vm776_vm4, %v1069_v24, %v1071_v61  ;;  %v2371_v31 = vsel %vm2366_vm6, %v2368_v56, %v2370_v3 }
  0xeb   : > { %v2373_v41 = vsel %vm2366_vm6, %v2370_v3, %v2372_v32 }
  0xec   : > { %4099 = vmatpush3.bf16.msra.mxu0 %v4578_v15  ;;  %v2145_v15 = vor.u32 %v2144_v44, %v2141_v42  ;;  %v4589_v44 = vld [vmem:[%s4667_s28 + $0x50] ss:$0 sps:$4 sm:$0x11]  }
  0xed   : > { %4100 = vmatprep.subr.bf16.mxu0 %v4615_v2 }
  0xee   : > { %3821 = vmatmul.mubr.bf16.gmra.mrb[20].mxu1 %v789_v49  ;;  %v2148_v49 = vshrl.u32 %v5177_v52, 16 }
  0xef   : > { %4065 = vmatmul.mubr.bf16.gmra.mrb[4].mxu0 %v2101_v50  ;;  %3824 = vmatprep.mubr.msk.bf16.mxu1 %vm4616_vm0, %v4615_v2  ;;  %v2151_v50 = vshll.u32 %v5177_v52, 16 }
  0xf0   : > { %4068 = vmatprep.mubr.msk.bf16.mxu0 %vm4616_vm0, %v4615_v2  ;;  %4101 = vmatpush3.bf16.msra.mxu0 %v4580_v17  ;;  %v2146_v17 = vsel %vm2075_vm5, %v2136_v33, %v2145_v15  ;;  %v2150_v38 = vrot.slane %v2148_v49, 2  ;;  %v1073_v33 = vrot.slane %v4995_v43, 1  ;;  %v1328_v49 = vrot.slane %v1326_v46, 1 }
  0xf1   : > { %4102 = vmatprep.subr.bf16.mxu0 %v4615_v2  ;;  %v2153_v53 = vrot.slane %v2151_v50, 3 }
  0xf2   : > { %v1074_v35 = vsel %vm776_vm4, %v1071_v61, %v1073_v33 }
  0xf4   : > { %4103 = vmatpush3.bf16.msra.mxu0 %v4582_v62  ;;  %v1065_v62 = vrot.slane %v4596_v57, 1 }
  0xf5   : > { %4104 = vmatprep.subr.bf16.mxu0 %v4615_v2 }
  0xf6   : > { %3825 = vmatmul.mubr.bf16.gmra.mrb[24].mxu1 %v791_v63  ;;  %v2154_v63 = vor.u32 %v2153_v53, %v2150_v38 }
  0xf7   : > { %4069 = vmatmul.mubr.bf16.gmra.mrb[8].mxu0 %v2110_v0  ;;  %3828 = vmatprep.mubr.msk.bf16.mxu1 %vm4616_vm0, %v4615_v2  ;;  %v4597_v0 = vld [vmem:[%s5856_s1 + $0x110] sm:$0xff]  }
  0xf8   : > { %4072 = vmatprep.mubr.msk.bf16.mxu0 %vm4616_vm0, %v4615_v2  ;;  %4105 = vmatpush3.bf16.msra.mxu0 %v4583_v59  ;;  %v1066_v59 = vsel %vm776_vm4, %v1063_v47, %v1065_v62  ;;  %v2155_v4 = vsel %vm2075_vm5, %v2145_v15, %v2154_v63  ;;  %v1329_v47 = vshll.u32 %v4964_v28, 16  ;;  %v1338_v28 = vshll.u32 %v4983_v39, 16 }
  0xf9   : > { %4106 = vmatprep.subr.bf16.mxu0 %v4615_v2 }
  0xfa   : > { %v1331_v50 = vrot.slane %v1329_v47, 2  ;;  %v1340_v57 = vrot.slane %v1338_v28, 2 }
  0xfc   : > { %4107 = vmatpush3.bf16.msra.mxu0 %v4584_v9  ;;  %v4599_v9 = vld [vmem:[%s4667_s28 + $0x28] sm:$0xff]  }
  0xfd   : > { %4108 = vmatprep.subr.bf16.mxu0 %v4615_v2 }
  0xfe   : > { %3829 = vmatmul.mubr.bf16.gmra.mrb[28].mxu1 %v793_v11  ;;  %v1067_v11 = vrot.slane %v4599_v9, 1 }
  0xff   : > { %4073 = vmatmul.mubr.bf16.gmra.mrb[12].mxu0 %v2119_v13  ;;  %3832 = vmatprep.mubr.msk.bf16.mxu1 %vm4616_vm0, %v4615_v2  ;;  %v2163_v13 = vor.u32 %v2162_v6, %v2159_v5  ;;  %v1353_v5 = vshrl.u32 %v5010_v48, 16 }
 0x100   : > { %4076 = vmatprep.mubr.msk.bf16.mxu0 %vm4616_vm0, %v4615_v2  ;;  %4109 = vmatpush3.bf16.msra.mxu0 %v4585_v14  ;;  %v1068_v14 = vsel %vm776_vm4, %v1065_v62, %v1067_v11 }
 0x101   : > { %4110 = vmatprep.subr.bf16.mxu0 %v4615_v2  ;;  %v2164_v54 = vsel %vm2075_vm5, %v2154_v63, %v2163_v13 }
 0x104   : > { %4111 = vmatpush3.bf16.msra.mxu0 %v4587_v60  ;;  %v2367_v60 = vrot.slane %v3426_v21, 3 }
 0x106   : > { %3833 = vmatmul.mubr.bf16.gmra.mrb[32].mxu1 %v795_v25  ;;  %v4602_v25 = vld [vmem:[%s5856_s1 + $0x130] sm:$0xff]   ;;  %v2369_v27 = vsel %vm2366_vm6, %v2367_v60, %v2368_v56 }
 0x107   : > { %4077 = vmatmul.mubr.bf16.gmra.mrb[16].mxu0 %v2128_v18  ;;  %3852 = vmatprep.mubr.msk.bf16.mxu1 %vm4616_vm0, %v4615_v2  ;;  %v1070_v18 = vsel %vm776_vm4, %v1067_v11, %v1069_v24 }
 0x108   : > { %4080 = vmatprep.mubr.msk.bf16.mxu0 %vm4616_vm0, %v4615_v2 }
 0x10e   : > { %3853 = vmatmul.mubr.bf16.vlgmr.msra.gmra.mrb[0].mxu1 %v1062_v37  ;;  %v1075_v37 = vrot.slane %v5010_v48, 1 }
 0x10f   : > { %4081 = vmatmul.mubr.bf16.gmra.mrb[20].mxu0 %v2137_v40  ;;  %4156 = vmatpush3.bf16.msra.mxu1 %v4593_v22  ;;  %v2374_v40 = vrot.slane %v5108_v20, 3  ;;  %v1077_v22 = vrot.slane %v4589_v44, 1  ;;  %v2376_v20 = vrot.slane %v5126_v26, 3  ;;  %v2378_v26 = vrot.slane %v5146_v36, 3 }
 0x110   : > { %3856 = vmatprep.mubr.msk.bf16.mxu1 %vm4616_vm0, %v4615_v2  ;;  %4084 = vmatprep.mubr.msk.bf16.mxu0 %vm4616_vm0, %v4615_v2  ;;  %v1076_v42 = vsel %vm776_vm4, %v1073_v33, %v1075_v37  ;;  %v2380_v36 = vrot.slane %v5162_v19, 3  ;;  %v2382_v19 = vrot.slane %v5177_v52, 3  ;;  %v2384_v52 = vrot.slane %v5328_v55, 3 }
 0x111   : > { %4149 = vmatprep.subr.bf16.mxu1 %v4615_v2  ;;  %v2375_v10 = vsel %vm2366_vm6, %v2372_v32, %v2374_v40  ;;  %v1078_v15 = vsel %vm776_vm4, %v1075_v37, %v1077_v22  ;;  %v2379_v62 = vsel %vm2366_vm6, %v2376_v20, %v2378_v26 }
 0x112   : > { %v2383_v11 = vsel %vm2366_vm6, %v2380_v36, %v2382_v19  ;;  %v2385_v21 = vsel %vm2366_vm6, %v2382_v19, %v2384_v52 }
 0x113   : > { %4157 = vmatpush3.bf16.msra.mxu1 %v4595_v16  ;;  %v1332_v16 = vor.u32 %v1331_v50, %v1328_v49 }
 0x114   : > { %4150 = vmatprep.subr.bf16.mxu1 %v4615_v2 }
 0x115   : > { %v1333_v38 = vsel %vm1280_vm2, %v4861_v34, %v1332_v16 }
 0x116   : > { %3857 = vmatmul.mubr.bf16.gmra.mrb[4].mxu1 %v1064_v45  ;;  %v2377_v45 = vsel %vm2366_vm6, %v2374_v40, %v2376_v20 }
 0x117   : > { %4085 = vmatmul.mubr.bf16.gmra.mrb[24].mxu0 %v2146_v17  ;;  %3860 = vmatprep.mubr.msk.bf16.mxu1 %vm4616_vm0, %v4615_v2  ;;  %v1335_v17 = vshrl.u32 %v4983_v39, 16  ;;  %v1344_v39 = vshrl.u32 %v4995_v43, 16 }
 0x118   : > { %4088 = vmatprep.mubr.msk.bf16.mxu0 %vm4616_vm0, %v4615_v2  ;;  %4158 = vmatpush3.bf16.msra.mxu1 %v4597_v0  ;;  %v1347_v0 = vshll.u32 %v4995_v43, 16  ;;  %v1356_v43 = vshll.u32 %v5010_v48, 16  ;;  %v1365_v48 = vshll.u32 %v5028_v51, 16 }
 0x119   : > { %4151 = vmatprep.subr.bf16.mxu1 %v4615_v2  ;;  %v1337_v53 = vrot.slane %v1335_v17, 1  ;;  %v1346_v58 = vrot.slane %v1344_v39, 1 }
 0x11a   : > { %v1349_v1 = vrot.slane %v1347_v0, 2  ;;  %v1358_v9 = vrot.slane %v1356_v43, 2 }
 0x11b   : > { %v1341_v63 = vor.u32 %v1340_v57, %v1337_v53 }
 0x11c   : > { %4159 = vmatpush3.bf16.msra.mxu1 %v4598_v8  ;;  %v1355_v8 = vrot.slane %v1353_v5, 1 }
 0x11d   : > { %4152 = vmatprep.subr.bf16.mxu1 %v4615_v2  ;;  %v1342_v34 = vsel %vm1280_vm2, %v1332_v16, %v1341_v63 }
 0x11e   : > { %3861 = vmatmul.mubr.bf16.gmra.mrb[8].mxu1 %v1066_v59  ;;  %v2381_v59 = vsel %vm2366_vm6, %v2378_v26, %v2380_v36  ;;  %v1359_v13 = vor.u32 %v1358_v9, %v1355_v8 }
 0x11f   : > { %4089 = vmatmul.mubr.bf16.gmra.mrb[28].mxu0 %v2155_v4  ;;  %3864 = vmatprep.mubr.msk.bf16.mxu1 %vm4616_vm0, %v4615_v2  ;;  %v1350_v4 = vor.u32 %v1349_v1, %v1346_v58 }
 0x120   : > { %4092 = vmatprep.mubr.msk.bf16.mxu0 %vm4616_vm0, %v4615_v2  ;;  %4160 = vmatpush3.bf16.msra.mxu1 %v4600_v7  ;;  %v1362_v7 = vshrl.u32 %v5028_v51, 16  ;;  %v2566_v51 = vlaneseq }
 0x121   : > { %4153 = vmatprep.subr.bf16.mxu1 %v4615_v2  ;;  %v1351_v6 = vsel %vm1280_vm2, %v1341_v63, %v1350_v4  ;;  %v1360_v12 = vsel %vm1280_vm2, %v1350_v4, %v1359_v13 }
 0x122   : > { %v5453_v60 = vshrl.u32 %v2566_v51, 7 }
 0x124   : > { %4161 = vmatpush3.bf16.msra.mxu1 %v4601_v23  ;;  %v2568_v55 = vadd.s32 8, %v5453_v60  ;;  %v2570_v33 = vadd.s32 24, %v5453_v60  ;;  %v2571_v37 = vadd.s32 32, %v5453_v60  ;;  %v5491_v28 = vadd.s32 40, %v5453_v60 }
 0x125   : > { %4154 = vmatprep.subr.bf16.mxu1 %v4615_v2  ;;  %v5495_v53 = vadd.s32 48, %v5453_v60  ;;  %v5499_v63 = vadd.s32 56, %v5453_v60  ;;  %v5535_v51 = vadd.s32 64, %v5453_v60 }
 0x126   : > { %3865 = vmatmul.mubr.bf16.gmra.mrb[12].mxu1 %v1068_v14  ;;  %v1364_v14 = vrot.slane %v1362_v7, 1  ;;  %v5479_v22 = vmul.u32.u64.low 3817748708, %v2570_v33  ;;  %v5480_v46 = vmul.u32.u64.high 3817748708, %v2570_v33, %v5479_v22 }
 0x127   : > { %4093 = vmatmul.mubr.bf16.gmra.mrb[32].mxu0 %v2164_v54  ;;  %3868 = vmatprep.mubr.msk.bf16.mxu1 %vm4616_vm0, %v4615_v2  ;;  %v1367_v54 = vrot.slane %v1365_v48, 2  ;;  %v5503_v0 = vmul.u32.u64.low 3817748708, %v5491_v28  ;;  %v5504_v36 = vmul.u32.u64.high 3817748708, %v5491_v28, %v5503_v0 }
 0x128   : > { %4112 = vmatprep.mubr.msk.bf16.mxu0 %vm4616_vm0, %v4615_v2  ;;  %4162 = vmatpush3.bf16.msra.mxu1 %v4602_v25  ;;  %v5507_v58 = vmul.u32.u64.low 3817748708, %v5495_v53  ;;  %v5508_v1 = vmul.u32.u64.high 3817748708, %v5495_v53, %v5507_v58  ;;  %v5513_v43 = vmul.u32.u64.low 3817748708, %v5499_v63  ;;  %v5514_v19 = vmul.u32.u64.high 3817748708, %v5499_v63, %v5513_v43 }
 0x129   : > { %4155 = vmatprep.subr.bf16.mxu1 %v4615_v2  ;;  %v1368_v23 = vor.u32 %v1367_v54, %v1364_v14  ;;  %v5600_v43 = vadd.s32 80, %v5453_v60 }
 0x12b   : > { %v1369_v24 = vsel %vm1280_vm2, %v1359_v13, %v1368_v23  ;;  %v2646_v23 = vshrl.u32 %v5504_v36, 4 }
 0x12c   : > { %4163 = vmatpush3.bf16.msra.mxu1 %v4603_v29 }
 0x12e   : > { %3869 = vmatmul.mubr.bf16.gmra.mrb[16].mxu1 %v1070_v18 }
 0x12f   : > { %4113 = vmatmul.mubr.bf16.vlgmr.msra.gmra.mrb[0].mxu0 %v2369_v27  ;;  %3872 = vmatprep.mubr.msk.bf16.mxu1 %vm4616_vm0, %v4615_v2  ;;  %v5461_v27 = vmul.u32.u64.low 3817748708, %v5453_v60  ;;  %v5462_v29 = vmul.u32.u64.high 3817748708, %v5453_v60, %v5461_v27 }
 0x130   : > { %4116 = vmatprep.mubr.msk.bf16.mxu0 %vm4616_vm0, %v4615_v2 }
 0x136   : > { %3873 = vmatmul.mubr.bf16.gmra.mrb[20].mxu1 %v1072_v30  ;;  %v2569_v30 = vadd.s32 16, %v5453_v60 }
 0x137   : > { %4117 = vmatmul.mubr.bf16.gmra.mrb[4].mxu0 %v2371_v31  ;;  %3876 = vmatprep.mubr.msk.bf16.mxu1 %vm4616_vm0, %v4615_v2 }
 0x138   : > { %4120 = vmatprep.mubr.msk.bf16.mxu0 %vm4616_vm0, %v4615_v2 }
 0x13e   : > { %3877 = vmatmul.mubr.bf16.gmra.mrb[24].mxu1 %v1074_v35 }
 0x13f   : > { %4121 = vmatmul.mubr.bf16.gmra.mrb[8].mxu0 %v2373_v41  ;;  %3880 = vmatprep.mubr.msk.bf16.mxu1 %vm4616_vm0, %v4615_v2  ;;  %v2591_v41 = vshrl.u32 %v5462_v29, 4 }
 0x140   : > { %4124 = vmatprep.mubr.msk.bf16.mxu0 %vm4616_vm0, %v4615_v2 }
 0x141   : > { %v2592_v47 = vmul.u32 18, %v2591_v41 }
 0x143   : > { %v2593_v17 = vsub.s32 %v5453_v60, %v2592_v47 }
 0x145   : > { %vm2783_vm7 = vcmp.ne.s32.totalorder %v2593_v17, 0  ;;  %vm2801_vm8 = vcmp.lt.s32.totalorder %v2593_v17, 0  ;;  %v2837_v9 = vadd.s32 18, %v2593_v17 }
 0x146   : > { %3881 = vmatmul.mubr.bf16.gmra.mrb[28].mxu1 %v1076_v42  ;;  %v5475_v42 = vmul.u32.u64.low 3817748708, %v2569_v30  ;;  %v5476_v44 = vmul.u32.u64.high 3817748708, %v2569_v30, %v5475_v42  ;;  %vm5518_vm11 = vmand %vm2801_vm8, %vm2783_vm7 }
 0x147   : > { %4125 = vmatmul.mubr.bf16.gmra.mrb[12].mxu0 %v2375_v10  ;;  %3884 = vmatprep.mubr.msk.bf16.mxu1 %vm4616_vm0, %v4615_v2  ;;  %v2855_v14 = vsel %vm5518_vm11, %v2837_v9, %v2593_v17 }
 0x148   : > { %4128 = vmatprep.mubr.msk.bf16.mxu0 %vm4616_vm0, %v4615_v2  ;;  %vm2873_vm1 = vcmp.lt.s32.totalorder %v2855_v14, 16 }
 0x14e   : > { %3885 = vmatmul.mubr.bf16.gmra.mrb[32].mxu1 %v1078_v15  ;;  %v5482_v20 = vmul.u32.u64.low 3817748708, %v2571_v37  ;;  %v5483_v15 = vmul.u32.u64.high 3817748708, %v2571_v37, %v5482_v20 }
 0x14f   : > { %4129 = vmatmul.mubr.bf16.gmra.mrb[16].mxu0 %v2377_v45  ;;  %3920 = vmatprep.mubr.msk.bf16.mxu1 %vm4616_vm0, %v4615_v2 }
 0x150   : > { %4132 = vmatprep.mubr.msk.bf16.mxu0 %vm4616_vm0, %v4615_v2  ;;  %v2635_v39 = vshrl.u32 %v5483_v15, 4 }
 0x152   : > { %v2636_v13 = vmul.u32 18, %v2635_v39 }
 0x156   : > { %3921 = vmatmul.mubr.bf16.vlgmr.msra.gmra.mrb[16].mxu1 %v1333_v38  ;;  %v2613_v38 = vshrl.u32 %v5476_v44, 4 }
 0x157   : > { %4133 = vmatmul.mubr.bf16.gmra.mrb[20].mxu0 %v2379_v62  ;;  %3924 = vmatprep.mubr.msk.bf16.mxu1 %vm4616_vm0, %v4615_v2  ;;  %v2624_v62 = vshrl.u32 %v5480_v46, 4 }
 0x158   : > { %4136 = vmatprep.mubr.msk.bf16.mxu0 %vm4616_vm0, %v4615_v2 }
 0x159   : > { %v2625_v4 = vmul.u32 18, %v2624_v62 }
 0x15e   : > { %3925 = vmatmul.mubr.bf16.gmra.mrb[20].mxu1 %v1342_v34  ;;  %v2614_v34 = vmul.u32 18, %v2613_v38 }
 0x15f   : > { %4137 = vmatmul.mubr.bf16.gmra.mrb[24].mxu0 %v2381_v59  ;;  %3928 = vmatprep.mubr.msk.bf16.mxu1 %vm4616_vm0, %v4615_v2 }
 0x160   : > { %4140 = vmatprep.mubr.msk.bf16.mxu0 %vm4616_vm0, %v4615_v2  ;;  %v2615_v52 = vsub.s32 %v2569_v30, %v2614_v34 }
 0x162   : > { %vm2785_vm13 = vcmp.ne.s32.totalorder %v2615_v52, 0  ;;  %vm2803_vm14 = vcmp.lt.s32.totalorder %v2615_v52, 0  ;;  %v2839_v29 = vadd.s32 18, %v2615_v52 }
 0x163   : > { %vm5546_vm3 = vmand %vm2803_vm14, %vm2785_vm13 }
 0x164   : > { %v2857_v20 = vsel %vm5546_vm3, %v2839_v29, %v2615_v52 }
 0x165   : > { %vm5584_vm8 = vcmp.lt.s32.totalorder %v2857_v20, 16 }
 0x166   : > { %3929 = vmatmul.mubr.bf16.gmra.mrb[24].mxu1 %v1351_v6 }
 0x167   : > { %4141 = vmatmul.mubr.bf16.gmra.mrb[28].mxu0 %v2383_v11  ;;  %3932 = vmatprep.mubr.msk.bf16.mxu1 %vm4616_vm0, %v4615_v2 }
 0x168   : > { %4144 = vmatprep.mubr.msk.bf16.mxu0 %vm4616_vm0, %v4615_v2 }
 0x16e   : > { %3933 = vmatmul.mubr.bf16.gmra.mrb[28].mxu1 %v1360_v12  ;;  %v2626_v12 = vsub.s32 %v2570_v33, %v2625_v4 }
 0x16f   : > { %4145 = vmatmul.mubr.bf16.gmra.mrb[32].mxu0 %v2385_v21  ;;  %3936 = vmatprep.mubr.msk.bf16.mxu1 %vm4616_vm0, %v4615_v2  ;;  %v5464_v2 = vmul.u32.u64.low 3817748708, %v2568_v55  ;;  %v5465_v3 = vmul.u32.u64.high 3817748708, %v2568_v55, %v5464_v2  ;;  %v5530_v21 = vsub.s32 %v2571_v37, %v2636_v13 }
 0x170   : > { %vm2786_vm15 = vcmp.ne.s32.totalorder %v2626_v12, 0  ;;  %vm2804_vm0 = vcmp.lt.s32.totalorder %v2626_v12, 0  ;;  %v2840_v33 = vadd.s32 18, %v2626_v12 }
 0x171   : > { %v2602_v10 = vshrl.u32 %v5465_v3, 4  ;;  %vm2787_vm4 = vcmp.ne.s32.totalorder %v5530_v21, 0  ;;  %vm5552_vm5 = vmand %vm2804_vm0, %vm2786_vm15  ;;  %vm2805_vm6 = vcmp.lt.s32.totalorder %v5530_v21, 0  ;;  %v2841_v15 = vadd.s32 18, %v5530_v21 }
 0x172   : > { %vm5575_vm7 = vmand %vm2805_vm6, %vm2787_vm4 }
 0x173   : > { %v2603_v50 = vmul.u32 18, %v2602_v10 }
 0x175   : > { %v2604_v57 = vsub.s32 %v2568_v55, %v2603_v50  ;;  %v5538_v55 = vadd.s32 72, %v5453_v60 }
 0x176   : > { %3937 = vmatmul.mubr.bf16.gmra.mrb[32].mxu1 %v1369_v24  ;;  %v2657_v24 = vshrl.u32 %v5508_v1, 4 }
 0x177   : > { %vm2784_vm9 = vcmp.ne.s32.totalorder %v2604_v57, 0  ;;  %vm2802_vm10 = vcmp.lt.s32.totalorder %v2604_v57, 0  ;;  %v2838_v11 = vadd.s32 18, %v2604_v57 }
 0x178   : > { %vm5522_vm12 = vmand %vm2802_vm10, %vm2784_vm9  ;;  %v5563_v46 = vmul.u32.u64.low 3817748708, %v5538_v55  ;;  %v5564_v47 = vmul.u32.u64.high 3817748708, %v5538_v55, %v5563_v46 }
 0x179   : > { %v2856_v54 = vsel %vm5522_vm12, %v2838_v11, %v2604_v57 }
 0x17a   : > { %vm5540_vm2 = vcmp.lt.s32.totalorder %v2856_v54, 16 }
 0x1e1   : > { %v5455_v56 = vpop.f32.mrb[0].mxu1 }
 0x1e2   : > { %v3854_v25 = vpop.f32.mrb[1].mxu1 }
 0x1e3   : > { %v5458_v18 = vpop.f32.mrb[2].mxu1 }
 0x1e4   : > { %v3855_v61 = vpop.f32.mrb[3].mxu1 }
 0x1e5   : > { %v2668_v61 = vshrl.u32 %v5514_v19, 4 }
 0x1e7   : > { %v2669_v50 = vmul.u32 18, %v2668_v61 }
 0x1e9   : > { %v5468_v31 = vpop.f32.mrb[4].mxu1  ;;  %v5596_v4 = vsub.s32 %v5499_v63, %v2669_v50 }
 0x1ea   : > { %v3858_v32 = vpop.f32.mrb[5].mxu1 }
 0x1eb   : > { %v5471_v35 = vpop.f32.mrb[6].mxu1  ;;  %v2647_v32 = vmul.u32 18, %v2646_v23  ;;  %vm2790_vm15 = vcmp.ne.s32.totalorder %v5596_v4, 0  ;;  %vm2808_vm0 = vcmp.lt.s32.totalorder %v5596_v4, 0  ;;  %v2844_v29 = vadd.s32 18, %v5596_v4 }
 0x1ec   : > { %v3859_v40 = vpop.f32.mrb[7].mxu1 }
 0x1ed   : > { %v2658_v40 = vmul.u32 18, %v2657_v24  ;;  %v2648_v38 = vsub.s32 %v5491_v28, %v2647_v32  ;;  %v2859_v28 = vsel %vm5575_vm7, %v2841_v15, %v5530_v21 }
 0x1ee   : > { %v5620_v54 = vmul.u32.u64.low 3817748708, %v5600_v43  ;;  %v5621_v21 = vmul.u32.u64.high 3817748708, %v5600_v43, %v5620_v54  ;;  %vm2877_vm3 = vcmp.lt.s32.totalorder %v2859_v28, 16 }
 0x1ef   : > { %v5581_v0 = vsub.s32 %v5495_v53, %v2658_v40  ;;  %vm2788_vm10 = vcmp.ne.s32.totalorder %v2648_v38, 0  ;;  %vm2806_vm11 = vcmp.lt.s32.totalorder %v2648_v38, 0  ;;  %v2842_v8 = vadd.s32 18, %v2648_v38 }
 0x1f0   : > { %vm5611_vm14 = vmand %vm2806_vm11, %vm2788_vm10 }
 0x1f1   : > { %v5485_v49 = vpop.f32.mrb[8].mxu1  ;;  %vm2789_vm12 = vcmp.ne.s32.totalorder %v5581_v0, 0  ;;  %vm2807_vm13 = vcmp.lt.s32.totalorder %v5581_v0, 0  ;;  %v2843_v9 = vadd.s32 18, %v5581_v0  ;;  %v2860_v61 = vsel %vm5611_vm14, %v2842_v8, %v2648_v38 }
 0x1f2   : > { %v3862_v45 = vpop.f32.mrb[9].mxu1  ;;  %vm2878_vm4 = vcmp.lt.s32.totalorder %v2860_v61, 16 }
 0x1f3   : > { %v5487_v16 = vpop.f32.mrb[10].mxu1 }
 0x1f4   : > { %v3863_v26 = vpop.f32.mrb[11].mxu1 }
 0x1f5   : > { %v2858_v26 = vsel %vm5552_vm5, %v2840_v33, %v2626_v12 }
 0x1f6   : > { %vm5588_vm9 = vcmp.lt.s32.totalorder %v2858_v26, 16 }
 0x1f9   : > { %v5510_v59 = vpop.f32.mrb[12].mxu1 }
 0x1fa   : > { %v3866_v5 = vpop.f32.mrb[13].mxu1 }
 0x1fb   : > { %v5516_v6 = vpop.f32.mrb[14].mxu1 }
 0x1fc   : > { %v3867_v7 = vpop.f32.mrb[15].mxu1 }
 0x1fd   : > { %v2690_v7 = vshrl.u32 %v5564_v47, 4 }
 0x1ff   : > { %v2691_v30 = vmul.u32 18, %v2690_v7  ;;  %v5685_v7 = vadd.s32 112, %v5453_v60 }
 0x201   : > { %v5657_v20 = vsub.s32 %v5538_v55, %v2691_v30  ;;  %v5670_v55 = vadd.s32 104, %v5453_v60 }
 0x202   : > { %v2477_v25 = vpop.f32.mrb[0].mxu0 }
 0x203   : > { %v4164_v2 = vadd.f32 %v2477_v25, %v5455_v56  ;;  %v4114_v3 = vpop.f32.mrb[1].mxu0  ;;  %v5558_v56 = vmul.u32.u64.low 3817748708, %v5535_v51  ;;  %v5559_v42 = vmul.u32.u64.high 3817748708, %v5535_v51, %v5558_v56  ;;  %vm2810_vm10 = vcmp.lt.s32.totalorder %v5657_v20, 0 }
 0x204   : > { %v2480_v41 = vpop.f32.mrb[2].mxu0  ;;  %v5644_v56 = vadd.s32 96, %v5453_v60 }
 0x205   : > { %v2927_v44 = vsel %vm2873_vm1, %v4164_v2, 0.0  ;;  %v4165_v10 = vadd.f32 %v2480_v41, %v5458_v18  ;;  %v4115_v22 = vpop.f32.mrb[3].mxu0  ;;  %v2679_v13 = vshrl.u32 %v5559_v42, 4  ;;  %vm5627_vm1 = vmand %vm2807_vm13, %vm2789_vm12  ;;  %v5640_v41 = vadd.s32 88, %v5453_v60 }
 0x206   : > { %v2972_v57 = vmul.f32 %v2927_v44, %v2927_v44 }
 0x207   : > { %v2928_v45 = vsel %vm5540_vm2, %v4165_v10, 0.0  ;;  %v3477_v17 = vpack.c.bf16 %v4165_v10, %v4164_v2  ;;  %vm5635_vm2 = vmand %vm2808_vm0, %vm2790_vm15  ;;  %v2680_v3 = vmul.u32 18, %v2679_v13 }
 0x208   : > { %v2946_v62 = vadd.f32 %v2928_v45, %v2927_v44  ;;  %v2973_v39 = vmul.f32 %v2928_v45, %v2928_v45  ;;  %v2861_v44 = vsel %vm5627_vm1, %v2843_v9, %v5581_v0  ;;  %v2862_v10 = vsel %vm5635_vm2, %v2844_v29, %v5596_v4 }
 0x209   : > { %3478 = vst [vmem:[%s4672_s7] sm:$0xff] %v3477_v17   ;;  %v5660_v45 = vmul.u32.u64.low 3817748708, %v5640_v41  ;;  %v5661_v17 = vmul.u32.u64.high 3817748708, %v5640_v41, %v5660_v45  ;;  %vm2879_vm5 = vcmp.lt.s32.totalorder %v2861_v44, 16  ;;  %vm2880_vm6 = vcmp.lt.s32.totalorder %v2862_v10, 16 }
 0x20a   : > { %v2990_v34 = vadd.f32 %v2973_v39, %v2972_v57  ;;  %v2485_v58 = vpop.f32.mrb[4].mxu0  ;;  %v5664_v38 = vmul.u32.u64.low 3817748708, %v5644_v56  ;;  %v5665_v57 = vmul.u32.u64.high 3817748708, %v5644_v56, %v5664_v38 }
 0x20b   : > { %v4166_v53 = vadd.f32 %v2485_v58, %v5468_v31  ;;  %v4118_v5 = vpop.f32.mrb[5].mxu0  ;;  %v5713_v61 = vmul.u32.u64.low 3817748708, %v5685_v7  ;;  %v5714_v2 = vmul.u32.u64.high 3817748708, %v5685_v7, %v5713_v61 }
 0x20c   : > { %v2488_v19 = vpop.f32.mrb[6].mxu0  ;;  %v2723_v13 = vshrl.u32 %v5665_v57, 4 }
 0x20d   : > { %v2929_v63 = vsel %vm5584_vm8, %v4166_v53, 0.0  ;;  %v4167_v11 = vadd.f32 %v2488_v19, %v5471_v35  ;;  %v4119_v31 = vpop.f32.mrb[7].mxu0  ;;  %v5678_v19 = vmul.u32.u64.low 3817748708, %v5670_v55  ;;  %v5679_v8 = vmul.u32.u64.high 3817748708, %v5670_v55, %v5678_v19 }
 0x20e   : > { %v2947_v48 = vadd.f32 %v2946_v62, %v2929_v63  ;;  %v2974_v52 = vmul.f32 %v2929_v63, %v2929_v63  ;;  %v2712_v63 = vshrl.u32 %v5661_v17, 4  ;;  %v2724_v29 = vmul.u32 18, %v2723_v13 }
 0x20f   : > { %v2930_v35 = vsel %vm5588_vm9, %v4167_v11, 0.0  ;;  %v3482_v14 = vpack.c.bf16 %v4167_v11, %v4166_v53  ;;  %vm2792_vm9 = vcmp.ne.s32.totalorder %v5657_v20, 0  ;;  %v5750_v17 = vadd.s32 136, %v5453_v60 }
 0x210   : > { %v2991_v23 = vadd.f32 %v2990_v34, %v2974_v52  ;;  %v2948_v24 = vadd.f32 %v2947_v48, %v2930_v35  ;;  %v2975_v25 = vmul.f32 %v2930_v35, %v2930_v35  ;;  %v5692_v35 = vadd.s32 120, %v5453_v60  ;;  %vm5708_vm12 = vmand %vm2810_vm10, %vm2792_vm9 }
 0x211   : > { %3519 = vst [vmem:[%s4672_s7 + $0x8] sm:$0xff] %v3482_v14  }
 0x212   : > { %v2992_v33 = vadd.f32 %v2991_v23, %v2975_v25  ;;  %v2493_v32 = vpop.f32.mrb[8].mxu0 }
 0x213   : > { %v4168_v37 = vadd.f32 %v2493_v32, %v5485_v49  ;;  %v4122_v40 = vpop.f32.mrb[9].mxu0  ;;  %v5654_v49 = vsub.s32 %v5535_v51, %v2680_v3  ;;  %v2701_v51 = vshrl.u32 %v5621_v21, 4 }
 0x214   : > { %v2496_v42 = vpop.f32.mrb[10].mxu0 }
 0x215   : > { %v2931_v22 = vsel %vm2877_vm3, %v4168_v37, 0.0  ;;  %v4169_v46 = vadd.f32 %v2496_v42, %v5487_v16  ;;  %v4123_v47 = vpop.f32.mrb[11].mxu0  ;;  %vm2791_vm7 = vcmp.ne.s32.totalorder %v5654_v49, 0  ;;  %vm2809_vm8 = vcmp.lt.s32.totalorder %v5654_v49, 0 }
 0x216   : > { %v2949_v15 = vadd.f32 %v2948_v24, %v2931_v22  ;;  %v2976_v50 = vmul.f32 %v2931_v22, %v2931_v22  ;;  %v2702_v28 = vmul.u32 18, %v2701_v51  ;;  %vm5698_vm11 = vmand %vm2809_vm8, %vm2791_vm7  ;;  %v2845_v23 = vadd.s32 18, %v5654_v49 }
 0x217   : > { %v2932_v26 = vsel %vm2878_vm4, %v4169_v46, 0.0  ;;  %v3487_v18 = vpack.c.bf16 %v4169_v46, %v4168_v37  ;;  %v2846_v24 = vadd.s32 18, %v5657_v20  ;;  %v5732_v22 = vsub.s32 %v5644_v56, %v2724_v29 }
 0x218   : > { %v2993_v16 = vadd.f32 %v2992_v33, %v2976_v50  ;;  %v2950_v62 = vadd.f32 %v2949_v15, %v2932_v26  ;;  %v2977_v39 = vmul.f32 %v2932_v26, %v2932_v26  ;;  %v5688_v12 = vsub.s32 %v5600_v43, %v2702_v28 }
 0x219   : > { %3520 = vst [vmem:[%s4672_s7 + $0x10] sm:$0xff] %v3487_v18   ;;  %v2713_v43 = vmul.u32 18, %v2712_v63  ;;  %v2734_v33 = vshrl.u32 %v5679_v8, 4  ;;  %v5720_v32 = vmul.u32.u64.low 3817748708, %v5692_v35  ;;  %v5721_v37 = vmul.u32.u64.high 3817748708, %v5692_v35, %v5720_v32 }
 0x21a   : > { %v2994_v0 = vadd.f32 %v2993_v16, %v2977_v39  ;;  %v2501_v36 = vpop.f32.mrb[12].mxu0  ;;  %vm2793_vm13 = vcmp.ne.s32.totalorder %v5688_v12, 0  ;;  %vm2811_vm14 = vcmp.lt.s32.totalorder %v5688_v12, 0  ;;  %v2863_v40 = vsel %vm5698_vm11, %v2845_v23, %v5654_v49 }
 0x21b   : > { %v4170_v34 = vadd.f32 %v2501_v36, %v5510_v59  ;;  %v4126_v58 = vpop.f32.mrb[13].mxu0  ;;  %v2864_v42 = vsel %vm5708_vm12, %v2846_v24, %v5657_v20  ;;  %v2714_v44 = vsub.s32 %v5640_v41, %v2713_v43  ;;  %v2847_v10 = vadd.s32 18, %v5688_v12  ;;  %vm5734_vm15 = vmand %vm2811_vm14, %vm2793_vm13 }
 0x21c   : > { %v2504_v1 = vpop.f32.mrb[14].mxu0  ;;  %v5739_v47 = vadd.s32 128, %v5453_v60  ;;  %vm5741_vm0 = vcmp.lt.s32.totalorder %v2863_v40, 16  ;;  %vm5745_vm1 = vcmp.lt.s32.totalorder %v2864_v42, 16  ;;  %v2735_v41 = vmul.u32 18, %v2734_v33 }
 0x21d   : > { %v2933_v4 = vsel %vm2879_vm5, %v4170_v34, 0.0  ;;  %v4171_v53 = vadd.f32 %v2504_v1, %v5516_v6  ;;  %v4127_v5 = vpop.f32.mrb[15].mxu0  ;;  %vm2794_vm2 = vcmp.ne.s32.totalorder %v2714_v44, 0  ;;  %vm2812_vm3 = vcmp.lt.s32.totalorder %v2714_v44, 0 }
 0x21e   : > { %v2951_v59 = vadd.f32 %v2950_v62, %v2933_v4  ;;  %v2978_v9 = vmul.f32 %v2933_v4, %v2933_v4  ;;  %v2865_v38 = vsel %vm5734_vm15, %v2847_v10, %v5688_v12  ;;  %v2848_v57 = vadd.s32 18, %v2714_v44  ;;  %vm5765_vm5 = vmand %vm2812_vm3, %vm2794_vm2 }
 0x21f   : > { %v2934_v11 = vsel %vm2880_vm6, %v4171_v53, 0.0  ;;  %v3492_v31 = vpack.c.bf16 %v4171_v53, %v4170_v34  ;;  %vm2795_vm4 = vcmp.ne.s32.totalorder %v5732_v22, 0  ;;  %v2745_v16 = vshrl.u32 %v5714_v2, 4 }
 0x220   : > { %v2995_v48 = vadd.f32 %v2994_v0, %v2978_v9  ;;  %v2952_v6 = vadd.f32 %v2951_v59, %v2934_v11  ;;  %v2979_v52 = vmul.f32 %v2934_v11, %v2934_v11  ;;  %v5770_v4 = vsub.s32 %v5670_v55, %v2735_v41 }
 0x221   : > { %3521 = vst [vmem:[%s4672_s7 + $0x18] sm:$0xff] %v3492_v31   ;;  %v5760_v60 = vmul.u32.u64.low 3817748708, %v5739_v47  ;;  %v5761_v36 = vmul.u32.u64.high 3817748708, %v5739_v47, %v5760_v60  ;;  %v2756_v53 = vshrl.u32 %v5721_v37, 4  ;;  %vm2813_vm6 = vcmp.lt.s32.totalorder %v5732_v22, 0 }
 0x222   : > { %v2996_v14 = vadd.f32 %v2995_v48, %v2979_v52  ;;  %v2509_v54 = vpop.f32.mrb[16].mxu0  ;;  %v5776_v8 = vmul.u32.u64.low 3817748708, %v5750_v17  ;;  %v5777_v59 = vmul.u32.u64.high 3817748708, %v5750_v17, %v5776_v8  ;;  %v2866_v55 = vsel %vm5765_vm5, %v2848_v57, %v2714_v44  ;;  %vm5786_vm8 = vmand %vm2813_vm6, %vm2795_vm4 }
 0x223   : > { %v4130_v25 = vpop.f32.mrb[17].mxu0  ;;  %v2746_v31 = vmul.u32 18, %v2745_v16  ;;  %vm2883_vm7 = vcmp.lt.s32.totalorder %v2865_v38, 16  ;;  %vm2796_vm9 = vcmp.ne.s32.totalorder %v5770_v4, 0  ;;  %vm2814_vm10 = vcmp.lt.s32.totalorder %v5770_v4, 0 }
 0x224   : > { %v2512_v3 = vpop.f32.mrb[18].mxu0  ;;  %v2757_v21 = vmul.u32 18, %v2756_v53  ;;  %vm2884_vm11 = vcmp.lt.s32.totalorder %v2866_v55, 16  ;;  %v2850_v43 = vadd.s32 18, %v5770_v4  ;;  %vm5802_vm12 = vmand %vm2814_vm10, %vm2796_vm9  ;;  %v2778_v10 = vshrl.u32 %v5777_v59, 4 }
 0x225   : > { %v4131_v30 = vpop.f32.mrb[19].mxu0  ;;  %v2747_v2 = vsub.s32 %v5685_v7, %v2746_v31 }
 0x226   : > { %v2758_v7 = vsub.s32 %v5692_v35, %v2757_v21 }
 0x227   : > { %vm2797_vm13 = vcmp.ne.s32.totalorder %v2747_v2, 0  ;;  %vm2815_vm14 = vcmp.lt.s32.totalorder %v2747_v2, 0 }
 0x228   : > { %vm5814_vm3 = vmand %vm2815_vm14, %vm2797_vm13  ;;  %v2852_v60 = vadd.s32 18, %v2758_v7 }
 0x229   : > { %v1493_v15 = vpop.f32.mrb[16].mxu1 }
 0x22a   : > { %v4172_v50 = vadd.f32 %v2509_v54, %v1493_v15  ;;  %v2517_v56 = vpop.f32.mrb[20].mxu0  ;;  %v3922_v45 = vpop.f32.mrb[17].mxu1 }
 0x22b   : > { %v4134_v26 = vpop.f32.mrb[21].mxu0  ;;  %v1496_v18 = vpop.f32.mrb[18].mxu1 }
 0x22c   : > { %v2935_v62 = vsel %vm5741_vm0, %v4172_v50, 0.0  ;;  %v4173_v39 = vadd.f32 %v2512_v3, %v1496_v18  ;;  %v2520_v51 = vpop.f32.mrb[22].mxu0  ;;  %v3923_v0 = vpop.f32.mrb[19].mxu1  ;;  %v2767_v3 = vshrl.u32 %v5761_v36, 4  ;;  %vm2798_vm0 = vcmp.ne.s32.totalorder %v2758_v7, 0 }
 0x22d   : > { %v2953_v34 = vadd.f32 %v2952_v6, %v2935_v62  ;;  %v2980_v58 = vmul.f32 %v2935_v62, %v2935_v62  ;;  %v4135_v1 = vpop.f32.mrb[23].mxu0  ;;  %v2849_v6 = vadd.s32 18, %v5732_v22  ;;  %v2779_v18 = vmul.u32 18, %v2778_v10 }
 0x22e   : > { %v2936_v5 = vsel %vm5745_vm1, %v4173_v39, 0.0  ;;  %v3497_v19 = vpack.c.bf16 %v4173_v39, %v4172_v50  ;;  %v2768_v20 = vmul.u32 18, %v2767_v3  ;;  %vm2816_vm1 = vcmp.lt.s32.totalorder %v2758_v7, 0 }
 0x22f   : > { %v2997_v9 = vadd.f32 %v2996_v14, %v2980_v58  ;;  %v2954_v63 = vadd.f32 %v2953_v34, %v2936_v5  ;;  %v2981_v11 = vmul.f32 %v2936_v5, %v2936_v5  ;;  %v2867_v37 = vsel %vm5786_vm8, %v2849_v6, %v5732_v22  ;;  %vm5821_vm4 = vmand %vm2816_vm1, %vm2798_vm0 }
 0x230   : > { %3522 = vst [vmem:[%s4672_s7 + $0x20] sm:$0xff] %v3497_v19   ;;  %v2868_v22 = vsel %vm5802_vm12, %v2850_v43, %v5770_v4  ;;  %vm2885_vm15 = vcmp.lt.s32.totalorder %v2867_v37, 16  ;;  %v2769_v36 = vsub.s32 %v5739_v47, %v2768_v20  ;;  %v2780_v19 = vsub.s32 %v5750_v17, %v2779_v18 }
 0x231   : > { %v2998_v13 = vadd.f32 %v2997_v9, %v2981_v11  ;;  %v1501_v48 = vpop.f32.mrb[20].mxu1  ;;  %vm2886_vm2 = vcmp.lt.s32.totalorder %v2868_v22, 16  ;;  %v2870_v47 = vsel %vm5821_vm4, %v2852_v60, %v2758_v7 }
 0x232   : > { %v4174_v52 = vadd.f32 %v2517_v56, %v1501_v48  ;;  %v2525_v12 = vpop.f32.mrb[24].mxu0  ;;  %v3926_v54 = vpop.f32.mrb[21].mxu1  ;;  %v2851_v56 = vadd.s32 18, %v2747_v2  ;;  %vm2799_vm5 = vcmp.ne.s32.totalorder %v2769_v36, 0  ;;  %vm2817_vm6 = vcmp.lt.s32.totalorder %v2769_v36, 0 }
 0x233   : > { %v4138_v23 = vpop.f32.mrb[25].mxu0  ;;  %v1504_v24 = vpop.f32.mrb[22].mxu1  ;;  %v2853_v48 = vadd.s32 18, %v2769_v36  ;;  %vm2800_vm8 = vcmp.ne.s32.totalorder %v2780_v19, 0  ;;  %vm2818_vm9 = vcmp.lt.s32.totalorder %v2780_v19, 0  ;;  %vm2888_vm10 = vcmp.lt.s32.totalorder %v2870_v47, 16 }
 0x234   : > { %v2937_v25 = vsel %vm2883_vm7, %v4174_v52, 0.0  ;;  %v4175_v27 = vadd.f32 %v2520_v51, %v1504_v24  ;;  %v2528_v29 = vpop.f32.mrb[26].mxu0  ;;  %v3927_v61 = vpop.f32.mrb[23].mxu1  ;;  %v2869_v5 = vsel %vm5814_vm3, %v2851_v56, %v2747_v2  ;;  %v2854_v23 = vadd.s32 18, %v2780_v19  ;;  %vm2836_vm12 = vmand %vm2818_vm9, %vm2800_vm8 }
 0x235   : > { %v2955_v30 = vadd.f32 %v2954_v63, %v2937_v25  ;;  %v2982_v33 = vmul.f32 %v2937_v25, %v2937_v25  ;;  %v4139_v32 = vpop.f32.mrb[27].mxu0  ;;  %vm2887_vm7 = vcmp.lt.s32.totalorder %v2869_v5, 16 }
 0x236   : > { %v2938_v42 = vsel %vm2884_vm11, %v4175_v27, 0.0  ;;  %v3502_v44 = vpack.c.bf16 %v4175_v27, %v4174_v52  ;;  %vm5831_vm11 = vmand %vm2817_vm6, %vm2799_vm5 }
 0x237   : > { %v2999_v46 = vadd.f32 %v2998_v13, %v2982_v33  ;;  %v2956_v15 = vadd.f32 %v2955_v30, %v2938_v42  ;;  %v2983_v49 = vmul.f32 %v2938_v42, %v2938_v42  ;;  %v2871_v61 = vsel %vm5831_vm11, %v2853_v48, %v2769_v36 }
 0x238   : > { %3523 = vst [vmem:[%s4672_s7 + $0x28] sm:$0xff] %v3502_v44   ;;  %v2872_v33 = vsel %vm2836_vm12, %v2854_v23, %v2780_v19  ;;  %vm2889_vm13 = vcmp.lt.s32.totalorder %v2871_v61, 16 }
 0x239   : > { %v3000_v41 = vadd.f32 %v2999_v46, %v2983_v49  ;;  %v1509_v50 = vpop.f32.mrb[24].mxu1  ;;  %vm2890_vm14 = vcmp.lt.s32.totalorder %v2872_v33, 16 }
 0x23a   : > { %v4176_v45 = vadd.f32 %v2525_v12, %v1509_v50  ;;  %v2533_v26 = vpop.f32.mrb[28].mxu0  ;;  %v3930_v35 = vpop.f32.mrb[25].mxu1 }
 0x23b   : > { %v4142_v38 = vpop.f32.mrb[29].mxu0  ;;  %v1512_v57 = vpop.f32.mrb[26].mxu1 }
 0x23c   : > { %v2939_v62 = vsel %vm2885_vm15, %v4176_v45, 0.0  ;;  %v4177_v39 = vadd.f32 %v2528_v29, %v1512_v57  ;;  %v2536_v51 = vpop.f32.mrb[30].mxu0  ;;  %v3931_v0 = vpop.f32.mrb[27].mxu1 }
 0x23d   : > { %v2957_v34 = vadd.f32 %v2956_v15, %v2939_v62  ;;  %v2984_v58 = vmul.f32 %v2939_v62, %v2939_v62  ;;  %v4143_v1 = vpop.f32.mrb[31].mxu0  ;;  %v2945_v0 = vld [vmem:[#allocation2] sm:$0x1] }
 0x23e   : > { %v2940_v4 = vsel %vm2886_vm2, %v4177_v39, 0.0  ;;  %v3507_v53 = vpack.c.bf16 %v4177_v39, %v4176_v45 }
 0x23f   : > { %v3001_v8 = vadd.f32 %v3000_v41, %v2984_v58  ;;  %v2958_v59 = vadd.f32 %v2957_v34, %v2940_v4  ;;  %v2985_v9 = vmul.f32 %v2940_v4, %v2940_v4  ;;  %v2971_v34 = vld [vmem:[#allocation3] sm:$0x1] }
 0x240   : > { %3524 = vst [vmem:[%s4672_s7 + $0x30] sm:$0xff] %v3507_v53  }
 0x241   : > { %v3002_v63 = vadd.f32 %v3001_v8, %v2985_v9  ;;  %v1517_v11 = vpop.f32.mrb[28].mxu1 }
 0x242   : > { %v4178_v55 = vadd.f32 %v2533_v26, %v1517_v11  ;;  %v2541_v31 = vpop.f32.mrb[32].mxu0  ;;  %v3934_v13 = vpop.f32.mrb[29].mxu1 }
 0x243   : > { %v4146_v6 = vpop.f32.mrb[33].mxu0  ;;  %v1520_v17 = vpop.f32.mrb[30].mxu1 }
 0x244   : > { %v2941_v12 = vsel %vm2887_vm7, %v4178_v55, 0.0  ;;  %v4179_v54 = vadd.f32 %v2536_v51, %v1520_v17  ;;  %v2544_v14 = vpop.f32.mrb[34].mxu0  ;;  %v3935_v21 = vpop.f32.mrb[31].mxu1 }
 0x245   : > { %v2959_v24 = vadd.f32 %v2958_v59, %v2941_v12  ;;  %v2986_v43 = vmul.f32 %v2941_v12, %v2941_v12  ;;  %v4147_v25 = vpop.f32.mrb[35].mxu0 }
 0x246   : > { %v2942_v27 = vsel %vm2888_vm10, %v4179_v54, 0.0  ;;  %v3512_v29 = vpack.c.bf16 %v4179_v54, %v4178_v55 }
 0x247   : > { %v3003_v2 = vadd.f32 %v3002_v63, %v2986_v43  ;;  %v2960_v3 = vadd.f32 %v2959_v24, %v2942_v27  ;;  %v2987_v30 = vmul.f32 %v2942_v27, %v2942_v27  ;;  %v3116_v63 = vld [vmem:[%s5857_s2] sm:$0x1] (!%p3453_p5) }
 0x248   : > { %3525 = vst [vmem:[%s4672_s7 + $0x38] sm:$0xff] %v3512_v29  }
 0x249   : > { %v3004_v32 = vadd.f32 %v3003_v2, %v2987_v30  ;;  %v1525_v37 = vpop.f32.mrb[32].mxu1 }
 0x24a   : > { %v4180_v40 = vadd.f32 %v2541_v31, %v1525_v37  ;;  %v3938_v42 = vpop.f32.mrb[33].mxu1  ;;  %v3121_v31 = vld [vmem:[%s5858_s3] sm:$0x1] (!%p3453_p5) }
 0x24b   : > { %v1528_v44 = vpop.f32.mrb[34].mxu1 }
 0x24c   : > { %v2943_v7 = vsel %vm2889_vm13, %v4180_v40, 0.0  ;;  %v4181_v10 = vadd.f32 %v2544_v14, %v1528_v44  ;;  %v3939_v46 = vpop.f32.mrb[35].mxu1 }
 0x24d   : > { %v2961_v15 = vadd.f32 %v2960_v3, %v2943_v7  ;;  %v2988_v49 = vmul.f32 %v2943_v7, %v2943_v7 }
 0x24e   : > { %v2944_v22 = vsel %vm2890_vm14, %v4181_v10, 0.0  ;;  %v3517_v20 = vpack.c.bf16 %v4181_v10, %v4180_v40 }
 0x24f   : > { %v3005_v41 = vadd.f32 %v3004_v32, %v2988_v49  ;;  %v2962_v50 = vadd.f32 %v2961_v15, %v2944_v22  ;;  %v2989_v56 = vmul.f32 %v2944_v22, %v2944_v22 }
 0x250   : > { %3526 = vst [vmem:[%s4672_s7 + $0x40] sm:$0xff] %v3517_v20  }
 0x251   : > { %v2963_v45 = vrot.slane %v2962_v50, 4  ;;  %v3006_v26 = vadd.f32 %v3005_v41, %v2989_v56 }
 0x253   : > { %v2964_v35 = vadd.f32 %v2963_v45, %v2962_v50  ;;  %v3007_v18 = vrot.slane %v3006_v26, 4 }
 0x255   : > { %v2965_v38 = vrot.slane %v2964_v35, 2  ;;  %v3008_v57 = vadd.f32 %v3007_v18, %v3006_v26 }
 0x257   : > { %v2966_v16 = vadd.f32 %v2965_v38, %v2964_v35  ;;  %v3009_v62 = vrot.slane %v3008_v57, 2 }
 0x259   : > { %v2967_v39 = vrot.slane %v2966_v16, 1  ;;  %v3010_v51 = vadd.f32 %v3009_v62, %v3008_v57 }
 0x25b   : > { %v2968_v60 = vadd.f32 %v2967_v39, %v2966_v16  ;;  %v3011_v36 = vrot.slane %v3010_v51, 1  ;;  %3108 = sbr.rel (%p3453_p5) target bundleno = 643 (0x283), region = 44 }
 0x25d   : > { %v2969_v58 = vadd.f32 %v2968_v60, %v2945_v0  ;;  %v3012_v1 = vadd.f32 %v3011_v36, %v3010_v51 }
 0x25f   : > { %2970 = vst [vmem:[#allocation2] sm:$0x1] %v2969_v58  ;;  %v3013_v28 = vadd.f32 %v3012_v1, %v2971_v34 }
 0x261   : > { %3014 = vst [vmem:[#allocation3] sm:$0x1] %v3013_v28 }
 0x266   : > { %v3109_v4 = vld [vmem:[#allocation2] sm:$0x1] }
 0x267   : > { %v3110_v5 = vmul.f32 0.001953125, %v3109_v4 }
 0x268   : > { %v3111_v53 = vld [vmem:[#allocation3] sm:$0x1] }
 0x269   : > { %v3112_v19 = vmul.f32 0.001953125, %v3111_v53  ;;  %v3113_v8 = vmul.f32 %v3110_v5, %v3110_v5 }
 0x26b   : > { %v3114_v59 = vsub.f32 %v3112_v19, %v3113_v8 }
 0x26d   : > { %v3115_v9 = vmax.f32 %v3114_v59, 0.0 }
 0x26f   : > { %v3117_v47 = vadd.f32 1e-05, %v3115_v9 }
 0x271   : > { %4604 = vrsqrt.f32 %v3117_v47 }
 0x27b   : > { %v4605_v11 = vpop.eup %4604 }
 0x27c   : > { %v3119_v55 = vmul.f32 %v4605_v11, %v3116_v63 }
 0x27e   : > { %3120 = vst [vmem:[%s5860_s5] sm:$0x1] %v3119_v55  ;;  %v3122_v13 = vmul.f32 %v3119_v55, %v3110_v5 }
 0x280   : > { %v3123_v48 = vsub.f32 %v3121_v31, %v3122_v13 }
 0x282   : > { %3124 = vst [vmem:[%s5861_s6] sm:$0x1] %v3123_v48 }
 0x283 PF: > { %s17_s21 = sadd.s32 1, %s4612_s21  }
 0x284   : > { %p14_p6 = scmp.ge.s32.totalorder %s17_s21, 6  }
 0x286   :  { %16 = sbr.rel (!%p14_p6) target bundleno = 1 (0x1), region = 98 }

</bundles_post_ra>
